<compile_context>
chip_gen: v7x
topology: tpu7x:2x2x1
jax: 0.10.0
libtpu: 0.0.40
codegen_flags: <defaults>
</compile_context>

<pallas_src>
import functools
import math

import jax
import jax.numpy as jnp
from jax import lax
from jax.experimental import pallas as pl
from jax.experimental.pallas import tpu as pltpu

# bf16 operands for the big weight matmuls (recommended for v6e/v7x); set to
# jnp.float32 for exact f32 parity with the PyTorch reference.
MXU_DTYPE = jnp.bfloat16
EPS_LN = 1e-5
EPS_DEG = 1e-6


def _mxu(x):
    return x.astype(MXU_DTYPE)


def _row_layer_norm(x, gamma, beta):
    """Per-row (node/edge) nn.LayerNorm over the feature axis."""
    mean = jnp.mean(x, axis=-1, keepdims=True)
    xc = x - mean
    var = jnp.mean(xc * xc, axis=-1, keepdims=True)
    return xc * lax.rsqrt(var + EPS_LN) * gamma + beta


def _graph_layer_norm(y, gamma, beta):
    """PyG LayerNorm(mode='graph'): stats over all nodes & features per graph.

    y: (G, S, D); gamma/beta: (1, D).
    """
    denom = 1.0 / float(y.shape[1] * y.shape[2])
    mean = jnp.sum(jnp.sum(y, axis=2, keepdims=True), axis=1,
                   keepdims=True) * denom
    yc = y - mean
    var = jnp.sum(jnp.sum(yc * yc, axis=2, keepdims=True), axis=1,
                  keepdims=True) * denom
    return yc * lax.rsqrt(var + EPS_LN) * gamma + beta


# ----------------------------------------------------------------------------
# Tiling helpers
# ----------------------------------------------------------------------------

def _graphs_per_block(num_graphs, s, target_rows=256, max_rows=2048):
    """Smallest divisor Gt of num_graphs with Gt*s >= target_rows (capped)."""
    divs = [g for g in range(1, num_graphs + 1) if num_graphs % g == 0]
    ok = [g for g in divs if g * s <= max_rows]
    if not ok:
        return 1
    for g in ok:
        if g * s >= target_rows:
            return g
    return ok[-1]


def _pick_edge_tile(group_edges, target=512):
    """Largest divisor of group_edges <= target that is a multiple of 8."""
    for t in range(min(target, group_edges), 0, -1):
        if group_edges % t == 0 and (t % 8 == 0 or t == group_edges):
            return t
    return group_edges


# ----------------------------------------------------------------------------
# Kernel 1: fused GatedGCN (projection + gather + edge update + aggregation +
#           node update + norm1_local), per graph group / per edge tile.
# ----------------------------------------------------------------------------

def _gcn_fused_kernel(eoff_ref,                # scalar prefetch: edge-block offsets
                      x_ref,                   # (tn, D) node features of group
                      eattr_ref,               # (te, D) edge features of tile
                      src_ref, dst_ref,        # (te, 1) group-relative endpoints
                      nw_ref, nb_ref,          # (D, 4D), (1, 4D) fused A|B|D|E
                      cw_ref, cb_ref,          # (D, D), (1, D)   edge proj C
                      lne_g_ref, lne_b_ref,    # edge LayerNorm
                      lnx_g_ref, lnx_b_ref,    # node LayerNorm
                      n1g_ref, n1b_ref,        # norm1_local (graph mode)
                      eout_ref, h_ref,         # outputs
                      np_buf, agg_acc,         # scratch (tn, 4D), (tn, 2D)
                      *, gt, s):
    del eoff_ref  # only consumed by the index_maps
    k = pl.program_id(1)
    tn, D = x_ref.shape
    te = eattr_ref.shape[0]

    @pl.when(k == 0)
    def _():
        # Fused A|B|D|E projection for this graph group: computed once per
        # group into VMEM scratch (lane-dense 4D output, never hits HBM).
        np_buf[...] = (jnp.dot(_mxu(x_ref[...]), _mxu(nw_ref[...]),
                               preferred_element_type=jnp.float32)
                       + nb_ref[...])
        agg_acc[...] = jnp.zeros_like(agg_acc)

    node_proj = np_buf[...]                    # (tn, 4D) = [Ax | Bx | Dx | Ex]
    bx = node_proj[:, 1 * D:2 * D]
    dx = node_proj[:, 2 * D:3 * D]
    ex = node_proj[:, 3 * D:4 * D]

    # In-kernel one-hot gathers / scatter on the MXU (kept in f32 => exact).
    node_ids = lax.broadcasted_iota(jnp.int32, (te, tn), 1)
    src_oh = (node_ids == src_ref[...]).astype(jnp.float32)   # (te, tn)
    dst_oh = (node_ids == dst_ref[...]).astype(jnp.float32)   # (te, tn)

    bx_j = jnp.dot(src_oh, bx, preferred_element_type=jnp.float32)  # Bx[src]
    ex_j = jnp.dot(src_oh, ex, preferred_element_type=jnp.float32)  # Ex[src]
    dx_i = jnp.dot(dst_oh, dx, preferred_element_type=jnp.float32)  # Dx[dst]

    ce = (jnp.dot(_mxu(eattr_ref[...]), _mxu(cw_ref[...]),
                  preferred_element_type=jnp.float32) + cb_ref[...])
    e_ij = dx_i + ex_j + ce
    sig = 1.0 / (1.0 + jnp.exp(-e_ij))          # exact sigmoid gate

    # Lane-packed [msg | sig] -> single (tn, te)x(te, 2D) scatter-add pass.
    msg_sig = jnp.concatenate([sig * bx_j, sig], axis=-1)       # (te, 2D)
    agg_acc[...] += lax.dot_general(dst_oh, msg_sig,
                                    (((0,), (0,)), ((), ())),
                                    preferred_element_type=jnp.float32)

    # Edge update: e_out = e_in + relu(LayerNorm(e_ij))   (GatedGCN order).
    eout_ref[...] = eattr_ref[...] + jnp.maximum(
        _row_layer_norm(e_ij, lne_g_ref[...], lne_b_ref[...]), 0.0)

    @pl.when(k == pl.num_programs(1) - 1)
    def _():
        acc = agg_acc[...]
        ax = np_buf[:, 0:D]
        x_agg = ax + acc[:, 0:D] / (acc[:, D:2 * D] + EPS_DEG)  # exact divide
        h_local = x_ref[...] + jnp.maximum(
            _row_layer_norm(x_agg, lnx_g_ref[...], lnx_b_ref[...]), 0.0)
        # norm1_local: graph-mode LayerNorm; statistics per graph in the group.
        out = _graph_layer_norm(h_local.reshape(gt, s, D),
                                n1g_ref[...], n1b_ref[...])
        h_ref[...] = out.reshape(gt * s, D)


def gatedgcn_local(x, edge_attr, src, dst, gcn_p, n1_g, n1_b, *,
                   num_graphs, nodes_per_graph, graphs_per_block,
                   edge_tile=512):
    N, D = x.shape
    E = edge_attr.shape[0]
    S = nodes_per_graph
    Gt = graphs_per_block
    assert N == num_graphs * S
    # TODO(synk): equal-sized, batch-sorted graphs assumed; ragged graphs need
    # per-graph edge counts (scalar-prefetched) and edge padding per group.
    assert E % num_graphs == 0
    Eg = E // num_graphs
    num_groups = num_graphs // Gt
    tn = Gt * S
    ge = Gt * Eg                               # contiguous edges per group
    te = _pick_edge_tile(ge, edge_tile)
    blocks_per_group = ge // te
    assert te % 8 == 0 or te == E              # BlockSpec (8,128) rule

    # Group-relative endpoint indices (batch-sorted => contiguous groups).
    edge_pos = jnp.arange(E, dtype=jnp.int32)
    base = ((edge_pos // Eg) // Gt) * tn
    src_rel = (src.astype(jnp.int32) - base).reshape(E, 1)
    dst_rel = (dst.astype(jnp.int32) - base).reshape(E, 1)
    # Per-group starting edge-block index (scalar prefetch -> SMEM).
    eoff = jnp.arange(num_groups, dtype=jnp.int32) * blocks_per_group

    node_spec = pl.BlockSpec((tn, D), lambda g, k, eo: (g, 0))
    edge_spec = pl.BlockSpec((te, D), lambda g, k, eo: (eo[g] + k, 0))
    idx_spec = pl.BlockSpec((te, 1), lambda g, k, eo: (eo[g] + k, 0))

    def pin(shape):
        return pl.BlockSpec(shape, lambda g, k, eo: tuple(0 for _ in shape))

    kern = functools.partial(_gcn_fused_kernel, gt=Gt, s=S)
    e_out, h_local = pl.pallas_call(
        kern,
        out_shape=(jax.ShapeDtypeStruct((E, D), jnp.float32),
                   jax.ShapeDtypeStruct((N, D), jnp.float32)),
        grid_spec=pltpu.PrefetchScalarGridSpec(
            num_scalar_prefetch=1,
            grid=(num_groups, blocks_per_group),
            in_specs=[node_spec, edge_spec, idx_spec, idx_spec,
                      pin((D, 4 * D)), pin((1, 4 * D)),
                      pin((D, D)), pin((1, D)),
                      pin((1, D)), pin((1, D)),
                      pin((1, D)), pin((1, D)),
                      pin((1, D)), pin((1, D))],
            out_specs=(edge_spec, node_spec),
            scratch_shapes=[pltpu.VMEM((tn, 4 * D), jnp.float32),
                            pltpu.VMEM((tn, 2 * D), jnp.float32)]),
        compiler_params=pltpu.CompilerParams(
            dimension_semantics=("parallel", "arbitrary")),
    )(eoff, x, edge_attr, src_rel, dst_rel,
      gcn_p["node_w"], gcn_p["node_b"].reshape(1, 4 * D),
      gcn_p["C_w"], gcn_p["C_b"].reshape(1, D),
      gcn_p["ln_e_g"].reshape(1, D), gcn_p["ln_e_b"].reshape(1, D),
      gcn_p["ln_x_g"].reshape(1, D), gcn_p["ln_x_b"].reshape(1, D),
      n1_g.reshape(1, D), n1_b.reshape(1, D))
    return h_local, e_out


# ----------------------------------------------------------------------------
# Kernel 2: fused self-attention block over batched graph groups
#           (per-head QKV + attention + accumulated out-proj + residual +
#            norm1_attn)
# ----------------------------------------------------------------------------

def _attn_block_kernel(x_ref, wq_ref, wk_ref, wv_ref, bq_ref, bk_ref, bv_ref,
                       wo_ref, ob_ref, ng_ref, nb_ref, o_ref,
                       *, num_heads, scale):
    gt, s, D = x_ref.shape
    x3 = x_ref[...]                          # (Gt, S, D)
    x2 = x3.reshape(gt * s, D)               # fill the MXU M dimension
    x2m = _mxu(x2)

    # TODO(synk): key_padding_mask dropped -- valid only for equal-sized,
    # fully-valid batch-sorted graphs; ragged graphs need a -inf score bias.
    acc = jnp.zeros((gt * s, D), jnp.float32)
    for h in range(num_heads):               # static unroll; per-head WEIGHT
        qh = (jnp.dot(x2m, _mxu(wq_ref[h]),  # slices, no activation lane slices
                      preferred_element_type=jnp.float32) + bq_ref[h]) * scale
        kh = jnp.dot(x2m, _mxu(wk_ref[h]),
                     preferred_element_type=jnp.float32) + bk_ref[h]
        vh = jnp.dot(x2m, _mxu(wv_ref[h]),
                     preferred_element_type=jnp.float32) + bv_ref[h]
        dh = qh.shape[-1]
        q3 = qh.reshape(gt, s, dh)
        k3 = kh.reshape(gt, s, dh)
        v3 = vh.reshape(gt, s, dh)
        sc = jnp.einsum('gqe,gke->gqk', q3, k3,
                        preferred_element_type=jnp.float32)      # (Gt, S, S)
        sc = sc - jnp.max(sc, axis=-1, keepdims=True)
        p = jnp.exp(sc)
        p = p / jnp.sum(p, axis=-1, keepdims=True)               # exact softmax
        oh = jnp.einsum('gqk,gke->gqe', p, v3,
                        preferred_element_type=jnp.float32)      # (Gt, S, dh)
        # Accumulate the out-projection per head (no concat of head outputs).
        acc = acc + jnp.dot(_mxu(oh.reshape(gt * s, dh)), _mxu(wo_ref[h]),
                            preferred_element_type=jnp.float32)

    h_attn = acc + ob_ref[...]
    y = x2 + h_attn                          # residual with h_in1
    o_ref[...] = _graph_layer_norm(y.reshape(gt, s, D),
                                   ng_ref[...], nb_ref[...])


def attn_block(x_dense, attn_p, n_g, n_b, *, num_heads, graphs_per_block):
    B, S, D = x_dense.shape
    Gt = graphs_per_block
    H = num_heads
    dh = D // H
    scale = 1.0 / math.sqrt(dh)

    # Split the packed in/out projections per head ONCE, outside the hot loop.
    in_w = attn_p["in_w"]                    # (D, 3D): qkv = x @ in_w + in_b
    in_b = attn_p["in_b"]
    wq = in_w[:, 0:D].reshape(D, H, dh).transpose(1, 0, 2)       # (H, D, dh)
    wk = in_w[:, D:2 * D].reshape(D, H, dh).transpose(1, 0, 2)
    wv = in_w[:, 2 * D:3 * D].reshape(D, H, dh).transpose(1, 0, 2)
    bq = in_b[0:D].reshape(H, 1, dh)
    bk = in_b[D:2 * D].reshape(H, 1, dh)
    bv = in_b[2 * D:3 * D].reshape(H, 1, dh)
    wo = attn_p["out_w"].reshape(H, dh, D)                       # (H, dh, D)
    ob = attn_p["out_b"].reshape(1, D)

    blk = pl.BlockSpec((Gt, S, D), lambda b: (b, 0, 0))

    def pin(shape):
        return pl.BlockSpec(shape, lambda b: tuple(0 for _ in shape))

    kern = functools.partial(_attn_block_kernel, num_heads=H, scale=scale)
    return pl.pallas_call(
        kern,
        out_shape=jax.ShapeDtypeStruct((B, S, D), jnp.float32),
        grid=(B // Gt,),
        in_specs=[blk,
                  pin((H, D, dh)), pin((H, D, dh)), pin((H, D, dh)),
                  pin((H, 1, dh)), pin((H, 1, dh)), pin((H, 1, dh)),
                  pin((H, dh, D)), pin((1, D)), pin((1, D)), pin((1, D))],
        out_specs=blk,
        compiler_params=pltpu.CompilerParams(
            dimension_semantics=("parallel",)),
    )(x_dense, wq, wk, wv, bq, bk, bv, wo, ob,
      n_g.reshape(1, D), n_b.reshape(1, D))


# ----------------------------------------------------------------------------
# Kernel 3: combine + FF block + residual + norm2, over batched graph groups
# ----------------------------------------------------------------------------

def _ff_block_kernel(hl_ref, ha_ref, w1_ref, b1_ref, w2_ref, b2_ref,
                     g_ref, b_ref, o_ref):
    gt, s, D = hl_ref.shape
    h3 = hl_ref[...] + ha_ref[...]           # h_local + h_attn
    h = h3.reshape(gt * s, D)
    t = jnp.maximum(
        jnp.dot(_mxu(h), _mxu(w1_ref[...]),
                preferred_element_type=jnp.float32) + b1_ref[...], 0.0)
    y = h + (jnp.dot(_mxu(t), _mxu(w2_ref[...]),
                     preferred_element_type=jnp.float32) + b2_ref[...])
    o_ref[...] = _graph_layer_norm(y.reshape(gt, s, D),
                                   g_ref[...], b_ref[...])


def ff_block(hl_dense, ha_dense, w1, b1, w2, b2, n_g, n_b, *,
             graphs_per_block):
    B, S, D = hl_dense.shape
    Hd = w1.shape[1]
    Gt = graphs_per_block
    blk = pl.BlockSpec((Gt, S, D), lambda b: (b, 0, 0))

    def pin(shape):
        return pl.BlockSpec(shape, lambda b: tuple(0 for _ in shape))

    return pl.pallas_call(
        _ff_block_kernel,
        out_shape=jax.ShapeDtypeStruct((B, S, D), jnp.float32),
        grid=(B // Gt,),
        in_specs=[blk, blk, pin((D, Hd)), pin((1, Hd)), pin((Hd, D)),
                  pin((1, D)), pin((1, D)), pin((1, D))],
        out_specs=blk,
        compiler_params=pltpu.CompilerParams(
            dimension_semantics=("parallel",)),
    )(hl_dense, ha_dense, w1, b1.reshape(1, Hd), w2, b2.reshape(1, D),
      n_g.reshape(1, D), n_b.reshape(1, D))


# ----------------------------------------------------------------------------
# GPSLayer forward (thin JAX glue; all hot paths live in the kernels above)
# ----------------------------------------------------------------------------

def gps_layer_forward(params, x, edge_index, edge_attr, *, num_graphs,
                      nodes_per_graph, num_heads):
    N, D = x.shape
    S = nodes_per_graph
    Gt = _graphs_per_block(num_graphs, S)
    src = edge_index[0]
    dst = edge_index[1]

    # ----- local model: fused GatedGCN (+ norm1_local) -----
    h_local, e_out = gatedgcn_local(
        x, edge_attr, src, dst, params["gcn"],
        params["norm1_local_g"], params["norm1_local_b"],
        num_graphs=num_graphs, nodes_per_graph=S, graphs_per_block=Gt)

    # ----- global model: fused MHA block (+ residual + norm1_attn) -----
    # Equal-sized, batch-sorted graphs => to_dense_batch == reshape.
    x_dense = x.reshape(num_graphs, S, D)
    h_attn_dense = attn_block(
        x_dense, params["attn"],
        params["norm1_attn_g"], params["norm1_attn_b"],
        num_heads=num_heads, graphs_per_block=Gt)

    # ----- combine + FF block + norm2 (fused) -----
    # TODO(synk): dropout layers omitted (p = 0.0 -> identity).
    hl_dense = h_local.reshape(num_graphs, S, D)
    h_dense = ff_block(hl_dense, h_attn_dense,
                       params["ff1_w"], params["ff1_b"],
                       params["ff2_w"], params["ff2_b"],
                       params["norm2_g"], params["norm2_b"],
                       graphs_per_block=Gt)
    return h_dense.reshape(N, D), e_out


# ----------------------------------------------------------------------------
# Deterministic parameter init (shapes follow the module __init__)
# ----------------------------------------------------------------------------

def init_params(key, dim_h):
    D = dim_h
    ks = jax.random.split(key, 16)

    def w(k, shape, scale=0.1):
        return (scale * jax.random.normal(k, shape)).astype(jnp.float32)

    # A|B|D|E node projections concatenated along the output dim: (D, 4D).
    node_w = jnp.concatenate(
        [w(ks[0], (D, D)), w(ks[1], (D, D)),
         w(ks[3], (D, D)), w(ks[4], (D, D))], axis=1)
    return {
        "gcn": {
            "node_w": node_w,
            "node_b": jnp.zeros((4 * D,), jnp.float32),
            "C_w": w(ks[2], (D, D)), "C_b": jnp.zeros((D,), jnp.float32),
            "ln_x_g": jnp.ones((D,), jnp.float32),
            "ln_x_b": jnp.zeros((D,), jnp.float32),
            "ln_e_g": jnp.ones((D,), jnp.float32),
            "ln_e_b": jnp.zeros((D,), jnp.float32),
        },
        "attn": {
            "in_w": w(ks[5], (D, 3 * D)),
            "in_b": jnp.zeros((3 * D,), jnp.float32),
            "out_w": w(ks[6], (D, D)),
            "out_b": jnp.zeros((D,), jnp.float32),
        },
        "norm1_local_g": jnp.ones((D,), jnp.float32),
        "norm1_local_b": jnp.zeros((D,), jnp.float32),
        "norm1_attn_g": jnp.ones((D,), jnp.float32),
        "norm1_attn_b": jnp.zeros((D,), jnp.float32),
        "norm2_g": jnp.ones((D,), jnp.float32),
        "norm2_b": jnp.zeros((D,), jnp.float32),
        # FF weights stored pre-transposed: (in, out)
        "ff1_w": w(ks[7], (D, 2 * D), scale=math.sqrt(2.0 / D)),
        "ff1_b": jnp.zeros((2 * D,), jnp.float32),
        "ff2_w": w(ks[8], (2 * D, D), scale=math.sqrt(2.0 / (2 * D))),
        "ff2_b": jnp.zeros((D,), jnp.float32),
    }


if __name__ == "__main__":
    DIM_H = 32
    NUM_HEADS = 4
    NUM_GRAPHS = 2
    NODES_PER_GRAPH = 8            # equal-sized graphs -> dense mask all-valid
    N = NUM_GRAPHS * NODES_PER_GRAPH

    key = jax.random.PRNGKey(0)
    k_param, k_x, k_e = jax.random.split(key, 3)
    params = init_params(k_param, DIM_H)

    # Bidirectional ring edges inside each graph (batch-sorted edge list).
    src_list, dst_list = [], []
    for gi in range(NUM_GRAPHS):
        base = gi * NODES_PER_GRAPH
        for i in range(NODES_PER_GRAPH):
            s_ = base + i
            d_ = base + (i + 1) % NODES_PER_GRAPH
            src_list += [s_, d_]
            dst_list += [d_, s_]
    edge_index = jnp.array([src_list, dst_list], dtype=jnp.int32)   # (2, E)
    E = edge_index.shape[1]

    x = jax.random.normal(k_x, (N, DIM_H), dtype=jnp.float32)
    edge_attr = jax.random.normal(k_e, (E, DIM_H), dtype=jnp.float32)

    fwd = jax.jit(functools.partial(
        gps_layer_forward, num_graphs=NUM_GRAPHS,
        nodes_per_graph=NODES_PER_GRAPH, num_heads=NUM_HEADS))
    h_out, e_out = fwd(params, x, edge_index, edge_attr)
    jax.block_until_ready((h_out, e_out))

    assert h_out.shape == (N, DIM_H) and e_out.shape == (E, DIM_H)
    assert bool(jnp.all(jnp.isfinite(h_out))) and bool(jnp.all(jnp.isfinite(e_out)))
    print("KERNEL_OK")
</pallas_src>

<mosaic_0001>
module attributes {stable_mosaic.version = 11 : i64} {
  func.func @_attn_block_kernel(%arg0: i32, %arg1: memref<2x8x32xf32, #tpu.memory_space<vmem>>, %arg2: memref<4x32x8xf32, #tpu.memory_space<vmem>>, %arg3: memref<4x32x8xf32, #tpu.memory_space<vmem>>, %arg4: memref<4x32x8xf32, #tpu.memory_space<vmem>>, %arg5: memref<4x1x8xf32, #tpu.memory_space<vmem>>, %arg6: memref<4x1x8xf32, #tpu.memory_space<vmem>>, %arg7: memref<4x1x8xf32, #tpu.memory_space<vmem>>, %arg8: memref<4x8x32xf32, #tpu.memory_space<vmem>>, %arg9: memref<1x32xf32, #tpu.memory_space<vmem>>, %arg10: memref<1x32xf32, #tpu.memory_space<vmem>>, %arg11: memref<1x32xf32, #tpu.memory_space<vmem>>, %arg12: memref<2x8x32xf32, #tpu.memory_space<vmem>>) attributes {dimension_semantics = [#tpu.dimension_semantics<parallel>], iteration_bounds = array<i64: 1>, scalar_prefetch = 0 : i64, scratch_operands = 0 : i64, tpu.core_type = #tpu.core_type<tc>, window_params = [{transform_indices = @transform_0, window_bounds = array<i64: 2, 8, 32>}, {pipeline_mode = #tpu.pipeline_mode<synchronous>, transform_indices = @transform_1, window_bounds = array<i64: 4, 32, 8>}, {pipeline_mode = #tpu.pipeline_mode<synchronous>, transform_indices = @transform_2, window_bounds = array<i64: 4, 32, 8>}, {pipeline_mode = #tpu.pipeline_mode<synchronous>, transform_indices = @transform_3, window_bounds = array<i64: 4, 32, 8>}, {pipeline_mode = #tpu.pipeline_mode<synchronous>, transform_indices = @transform_4, window_bounds = array<i64: 4, 1, 8>}, {pipeline_mode = #tpu.pipeline_mode<synchronous>, transform_indices = @transform_5, window_bounds = array<i64: 4, 1, 8>}, {pipeline_mode = #tpu.pipeline_mode<synchronous>, transform_indices = @transform_6, window_bounds = array<i64: 4, 1, 8>}, {pipeline_mode = #tpu.pipeline_mode<synchronous>, transform_indices = @transform_7, window_bounds = array<i64: 4, 8, 32>}, {pipeline_mode = #tpu.pipeline_mode<synchronous>, transform_indices = @transform_8, window_bounds = array<i64: 1, 32>}, {pipeline_mode = #tpu.pipeline_mode<synchronous>, transform_indices = @transform_9, window_bounds = array<i64: 1, 32>}, {pipeline_mode = #tpu.pipeline_mode<synchronous>, transform_indices = @transform_10, window_bounds = array<i64: 1, 32>}, {transform_indices = @transform_11, window_bounds = array<i64: 2, 8, 32>}]} {
    %c0 = arith.constant 0 : index
    %c0_0 = arith.constant 0 : index
    %c0_1 = arith.constant 0 : index
    %0 = vector.load %arg1[%c0, %c0_0, %c0_1] : memref<2x8x32xf32, #tpu.memory_space<vmem>>, vector<2x8x32xf32>
    %1 = vector.shape_cast %0 : vector<2x8x32xf32> to vector<16x32xf32>
    %2 = arith.truncf %1 : vector<16x32xf32> to vector<16x32xbf16>
    %cst = arith.constant 0.000000e+00 : f32
    %3 = vector.broadcast %cst : f32 to vector<16x32xf32>
    %c0_2 = arith.constant 0 : index
    %c0_3 = arith.constant 0 : index
    %c0_4 = arith.constant 0 : index
    %4 = vector.load %arg2[%c0_2, %c0_3, %c0_4] : memref<4x32x8xf32, #tpu.memory_space<vmem>>, vector<1x32x8xf32>
    %5 = vector.shape_cast %4 : vector<1x32x8xf32> to vector<32x8xf32>
    %6 = arith.truncf %5 : vector<32x8xf32> to vector<32x8xbf16>
    %cst_5 = arith.constant dense<0.000000e+00> : vector<16x8xf32>
    %7 = tpu.matmul %2, %6, %cst_5 {dimension_numbers = #tpu.dot_dimension_numbers<[1], [0], [0], [1], [0, 0, 1, 1], [], []>} : vector<16x32xbf16>, vector<32x8xbf16>, vector<16x8xf32> -> vector<16x8xf32>
    %c0_6 = arith.constant 0 : index
    %c0_7 = arith.constant 0 : index
    %c0_8 = arith.constant 0 : index
    %8 = vector.load %arg5[%c0_6, %c0_7, %c0_8] : memref<4x1x8xf32, #tpu.memory_space<vmem>>, vector<1x1x8xf32>
    %9 = vector.shape_cast %8 : vector<1x1x8xf32> to vector<1x8xf32>
    %10 = vector.broadcast %9 : vector<1x8xf32> to vector<16x8xf32>
    %11 = arith.addf %7, %10 : vector<16x8xf32>
    %cst_9 = arith.constant 0.353553385 : f32
    %12 = vector.broadcast %cst_9 : f32 to vector<16x8xf32>
    %13 = arith.mulf %11, %12 : vector<16x8xf32>
    %c0_10 = arith.constant 0 : index
    %c0_11 = arith.constant 0 : index
    %c0_12 = arith.constant 0 : index
    %14 = vector.load %arg3[%c0_10, %c0_11, %c0_12] : memref<4x32x8xf32, #tpu.memory_space<vmem>>, vector<1x32x8xf32>
    %15 = vector.shape_cast %14 : vector<1x32x8xf32> to vector<32x8xf32>
    %16 = arith.truncf %15 : vector<32x8xf32> to vector<32x8xbf16>
    %cst_13 = arith.constant dense<0.000000e+00> : vector<16x8xf32>
    %17 = tpu.matmul %2, %16, %cst_13 {dimension_numbers = #tpu.dot_dimension_numbers<[1], [0], [0], [1], [0, 0, 1, 1], [], []>} : vector<16x32xbf16>, vector<32x8xbf16>, vector<16x8xf32> -> vector<16x8xf32>
    %c0_14 = arith.constant 0 : index
    %c0_15 = arith.constant 0 : index
    %c0_16 = arith.constant 0 : index
    %18 = vector.load %arg6[%c0_14, %c0_15, %c0_16] : memref<4x1x8xf32, #tpu.memory_space<vmem>>, vector<1x1x8xf32>
    %19 = vector.shape_cast %18 : vector<1x1x8xf32> to vector<1x8xf32>
    %20 = vector.broadcast %19 : vector<1x8xf32> to vector<16x8xf32>
    %21 = arith.addf %17, %20 : vector<16x8xf32>
    %c0_17 = arith.constant 0 : index
    %c0_18 = arith.constant 0 : index
    %c0_19 = arith.constant 0 : index
    %22 = vector.load %arg4[%c0_17, %c0_18, %c0_19] : memref<4x32x8xf32, #tpu.memory_space<vmem>>, vector<1x32x8xf32>
    %23 = vector.shape_cast %22 : vector<1x32x8xf32> to vector<32x8xf32>
    %24 = arith.truncf %23 : vector<32x8xf32> to vector<32x8xbf16>
    %cst_20 = arith.constant dense<0.000000e+00> : vector<16x8xf32>
    %25 = tpu.matmul %2, %24, %cst_20 {dimension_numbers = #tpu.dot_dimension_numbers<[1], [0], [0], [1], [0, 0, 1, 1], [], []>} : vector<16x32xbf16>, vector<32x8xbf16>, vector<16x8xf32> -> vector<16x8xf32>
    %c0_21 = arith.constant 0 : index
    %c0_22 = arith.constant 0 : index
    %c0_23 = arith.constant 0 : index
    %26 = vector.load %arg7[%c0_21, %c0_22, %c0_23] : memref<4x1x8xf32, #tpu.memory_space<vmem>>, vector<1x1x8xf32>
    %27 = vector.shape_cast %26 : vector<1x1x8xf32> to vector<1x8xf32>
    %28 = vector.broadcast %27 : vector<1x8xf32> to vector<16x8xf32>
    %29 = arith.addf %25, %28 : vector<16x8xf32>
    %30 = vector.shape_cast %13 : vector<16x8xf32> to vector<2x8x8xf32>
    %31 = vector.shape_cast %21 : vector<16x8xf32> to vector<2x8x8xf32>
    %32 = vector.shape_cast %29 : vector<16x8xf32> to vector<2x8x8xf32>
    "tpu.trace_start"() <{level = 10 : i32, message = "gqe,gke->gqk"}> : () -> ()
    %cst_24 = arith.constant dense<0.000000e+00> : vector<2x8x8xf32>
    %33 = tpu.matmul %30, %31, %cst_24 {dimension_numbers = #tpu.dot_dimension_numbers<[2], [2], [1], [1], [0, 0, 0, 1, 1, 1], [0], [0]>} : vector<2x8x8xf32>, vector<2x8x8xf32>, vector<2x8x8xf32> -> vector<2x8x8xf32>
    "tpu.trace_stop"() : () -> ()
    %cst_25 = arith.constant dense<0xFF800000> : vector<2x8xf32>
    %34 = vector.multi_reduction <maximumf>, %33, %cst_25 [2] : vector<2x8x8xf32> to vector<2x8xf32>
    %35 = vector.shape_cast %34 : vector<2x8xf32> to vector<2x8x1xf32>
    %36 = vector.broadcast %35 : vector<2x8x1xf32> to vector<2x8x8xf32>
    %37 = arith.subf %33, %36 : vector<2x8x8xf32>
    %38 = math.exp %37 : vector<2x8x8xf32>
    %cst_26 = arith.constant dense<0.000000e+00> : vector<2x8xf32>
    %39 = vector.multi_reduction <add>, %38, %cst_26 [2] : vector<2x8x8xf32> to vector<2x8xf32>
    %40 = vector.shape_cast %39 : vector<2x8xf32> to vector<2x8x1xf32>
    %41 = vector.broadcast %40 : vector<2x8x1xf32> to vector<2x8x8xf32>
    %42 = arith.divf %38, %41 : vector<2x8x8xf32>
    "tpu.trace_start"() <{level = 10 : i32, message = "gqk,gke->gqe"}> : () -> ()
    %cst_27 = arith.constant dense<0.000000e+00> : vector<2x8x8xf32>
    %43 = tpu.matmul %42, %32, %cst_27 {dimension_numbers = #tpu.dot_dimension_numbers<[2], [1], [1], [2], [0, 0, 0, 1, 1, 2], [0], [0]>} : vector<2x8x8xf32>, vector<2x8x8xf32>, vector<2x8x8xf32> -> vector<2x8x8xf32>
    "tpu.trace_stop"() : () -> ()
    %44 = vector.shape_cast %43 : vector<2x8x8xf32> to vector<16x8xf32>
    %45 = arith.truncf %44 : vector<16x8xf32> to vector<16x8xbf16>
    %c0_28 = arith.constant 0 : index
    %c0_29 = arith.constant 0 : index
    %c0_30 = arith.constant 0 : index
    %46 = vector.load %arg8[%c0_28, %c0_29, %c0_30] : memref<4x8x32xf32, #tpu.memory_space<vmem>>, vector<1x8x32xf32>
    %47 = vector.shape_cast %46 : vector<1x8x32xf32> to vector<8x32xf32>
    %48 = arith.truncf %47 : vector<8x32xf32> to vector<8x32xbf16>
    %cst_31 = arith.constant dense<0.000000e+00> : vector<16x32xf32>
    %49 = tpu.matmul %45, %48, %cst_31 {dimension_numbers = #tpu.dot_dimension_numbers<[1], [0], [0], [1], [0, 0, 1, 1], [], []>} : vector<16x8xbf16>, vector<8x32xbf16>, vector<16x32xf32> -> vector<16x32xf32>
    %50 = arith.addf %3, %49 : vector<16x32xf32>
    %c1 = arith.constant 1 : index
    %c0_32 = arith.constant 0 : index
    %c0_33 = arith.constant 0 : index
    %51 = vector.load %arg2[%c1, %c0_32, %c0_33] : memref<4x32x8xf32, #tpu.memory_space<vmem>>, vector<1x32x8xf32>
    %52 = vector.shape_cast %51 : vector<1x32x8xf32> to vector<32x8xf32>
    %53 = arith.truncf %52 : vector<32x8xf32> to vector<32x8xbf16>
    %cst_34 = arith.constant dense<0.000000e+00> : vector<16x8xf32>
    %54 = tpu.matmul %2, %53, %cst_34 {dimension_numbers = #tpu.dot_dimension_numbers<[1], [0], [0], [1], [0, 0, 1, 1], [], []>} : vector<16x32xbf16>, vector<32x8xbf16>, vector<16x8xf32> -> vector<16x8xf32>
    %c1_35 = arith.constant 1 : index
    %c0_36 = arith.constant 0 : index
    %c0_37 = arith.constant 0 : index
    %55 = vector.load %arg5[%c1_35, %c0_36, %c0_37] : memref<4x1x8xf32, #tpu.memory_space<vmem>>, vector<1x1x8xf32>
    %56 = vector.shape_cast %55 : vector<1x1x8xf32> to vector<1x8xf32>
    %57 = vector.broadcast %56 : vector<1x8xf32> to vector<16x8xf32>
    %58 = arith.addf %54, %57 : vector<16x8xf32>
    %cst_38 = arith.constant 0.353553385 : f32
    %59 = vector.broadcast %cst_38 : f32 to vector<16x8xf32>
    %60 = arith.mulf %58, %59 : vector<16x8xf32>
    %c1_39 = arith.constant 1 : index
    %c0_40 = arith.constant 0 : index
    %c0_41 = arith.constant 0 : index
    %61 = vector.load %arg3[%c1_39, %c0_40, %c0_41] : memref<4x32x8xf32, #tpu.memory_space<vmem>>, vector<1x32x8xf32>
    %62 = vector.shape_cast %61 : vector<1x32x8xf32> to vector<32x8xf32>
    %63 = arith.truncf %62 : vector<32x8xf32> to vector<32x8xbf16>
    %cst_42 = arith.constant dense<0.000000e+00> : vector<16x8xf32>
    %64 = tpu.matmul %2, %63, %cst_42 {dimension_numbers = #tpu.dot_dimension_numbers<[1], [0], [0], [1], [0, 0, 1, 1], [], []>} : vector<16x32xbf16>, vector<32x8xbf16>, vector<16x8xf32> -> vector<16x8xf32>
    %c1_43 = arith.constant 1 : index
    %c0_44 = arith.constant 0 : index
    %c0_45 = arith.constant 0 : index
    %65 = vector.load %arg6[%c1_43, %c0_44, %c0_45] : memref<4x1x8xf32, #tpu.memory_space<vmem>>, vector<1x1x8xf32>
    %66 = vector.shape_cast %65 : vector<1x1x8xf32> to vector<1x8xf32>
    %67 = vector.broadcast %66 : vector<1x8xf32> to vector<16x8xf32>
    %68 = arith.addf %64, %67 : vector<16x8xf32>
    %c1_46 = arith.constant 1 : index
    %c0_47 = arith.constant 0 : index
    %c0_48 = arith.constant 0 : index
    %69 = vector.load %arg4[%c1_46, %c0_47, %c0_48] : memref<4x32x8xf32, #tpu.memory_space<vmem>>, vector<1x32x8xf32>
    %70 = vector.shape_cast %69 : vector<1x32x8xf32> to vector<32x8xf32>
    %71 = arith.truncf %70 : vector<32x8xf32> to vector<32x8xbf16>
    %cst_49 = arith.constant dense<0.000000e+00> : vector<16x8xf32>
    %72 = tpu.matmul %2, %71, %cst_49 {dimension_numbers = #tpu.dot_dimension_numbers<[1], [0], [0], [1], [0, 0, 1, 1], [], []>} : vector<16x32xbf16>, vector<32x8xbf16>, vector<16x8xf32> -> vector<16x8xf32>
    %c1_50 = arith.constant 1 : index
    %c0_51 = arith.constant 0 : index
    %c0_52 = arith.constant 0 : index
    %73 = vector.load %arg7[%c1_50, %c0_51, %c0_52] : memref<4x1x8xf32, #tpu.memory_space<vmem>>, vector<1x1x8xf32>
    %74 = vector.shape_cast %73 : vector<1x1x8xf32> to vector<1x8xf32>
    %75 = vector.broadcast %74 : vector<1x8xf32> to vector<16x8xf32>
    %76 = arith.addf %72, %75 : vector<16x8xf32>
    %77 = vector.shape_cast %60 : vector<16x8xf32> to vector<2x8x8xf32>
    %78 = vector.shape_cast %68 : vector<16x8xf32> to vector<2x8x8xf32>
    %79 = vector.shape_cast %76 : vector<16x8xf32> to vector<2x8x8xf32>
    "tpu.trace_start"() <{level = 10 : i32, message = "gqe,gke->gqk"}> : () -> ()
    %cst_53 = arith.constant dense<0.000000e+00> : vector<2x8x8xf32>
    %80 = tpu.matmul %77, %78, %cst_53 {dimension_numbers = #tpu.dot_dimension_numbers<[2], [2], [1], [1], [0, 0, 0, 1, 1, 1], [0], [0]>} : vector<2x8x8xf32>, vector<2x8x8xf32>, vector<2x8x8xf32> -> vector<2x8x8xf32>
    "tpu.trace_stop"() : () -> ()
    %cst_54 = arith.constant dense<0xFF800000> : vector<2x8xf32>
    %81 = vector.multi_reduction <maximumf>, %80, %cst_54 [2] : vector<2x8x8xf32> to vector<2x8xf32>
    %82 = vector.shape_cast %81 : vector<2x8xf32> to vector<2x8x1xf32>
    %83 = vector.broadcast %82 : vector<2x8x1xf32> to vector<2x8x8xf32>
    %84 = arith.subf %80, %83 : vector<2x8x8xf32>
    %85 = math.exp %84 : vector<2x8x8xf32>
    %cst_55 = arith.constant dense<0.000000e+00> : vector<2x8xf32>
    %86 = vector.multi_reduction <add>, %85, %cst_55 [2] : vector<2x8x8xf32> to vector<2x8xf32>
    %87 = vector.shape_cast %86 : vector<2x8xf32> to vector<2x8x1xf32>
    %88 = vector.broadcast %87 : vector<2x8x1xf32> to vector<2x8x8xf32>
    %89 = arith.divf %85, %88 : vector<2x8x8xf32>
    "tpu.trace_start"() <{level = 10 : i32, message = "gqk,gke->gqe"}> : () -> ()
    %cst_56 = arith.constant dense<0.000000e+00> : vector<2x8x8xf32>
    %90 = tpu.matmul %89, %79, %cst_56 {dimension_numbers = #tpu.dot_dimension_numbers<[2], [1], [1], [2], [0, 0, 0, 1, 1, 2], [0], [0]>} : vector<2x8x8xf32>, vector<2x8x8xf32>, vector<2x8x8xf32> -> vector<2x8x8xf32>
    "tpu.trace_stop"() : () -> ()
    %91 = vector.shape_cast %90 : vector<2x8x8xf32> to vector<16x8xf32>
    %92 = arith.truncf %91 : vector<16x8xf32> to vector<16x8xbf16>
    %c1_57 = arith.constant 1 : index
    %c0_58 = arith.constant 0 : index
    %c0_59 = arith.constant 0 : index
    %93 = vector.load %arg8[%c1_57, %c0_58, %c0_59] : memref<4x8x32xf32, #tpu.memory_space<vmem>>, vector<1x8x32xf32>
    %94 = vector.shape_cast %93 : vector<1x8x32xf32> to vector<8x32xf32>
    %95 = arith.truncf %94 : vector<8x32xf32> to vector<8x32xbf16>
    %cst_60 = arith.constant dense<0.000000e+00> : vector<16x32xf32>
    %96 = tpu.matmul %92, %95, %cst_60 {dimension_numbers = #tpu.dot_dimension_numbers<[1], [0], [0], [1], [0, 0, 1, 1], [], []>} : vector<16x8xbf16>, vector<8x32xbf16>, vector<16x32xf32> -> vector<16x32xf32>
    %97 = arith.addf %50, %96 : vector<16x32xf32>
    %c2 = arith.constant 2 : index
    %c0_61 = arith.constant 0 : index
    %c0_62 = arith.constant 0 : index
    %98 = vector.load %arg2[%c2, %c0_61, %c0_62] : memref<4x32x8xf32, #tpu.memory_space<vmem>>, vector<1x32x8xf32>
    %99 = vector.shape_cast %98 : vector<1x32x8xf32> to vector<32x8xf32>
    %100 = arith.truncf %99 : vector<32x8xf32> to vector<32x8xbf16>
    %cst_63 = arith.constant dense<0.000000e+00> : vector<16x8xf32>
    %101 = tpu.matmul %2, %100, %cst_63 {dimension_numbers = #tpu.dot_dimension_numbers<[1], [0], [0], [1], [0, 0, 1, 1], [], []>} : vector<16x32xbf16>, vector<32x8xbf16>, vector<16x8xf32> -> vector<16x8xf32>
    %c2_64 = arith.constant 2 : index
    %c0_65 = arith.constant 0 : index
    %c0_66 = arith.constant 0 : index
    %102 = vector.load %arg5[%c2_64, %c0_65, %c0_66] : memref<4x1x8xf32, #tpu.memory_space<vmem>>, vector<1x1x8xf32>
    %103 = vector.shape_cast %102 : vector<1x1x8xf32> to vector<1x8xf32>
    %104 = vector.broadcast %103 : vector<1x8xf32> to vector<16x8xf32>
    %105 = arith.addf %101, %104 : vector<16x8xf32>
    %cst_67 = arith.constant 0.353553385 : f32
    %106 = vector.broadcast %cst_67 : f32 to vector<16x8xf32>
    %107 = arith.mulf %105, %106 : vector<16x8xf32>
    %c2_68 = arith.constant 2 : index
    %c0_69 = arith.constant 0 : index
    %c0_70 = arith.constant 0 : index
    %108 = vector.load %arg3[%c2_68, %c0_69, %c0_70] : memref<4x32x8xf32, #tpu.memory_space<vmem>>, vector<1x32x8xf32>
    %109 = vector.shape_cast %108 : vector<1x32x8xf32> to vector<32x8xf32>
    %110 = arith.truncf %109 : vector<32x8xf32> to vector<32x8xbf16>
    %cst_71 = arith.constant dense<0.000000e+00> : vector<16x8xf32>
    %111 = tpu.matmul %2, %110, %cst_71 {dimension_numbers = #tpu.dot_dimension_numbers<[1], [0], [0], [1], [0, 0, 1, 1], [], []>} : vector<16x32xbf16>, vector<32x8xbf16>, vector<16x8xf32> -> vector<16x8xf32>
    %c2_72 = arith.constant 2 : index
    %c0_73 = arith.constant 0 : index
    %c0_74 = arith.constant 0 : index
    %112 = vector.load %arg6[%c2_72, %c0_73, %c0_74] : memref<4x1x8xf32, #tpu.memory_space<vmem>>, vector<1x1x8xf32>
    %113 = vector.shape_cast %112 : vector<1x1x8xf32> to vector<1x8xf32>
    %114 = vector.broadcast %113 : vector<1x8xf32> to vector<16x8xf32>
    %115 = arith.addf %111, %114 : vector<16x8xf32>
    %c2_75 = arith.constant 2 : index
    %c0_76 = arith.constant 0 : index
    %c0_77 = arith.constant 0 : index
    %116 = vector.load %arg4[%c2_75, %c0_76, %c0_77] : memref<4x32x8xf32, #tpu.memory_space<vmem>>, vector<1x32x8xf32>
    %117 = vector.shape_cast %116 : vector<1x32x8xf32> to vector<32x8xf32>
    %118 = arith.truncf %117 : vector<32x8xf32> to vector<32x8xbf16>
    %cst_78 = arith.constant dense<0.000000e+00> : vector<16x8xf32>
    %119 = tpu.matmul %2, %118, %cst_78 {dimension_numbers = #tpu.dot_dimension_numbers<[1], [0], [0], [1], [0, 0, 1, 1], [], []>} : vector<16x32xbf16>, vector<32x8xbf16>, vector<16x8xf32> -> vector<16x8xf32>
    %c2_79 = arith.constant 2 : index
    %c0_80 = arith.constant 0 : index
    %c0_81 = arith.constant 0 : index
    %120 = vector.load %arg7[%c2_79, %c0_80, %c0_81] : memref<4x1x8xf32, #tpu.memory_space<vmem>>, vector<1x1x8xf32>
    %121 = vector.shape_cast %120 : vector<1x1x8xf32> to vector<1x8xf32>
    %122 = vector.broadcast %121 : vector<1x8xf32> to vector<16x8xf32>
    %123 = arith.addf %119, %122 : vector<16x8xf32>
    %124 = vector.shape_cast %107 : vector<16x8xf32> to vector<2x8x8xf32>
    %125 = vector.shape_cast %115 : vector<16x8xf32> to vector<2x8x8xf32>
    %126 = vector.shape_cast %123 : vector<16x8xf32> to vector<2x8x8xf32>
    "tpu.trace_start"() <{level = 10 : i32, message = "gqe,gke->gqk"}> : () -> ()
    %cst_82 = arith.constant dense<0.000000e+00> : vector<2x8x8xf32>
    %127 = tpu.matmul %124, %125, %cst_82 {dimension_numbers = #tpu.dot_dimension_numbers<[2], [2], [1], [1], [0, 0, 0, 1, 1, 1], [0], [0]>} : vector<2x8x8xf32>, vector<2x8x8xf32>, vector<2x8x8xf32> -> vector<2x8x8xf32>
    "tpu.trace_stop"() : () -> ()
    %cst_83 = arith.constant dense<0xFF800000> : vector<2x8xf32>
    %128 = vector.multi_reduction <maximumf>, %127, %cst_83 [2] : vector<2x8x8xf32> to vector<2x8xf32>
    %129 = vector.shape_cast %128 : vector<2x8xf32> to vector<2x8x1xf32>
    %130 = vector.broadcast %129 : vector<2x8x1xf32> to vector<2x8x8xf32>
    %131 = arith.subf %127, %130 : vector<2x8x8xf32>
    %132 = math.exp %131 : vector<2x8x8xf32>
    %cst_84 = arith.constant dense<0.000000e+00> : vector<2x8xf32>
    %133 = vector.multi_reduction <add>, %132, %cst_84 [2] : vector<2x8x8xf32> to vector<2x8xf32>
    %134 = vector.shape_cast %133 : vector<2x8xf32> to vector<2x8x1xf32>
    %135 = vector.broadcast %134 : vector<2x8x1xf32> to vector<2x8x8xf32>
    %136 = arith.divf %132, %135 : vector<2x8x8xf32>
    "tpu.trace_start"() <{level = 10 : i32, message = "gqk,gke->gqe"}> : () -> ()
    %cst_85 = arith.constant dense<0.000000e+00> : vector<2x8x8xf32>
    %137 = tpu.matmul %136, %126, %cst_85 {dimension_numbers = #tpu.dot_dimension_numbers<[2], [1], [1], [2], [0, 0, 0, 1, 1, 2], [0], [0]>} : vector<2x8x8xf32>, vector<2x8x8xf32>, vector<2x8x8xf32> -> vector<2x8x8xf32>
    "tpu.trace_stop"() : () -> ()
    %138 = vector.shape_cast %137 : vector<2x8x8xf32> to vector<16x8xf32>
    %139 = arith.truncf %138 : vector<16x8xf32> to vector<16x8xbf16>
    %c2_86 = arith.constant 2 : index
    %c0_87 = arith.constant 0 : index
    %c0_88 = arith.constant 0 : index
    %140 = vector.load %arg8[%c2_86, %c0_87, %c0_88] : memref<4x8x32xf32, #tpu.memory_space<vmem>>, vector<1x8x32xf32>
    %141 = vector.shape_cast %140 : vector<1x8x32xf32> to vector<8x32xf32>
    %142 = arith.truncf %141 : vector<8x32xf32> to vector<8x32xbf16>
    %cst_89 = arith.constant dense<0.000000e+00> : vector<16x32xf32>
    %143 = tpu.matmul %139, %142, %cst_89 {dimension_numbers = #tpu.dot_dimension_numbers<[1], [0], [0], [1], [0, 0, 1, 1], [], []>} : vector<16x8xbf16>, vector<8x32xbf16>, vector<16x32xf32> -> vector<16x32xf32>
    %144 = arith.addf %97, %143 : vector<16x32xf32>
    %c3 = arith.constant 3 : index
    %c0_90 = arith.constant 0 : index
    %c0_91 = arith.constant 0 : index
    %145 = vector.load %arg2[%c3, %c0_90, %c0_91] : memref<4x32x8xf32, #tpu.memory_space<vmem>>, vector<1x32x8xf32>
    %146 = vector.shape_cast %145 : vector<1x32x8xf32> to vector<32x8xf32>
    %147 = arith.truncf %146 : vector<32x8xf32> to vector<32x8xbf16>
    %cst_92 = arith.constant dense<0.000000e+00> : vector<16x8xf32>
    %148 = tpu.matmul %2, %147, %cst_92 {dimension_numbers = #tpu.dot_dimension_numbers<[1], [0], [0], [1], [0, 0, 1, 1], [], []>} : vector<16x32xbf16>, vector<32x8xbf16>, vector<16x8xf32> -> vector<16x8xf32>
    %c3_93 = arith.constant 3 : index
    %c0_94 = arith.constant 0 : index
    %c0_95 = arith.constant 0 : index
    %149 = vector.load %arg5[%c3_93, %c0_94, %c0_95] : memref<4x1x8xf32, #tpu.memory_space<vmem>>, vector<1x1x8xf32>
    %150 = vector.shape_cast %149 : vector<1x1x8xf32> to vector<1x8xf32>
    %151 = vector.broadcast %150 : vector<1x8xf32> to vector<16x8xf32>
    %152 = arith.addf %148, %151 : vector<16x8xf32>
    %cst_96 = arith.constant 0.353553385 : f32
    %153 = vector.broadcast %cst_96 : f32 to vector<16x8xf32>
    %154 = arith.mulf %152, %153 : vector<16x8xf32>
    %c3_97 = arith.constant 3 : index
    %c0_98 = arith.constant 0 : index
    %c0_99 = arith.constant 0 : index
    %155 = vector.load %arg3[%c3_97, %c0_98, %c0_99] : memref<4x32x8xf32, #tpu.memory_space<vmem>>, vector<1x32x8xf32>
    %156 = vector.shape_cast %155 : vector<1x32x8xf32> to vector<32x8xf32>
    %157 = arith.truncf %156 : vector<32x8xf32> to vector<32x8xbf16>
    %cst_100 = arith.constant dense<0.000000e+00> : vector<16x8xf32>
    %158 = tpu.matmul %2, %157, %cst_100 {dimension_numbers = #tpu.dot_dimension_numbers<[1], [0], [0], [1], [0, 0, 1, 1], [], []>} : vector<16x32xbf16>, vector<32x8xbf16>, vector<16x8xf32> -> vector<16x8xf32>
    %c3_101 = arith.constant 3 : index
    %c0_102 = arith.constant 0 : index
    %c0_103 = arith.constant 0 : index
    %159 = vector.load %arg6[%c3_101, %c0_102, %c0_103] : memref<4x1x8xf32, #tpu.memory_space<vmem>>, vector<1x1x8xf32>
    %160 = vector.shape_cast %159 : vector<1x1x8xf32> to vector<1x8xf32>
    %161 = vector.broadcast %160 : vector<1x8xf32> to vector<16x8xf32>
    %162 = arith.addf %158, %161 : vector<16x8xf32>
    %c3_104 = arith.constant 3 : index
    %c0_105 = arith.constant 0 : index
    %c0_106 = arith.constant 0 : index
    %163 = vector.load %arg4[%c3_104, %c0_105, %c0_106] : memref<4x32x8xf32, #tpu.memory_space<vmem>>, vector<1x32x8xf32>
    %164 = vector.shape_cast %163 : vector<1x32x8xf32> to vector<32x8xf32>
    %165 = arith.truncf %164 : vector<32x8xf32> to vector<32x8xbf16>
    %cst_107 = arith.constant dense<0.000000e+00> : vector<16x8xf32>
    %166 = tpu.matmul %2, %165, %cst_107 {dimension_numbers = #tpu.dot_dimension_numbers<[1], [0], [0], [1], [0, 0, 1, 1], [], []>} : vector<16x32xbf16>, vector<32x8xbf16>, vector<16x8xf32> -> vector<16x8xf32>
    %c3_108 = arith.constant 3 : index
    %c0_109 = arith.constant 0 : index
    %c0_110 = arith.constant 0 : index
    %167 = vector.load %arg7[%c3_108, %c0_109, %c0_110] : memref<4x1x8xf32, #tpu.memory_space<vmem>>, vector<1x1x8xf32>
    %168 = vector.shape_cast %167 : vector<1x1x8xf32> to vector<1x8xf32>
    %169 = vector.broadcast %168 : vector<1x8xf32> to vector<16x8xf32>
    %170 = arith.addf %166, %169 : vector<16x8xf32>
    %171 = vector.shape_cast %154 : vector<16x8xf32> to vector<2x8x8xf32>
    %172 = vector.shape_cast %162 : vector<16x8xf32> to vector<2x8x8xf32>
    %173 = vector.shape_cast %170 : vector<16x8xf32> to vector<2x8x8xf32>
    "tpu.trace_start"() <{level = 10 : i32, message = "gqe,gke->gqk"}> : () -> ()
    %cst_111 = arith.constant dense<0.000000e+00> : vector<2x8x8xf32>
    %174 = tpu.matmul %171, %172, %cst_111 {dimension_numbers = #tpu.dot_dimension_numbers<[2], [2], [1], [1], [0, 0, 0, 1, 1, 1], [0], [0]>} : vector<2x8x8xf32>, vector<2x8x8xf32>, vector<2x8x8xf32> -> vector<2x8x8xf32>
    "tpu.trace_stop"() : () -> ()
    %cst_112 = arith.constant dense<0xFF800000> : vector<2x8xf32>
    %175 = vector.multi_reduction <maximumf>, %174, %cst_112 [2] : vector<2x8x8xf32> to vector<2x8xf32>
    %176 = vector.shape_cast %175 : vector<2x8xf32> to vector<2x8x1xf32>
    %177 = vector.broadcast %176 : vector<2x8x1xf32> to vector<2x8x8xf32>
    %178 = arith.subf %174, %177 : vector<2x8x8xf32>
    %179 = math.exp %178 : vector<2x8x8xf32>
    %cst_113 = arith.constant dense<0.000000e+00> : vector<2x8xf32>
    %180 = vector.multi_reduction <add>, %179, %cst_113 [2] : vector<2x8x8xf32> to vector<2x8xf32>
    %181 = vector.shape_cast %180 : vector<2x8xf32> to vector<2x8x1xf32>
    %182 = vector.broadcast %181 : vector<2x8x1xf32> to vector<2x8x8xf32>
    %183 = arith.divf %179, %182 : vector<2x8x8xf32>
    "tpu.trace_start"() <{level = 10 : i32, message = "gqk,gke->gqe"}> : () -> ()
    %cst_114 = arith.constant dense<0.000000e+00> : vector<2x8x8xf32>
    %184 = tpu.matmul %183, %173, %cst_114 {dimension_numbers = #tpu.dot_dimension_numbers<[2], [1], [1], [2], [0, 0, 0, 1, 1, 2], [0], [0]>} : vector<2x8x8xf32>, vector<2x8x8xf32>, vector<2x8x8xf32> -> vector<2x8x8xf32>
    "tpu.trace_stop"() : () -> ()
    %185 = vector.shape_cast %184 : vector<2x8x8xf32> to vector<16x8xf32>
    %186 = arith.truncf %185 : vector<16x8xf32> to vector<16x8xbf16>
    %c3_115 = arith.constant 3 : index
    %c0_116 = arith.constant 0 : index
    %c0_117 = arith.constant 0 : index
    %187 = vector.load %arg8[%c3_115, %c0_116, %c0_117] : memref<4x8x32xf32, #tpu.memory_space<vmem>>, vector<1x8x32xf32>
    %188 = vector.shape_cast %187 : vector<1x8x32xf32> to vector<8x32xf32>
    %189 = arith.truncf %188 : vector<8x32xf32> to vector<8x32xbf16>
    %cst_118 = arith.constant dense<0.000000e+00> : vector<16x32xf32>
    %190 = tpu.matmul %186, %189, %cst_118 {dimension_numbers = #tpu.dot_dimension_numbers<[1], [0], [0], [1], [0, 0, 1, 1], [], []>} : vector<16x8xbf16>, vector<8x32xbf16>, vector<16x32xf32> -> vector<16x32xf32>
    %191 = arith.addf %144, %190 : vector<16x32xf32>
    %c0_119 = arith.constant 0 : index
    %c0_120 = arith.constant 0 : index
    %192 = vector.load %arg9[%c0_119, %c0_120] : memref<1x32xf32, #tpu.memory_space<vmem>>, vector<1x32xf32>
    %193 = vector.broadcast %192 : vector<1x32xf32> to vector<16x32xf32>
    %194 = arith.addf %191, %193 : vector<16x32xf32>
    %195 = arith.addf %1, %194 : vector<16x32xf32>
    %196 = vector.shape_cast %195 : vector<16x32xf32> to vector<2x8x32xf32>
    %c0_121 = arith.constant 0 : index
    %c0_122 = arith.constant 0 : index
    %197 = vector.load %arg10[%c0_121, %c0_122] : memref<1x32xf32, #tpu.memory_space<vmem>>, vector<1x32xf32>
    %c0_123 = arith.constant 0 : index
    %c0_124 = arith.constant 0 : index
    %198 = vector.load %arg11[%c0_123, %c0_124] : memref<1x32xf32, #tpu.memory_space<vmem>>, vector<1x32xf32>
    %cst_125 = arith.constant dense<0.000000e+00> : vector<2x8xf32>
    %199 = vector.multi_reduction <add>, %196, %cst_125 [2] : vector<2x8x32xf32> to vector<2x8xf32>
    %200 = vector.shape_cast %199 : vector<2x8xf32> to vector<2x8x1xf32>
    %cst_126 = arith.constant dense<0.000000e+00> : vector<2x1xf32>
    %201 = vector.multi_reduction <add>, %200, %cst_126 [1] : vector<2x8x1xf32> to vector<2x1xf32>
    %202 = vector.shape_cast %201 : vector<2x1xf32> to vector<2x1x1xf32>
    %cst_127 = arith.constant 3.906250e-03 : f32
    %203 = vector.broadcast %cst_127 : f32 to vector<2x1x1xf32>
    %204 = arith.mulf %202, %203 : vector<2x1x1xf32>
    %205 = vector.broadcast %204 : vector<2x1x1xf32> to vector<2x8x32xf32>
    %206 = arith.subf %196, %205 : vector<2x8x32xf32>
    %207 = arith.mulf %206, %206 : vector<2x8x32xf32>
    %cst_128 = arith.constant dense<0.000000e+00> : vector<2x8xf32>
    %208 = vector.multi_reduction <add>, %207, %cst_128 [2] : vector<2x8x32xf32> to vector<2x8xf32>
    %209 = vector.shape_cast %208 : vector<2x8xf32> to vector<2x8x1xf32>
    %cst_129 = arith.constant dense<0.000000e+00> : vector<2x1xf32>
    %210 = vector.multi_reduction <add>, %209, %cst_129 [1] : vector<2x8x1xf32> to vector<2x1xf32>
    %211 = vector.shape_cast %210 : vector<2x1xf32> to vector<2x1x1xf32>
    %cst_130 = arith.constant 3.906250e-03 : f32
    %212 = vector.broadcast %cst_130 : f32 to vector<2x1x1xf32>
    %213 = arith.mulf %211, %212 : vector<2x1x1xf32>
    %cst_131 = arith.constant 9.99999974E-6 : f32
    %214 = vector.broadcast %cst_131 : f32 to vector<2x1x1xf32>
    %215 = arith.addf %213, %214 : vector<2x1x1xf32>
    %216 = math.rsqrt %215 : vector<2x1x1xf32>
    %217 = vector.broadcast %216 : vector<2x1x1xf32> to vector<2x8x32xf32>
    %218 = arith.mulf %206, %217 : vector<2x8x32xf32>
    %219 = vector.shape_cast %197 : vector<1x32xf32> to vector<1x1x32xf32>
    %220 = vector.broadcast %219 : vector<1x1x32xf32> to vector<2x8x32xf32>
    %221 = arith.mulf %218, %220 : vector<2x8x32xf32>
    %222 = vector.shape_cast %198 : vector<1x32xf32> to vector<1x1x32xf32>
    %223 = vector.broadcast %222 : vector<1x1x32xf32> to vector<2x8x32xf32>
    %224 = arith.addf %221, %223 : vector<2x8x32xf32>
    %c0_132 = arith.constant 0 : index
    %c0_133 = arith.constant 0 : index
    %c0_134 = arith.constant 0 : index
    %225 = vector.load %arg12[%c0_132, %c0_133, %c0_134] : memref<2x8x32xf32, #tpu.memory_space<vmem>>, vector<2x8x32xf32>
    tpu.vector_store %arg12[%c0_132, %c0_133, %c0_134], %224 {strides = array<i32>} : memref<2x8x32xf32, #tpu.memory_space<vmem>>, vector<2x8x32xf32>,
    return
  }
  func.func @transform_0(%arg0: i32) -> (i32, i32, i32) {
    %c0_i32 = arith.constant 0 : i32
    %c0_i32_0 = arith.constant 0 : i32
    %c0_i32_1 = arith.constant 0 : i32
    return %arg0, %c0_i32, %c0_i32_0 : i32, i32, i32
  }
  func.func @transform_1(%arg0: i32) -> (i32, i32, i32) {
    %c0_i32 = arith.constant 0 : i32
    %c0_i32_0 = arith.constant 0 : i32
    %c0_i32_1 = arith.constant 0 : i32
    %c0_i32_2 = arith.constant 0 : i32
    return %c0_i32, %c0_i32_0, %c0_i32_1 : i32, i32, i32
  }
  func.func @transform_2(%arg0: i32) -> (i32, i32, i32) {
    %c0_i32 = arith.constant 0 : i32
    %c0_i32_0 = arith.constant 0 : i32
    %c0_i32_1 = arith.constant 0 : i32
    %c0_i32_2 = arith.constant 0 : i32
    return %c0_i32, %c0_i32_0, %c0_i32_1 : i32, i32, i32
  }
  func.func @transform_3(%arg0: i32) -> (i32, i32, i32) {
    %c0_i32 = arith.constant 0 : i32
    %c0_i32_0 = arith.constant 0 : i32
    %c0_i32_1 = arith.constant 0 : i32
    %c0_i32_2 = arith.constant 0 : i32
    return %c0_i32, %c0_i32_0, %c0_i32_1 : i32, i32, i32
  }
  func.func @transform_4(%arg0: i32) -> (i32, i32, i32) {
    %c0_i32 = arith.constant 0 : i32
    %c0_i32_0 = arith.constant 0 : i32
    %c0_i32_1 = arith.constant 0 : i32
    %c0_i32_2 = arith.constant 0 : i32
    return %c0_i32, %c0_i32_0, %c0_i32_1 : i32, i32, i32
  }
  func.func @transform_5(%arg0: i32) -> (i32, i32, i32) {
    %c0_i32 = arith.constant 0 : i32
    %c0_i32_0 = arith.constant 0 : i32
    %c0_i32_1 = arith.constant 0 : i32
    %c0_i32_2 = arith.constant 0 : i32
    return %c0_i32, %c0_i32_0, %c0_i32_1 : i32, i32, i32
  }
  func.func @transform_6(%arg0: i32) -> (i32, i32, i32) {
    %c0_i32 = arith.constant 0 : i32
    %c0_i32_0 = arith.constant 0 : i32
    %c0_i32_1 = arith.constant 0 : i32
    %c0_i32_2 = arith.constant 0 : i32
    return %c0_i32, %c0_i32_0, %c0_i32_1 : i32, i32, i32
  }
  func.func @transform_7(%arg0: i32) -> (i32, i32, i32) {
    %c0_i32 = arith.constant 0 : i32
    %c0_i32_0 = arith.constant 0 : i32
    %c0_i32_1 = arith.constant 0 : i32
    %c0_i32_2 = arith.constant 0 : i32
    return %c0_i32, %c0_i32_0, %c0_i32_1 : i32, i32, i32
  }
  func.func @transform_8(%arg0: i32) -> (i32, i32) {
    %c0_i32 = arith.constant 0 : i32
    %c0_i32_0 = arith.constant 0 : i32
    %c0_i32_1 = arith.constant 0 : i32
    return %c0_i32, %c0_i32_0 : i32, i32
  }
  func.func @transform_9(%arg0: i32) -> (i32, i32) {
    %c0_i32 = arith.constant 0 : i32
    %c0_i32_0 = arith.constant 0 : i32
    %c0_i32_1 = arith.constant 0 : i32
    return %c0_i32, %c0_i32_0 : i32, i32
  }
  func.func @transform_10(%arg0: i32) -> (i32, i32) {
    %c0_i32 = arith.constant 0 : i32
    %c0_i32_0 = arith.constant 0 : i32
    %c0_i32_1 = arith.constant 0 : i32
    return %c0_i32, %c0_i32_0 : i32, i32
  }
  func.func @transform_11(%arg0: i32) -> (i32, i32, i32) {
    %c0_i32 = arith.constant 0 : i32
    %c0_i32_0 = arith.constant 0 : i32
    %c0_i32_1 = arith.constant 0 : i32
    return %arg0, %c0_i32, %c0_i32_0 : i32, i32, i32
  }
}

module attributes {stable_mosaic.version = 11 : i64} {
  func.func @_ff_block_kernel(%arg0: i32, %arg1: memref<2x8x32xf32, #tpu.memory_space<vmem>>, %arg2: memref<2x8x32xf32, #tpu.memory_space<vmem>>, %arg3: memref<32x64xf32, #tpu.memory_space<vmem>>, %arg4: memref<1x64xf32, #tpu.memory_space<vmem>>, %arg5: memref<64x32xf32, #tpu.memory_space<vmem>>, %arg6: memref<1x32xf32, #tpu.memory_space<vmem>>, %arg7: memref<1x32xf32, #tpu.memory_space<vmem>>, %arg8: memref<1x32xf32, #tpu.memory_space<vmem>>, %arg9: memref<2x8x32xf32, #tpu.memory_space<vmem>>) attributes {dimension_semantics = [#tpu.dimension_semantics<parallel>], iteration_bounds = array<i64: 1>, scalar_prefetch = 0 : i64, scratch_operands = 0 : i64, tpu.core_type = #tpu.core_type<tc>, window_params = [{transform_indices = @transform_0, window_bounds = array<i64: 2, 8, 32>}, {transform_indices = @transform_1, window_bounds = array<i64: 2, 8, 32>}, {pipeline_mode = #tpu.pipeline_mode<synchronous>, transform_indices = @transform_2, window_bounds = array<i64: 32, 64>}, {pipeline_mode = #tpu.pipeline_mode<synchronous>, transform_indices = @transform_3, window_bounds = array<i64: 1, 64>}, {pipeline_mode = #tpu.pipeline_mode<synchronous>, transform_indices = @transform_4, window_bounds = array<i64: 64, 32>}, {pipeline_mode = #tpu.pipeline_mode<synchronous>, transform_indices = @transform_5, window_bounds = array<i64: 1, 32>}, {pipeline_mode = #tpu.pipeline_mode<synchronous>, transform_indices = @transform_6, window_bounds = array<i64: 1, 32>}, {pipeline_mode = #tpu.pipeline_mode<synchronous>, transform_indices = @transform_7, window_bounds = array<i64: 1, 32>}, {transform_indices = @transform_8, window_bounds = array<i64: 2, 8, 32>}]} {
    %c0 = arith.constant 0 : index
    %c0_0 = arith.constant 0 : index
    %c0_1 = arith.constant 0 : index
    %0 = vector.load %arg1[%c0, %c0_0, %c0_1] : memref<2x8x32xf32, #tpu.memory_space<vmem>>, vector<2x8x32xf32>
    %c0_2 = arith.constant 0 : index
    %c0_3 = arith.constant 0 : index
    %c0_4 = arith.constant 0 : index
    %1 = vector.load %arg2[%c0_2, %c0_3, %c0_4] : memref<2x8x32xf32, #tpu.memory_space<vmem>>, vector<2x8x32xf32>
    %2 = arith.addf %0, %1 : vector<2x8x32xf32>
    %3 = vector.shape_cast %2 : vector<2x8x32xf32> to vector<16x32xf32>
    %4 = arith.truncf %3 : vector<16x32xf32> to vector<16x32xbf16>
    %c0_5 = arith.constant 0 : index
    %c0_6 = arith.constant 0 : index
    %5 = vector.load %arg3[%c0_5, %c0_6] : memref<32x64xf32, #tpu.memory_space<vmem>>, vector<32x64xf32>
    %6 = arith.truncf %5 : vector<32x64xf32> to vector<32x64xbf16>
    %cst = arith.constant dense<0.000000e+00> : vector<16x64xf32>
    %7 = tpu.matmul %4, %6, %cst {dimension_numbers = #tpu.dot_dimension_numbers<[1], [0], [0], [1], [0, 0, 1, 1], [], []>} : vector<16x32xbf16>, vector<32x64xbf16>, vector<16x64xf32> -> vector<16x64xf32>
    %c0_7 = arith.constant 0 : index
    %c0_8 = arith.constant 0 : index
    %8 = vector.load %arg4[%c0_7, %c0_8] : memref<1x64xf32, #tpu.memory_space<vmem>>, vector<1x64xf32>
    %9 = vector.broadcast %8 : vector<1x64xf32> to vector<16x64xf32>
    %10 = arith.addf %7, %9 : vector<16x64xf32>
    %cst_9 = arith.constant 0.000000e+00 : f32
    %11 = vector.broadcast %cst_9 : f32 to vector<16x64xf32>
    %12 = arith.maximumf %10, %11 : vector<16x64xf32>
    %13 = arith.truncf %12 : vector<16x64xf32> to vector<16x64xbf16>
    %c0_10 = arith.constant 0 : index
    %c0_11 = arith.constant 0 : index
    %14 = vector.load %arg5[%c0_10, %c0_11] : memref<64x32xf32, #tpu.memory_space<vmem>>, vector<64x32xf32>
    %15 = arith.truncf %14 : vector<64x32xf32> to vector<64x32xbf16>
    %cst_12 = arith.constant dense<0.000000e+00> : vector<16x32xf32>
    %16 = tpu.matmul %13, %15, %cst_12 {dimension_numbers = #tpu.dot_dimension_numbers<[1], [0], [0], [1], [0, 0, 1, 1], [], []>} : vector<16x64xbf16>, vector<64x32xbf16>, vector<16x32xf32> -> vector<16x32xf32>
    %c0_13 = arith.constant 0 : index
    %c0_14 = arith.constant 0 : index
    %17 = vector.load %arg6[%c0_13, %c0_14] : memref<1x32xf32, #tpu.memory_space<vmem>>, vector<1x32xf32>
    %18 = vector.broadcast %17 : vector<1x32xf32> to vector<16x32xf32>
    %19 = arith.addf %16, %18 : vector<16x32xf32>
    %20 = arith.addf %3, %19 : vector<16x32xf32>
    %21 = vector.shape_cast %20 : vector<16x32xf32> to vector<2x8x32xf32>
    %c0_15 = arith.constant 0 : index
    %c0_16 = arith.constant 0 : index
    %22 = vector.load %arg7[%c0_15, %c0_16] : memref<1x32xf32, #tpu.memory_space<vmem>>, vector<1x32xf32>
    %c0_17 = arith.constant 0 : index
    %c0_18 = arith.constant 0 : index
    %23 = vector.load %arg8[%c0_17, %c0_18] : memref<1x32xf32, #tpu.memory_space<vmem>>, vector<1x32xf32>
    %cst_19 = arith.constant dense<0.000000e+00> : vector<2x8xf32>
    %24 = vector.multi_reduction <add>, %21, %cst_19 [2] : vector<2x8x32xf32> to vector<2x8xf32>
    %25 = vector.shape_cast %24 : vector<2x8xf32> to vector<2x8x1xf32>
    %cst_20 = arith.constant dense<0.000000e+00> : vector<2x1xf32>
    %26 = vector.multi_reduction <add>, %25, %cst_20 [1] : vector<2x8x1xf32> to vector<2x1xf32>
    %27 = vector.shape_cast %26 : vector<2x1xf32> to vector<2x1x1xf32>
    %cst_21 = arith.constant 3.906250e-03 : f32
    %28 = vector.broadcast %cst_21 : f32 to vector<2x1x1xf32>
    %29 = arith.mulf %27, %28 : vector<2x1x1xf32>
    %30 = vector.broadcast %29 : vector<2x1x1xf32> to vector<2x8x32xf32>
    %31 = arith.subf %21, %30 : vector<2x8x32xf32>
    %32 = arith.mulf %31, %31 : vector<2x8x32xf32>
    %cst_22 = arith.constant dense<0.000000e+00> : vector<2x8xf32>
    %33 = vector.multi_reduction <add>, %32, %cst_22 [2] : vector<2x8x32xf32> to vector<2x8xf32>
    %34 = vector.shape_cast %33 : vector<2x8xf32> to vector<2x8x1xf32>
    %cst_23 = arith.constant dense<0.000000e+00> : vector<2x1xf32>
    %35 = vector.multi_reduction <add>, %34, %cst_23 [1] : vector<2x8x1xf32> to vector<2x1xf32>
    %36 = vector.shape_cast %35 : vector<2x1xf32> to vector<2x1x1xf32>
    %cst_24 = arith.constant 3.906250e-03 : f32
    %37 = vector.broadcast %cst_24 : f32 to vector<2x1x1xf32>
    %38 = arith.mulf %36, %37 : vector<2x1x1xf32>
    %cst_25 = arith.constant 9.99999974E-6 : f32
    %39 = vector.broadcast %cst_25 : f32 to vector<2x1x1xf32>
    %40 = arith.addf %38, %39 : vector<2x1x1xf32>
    %41 = math.rsqrt %40 : vector<2x1x1xf32>
    %42 = vector.broadcast %41 : vector<2x1x1xf32> to vector<2x8x32xf32>
    %43 = arith.mulf %31, %42 : vector<2x8x32xf32>
    %44 = vector.shape_cast %22 : vector<1x32xf32> to vector<1x1x32xf32>
    %45 = vector.broadcast %44 : vector<1x1x32xf32> to vector<2x8x32xf32>
    %46 = arith.mulf %43, %45 : vector<2x8x32xf32>
    %47 = vector.shape_cast %23 : vector<1x32xf32> to vector<1x1x32xf32>
    %48 = vector.broadcast %47 : vector<1x1x32xf32> to vector<2x8x32xf32>
    %49 = arith.addf %46, %48 : vector<2x8x32xf32>
    %c0_26 = arith.constant 0 : index
    %c0_27 = arith.constant 0 : index
    %c0_28 = arith.constant 0 : index
    %50 = vector.load %arg9[%c0_26, %c0_27, %c0_28] : memref<2x8x32xf32, #tpu.memory_space<vmem>>, vector<2x8x32xf32>
    tpu.vector_store %arg9[%c0_26, %c0_27, %c0_28], %49 {strides = array<i32>} : memref<2x8x32xf32, #tpu.memory_space<vmem>>, vector<2x8x32xf32>,
    return
  }
  func.func @transform_0(%arg0: i32) -> (i32, i32, i32) {
    %c0_i32 = arith.constant 0 : i32
    %c0_i32_0 = arith.constant 0 : i32
    %c0_i32_1 = arith.constant 0 : i32
    return %arg0, %c0_i32, %c0_i32_0 : i32, i32, i32
  }
  func.func @transform_1(%arg0: i32) -> (i32, i32, i32) {
    %c0_i32 = arith.constant 0 : i32
    %c0_i32_0 = arith.constant 0 : i32
    %c0_i32_1 = arith.constant 0 : i32
    return %arg0, %c0_i32, %c0_i32_0 : i32, i32, i32
  }
  func.func @transform_2(%arg0: i32) -> (i32, i32) {
    %c0_i32 = arith.constant 0 : i32
    %c0_i32_0 = arith.constant 0 : i32
    %c0_i32_1 = arith.constant 0 : i32
    return %c0_i32, %c0_i32_0 : i32, i32
  }
  func.func @transform_3(%arg0: i32) -> (i32, i32) {
    %c0_i32 = arith.constant 0 : i32
    %c0_i32_0 = arith.constant 0 : i32
    %c0_i32_1 = arith.constant 0 : i32
    return %c0_i32, %c0_i32_0 : i32, i32
  }
  func.func @transform_4(%arg0: i32) -> (i32, i32) {
    %c0_i32 = arith.constant 0 : i32
    %c0_i32_0 = arith.constant 0 : i32
    %c0_i32_1 = arith.constant 0 : i32
    return %c0_i32, %c0_i32_0 : i32, i32
  }
  func.func @transform_5(%arg0: i32) -> (i32, i32) {
    %c0_i32 = arith.constant 0 : i32
    %c0_i32_0 = arith.constant 0 : i32
    %c0_i32_1 = arith.constant 0 : i32
    return %c0_i32, %c0_i32_0 : i32, i32
  }
  func.func @transform_6(%arg0: i32) -> (i32, i32) {
    %c0_i32 = arith.constant 0 : i32
    %c0_i32_0 = arith.constant 0 : i32
    %c0_i32_1 = arith.constant 0 : i32
    return %c0_i32, %c0_i32_0 : i32, i32
  }
  func.func @transform_7(%arg0: i32) -> (i32, i32) {
    %c0_i32 = arith.constant 0 : i32
    %c0_i32_0 = arith.constant 0 : i32
    %c0_i32_1 = arith.constant 0 : i32
    return %c0_i32, %c0_i32_0 : i32, i32
  }
  func.func @transform_8(%arg0: i32) -> (i32, i32, i32) {
    %c0_i32 = arith.constant 0 : i32
    %c0_i32_0 = arith.constant 0 : i32
    %c0_i32_1 = arith.constant 0 : i32
    return %arg0, %c0_i32, %c0_i32_0 : i32, i32, i32
  }
}

module attributes {stable_mosaic.version = 11 : i64} {
  func.func @_gcn_fused_kernel(%arg0: i32, %arg1: i32, %arg2: memref<1xi32, #tpu.memory_space<smem>>, %arg3: memref<16x32xf32, #tpu.memory_space<vmem>>, %arg4: memref<32x32xf32, #tpu.memory_space<vmem>>, %arg5: memref<32x1xi32, #tpu.memory_space<vmem>>, %arg6: memref<32x1xi32, #tpu.memory_space<vmem>>, %arg7: memref<32x128xf32, #tpu.memory_space<vmem>>, %arg8: memref<1x128xf32, #tpu.memory_space<vmem>>, %arg9: memref<32x32xf32, #tpu.memory_space<vmem>>, %arg10: memref<1x32xf32, #tpu.memory_space<vmem>>, %arg11: memref<1x32xf32, #tpu.memory_space<vmem>>, %arg12: memref<1x32xf32, #tpu.memory_space<vmem>>, %arg13: memref<1x32xf32, #tpu.memory_space<vmem>>, %arg14: memref<1x32xf32, #tpu.memory_space<vmem>>, %arg15: memref<1x32xf32, #tpu.memory_space<vmem>>, %arg16: memref<1x32xf32, #tpu.memory_space<vmem>>, %arg17: memref<32x32xf32, #tpu.memory_space<vmem>>, %arg18: memref<16x32xf32, #tpu.memory_space<vmem>>, %arg19: memref<16x128xf32, #tpu.memory_space<vmem>>, %arg20: memref<16x64xf32, #tpu.memory_space<vmem>>) attributes {dimension_semantics = [#tpu.dimension_semantics<parallel>, #tpu.dimension_semantics<arbitrary>], iteration_bounds = array<i64: 1, 1>, scalar_prefetch = 1 : i64, scratch_operands = 2 : i64, tpu.core_type = #tpu.core_type<tc>, window_params = [{transform_indices = @transform_0, window_bounds = array<i64: 16, 32>}, {transform_indices = @transform_1, window_bounds = array<i64: 32, 32>}, {transform_indices = @transform_2, window_bounds = array<i64: 32, 1>}, {transform_indices = @transform_3, window_bounds = array<i64: 32, 1>}, {pipeline_mode = #tpu.pipeline_mode<synchronous>, transform_indices = @transform_4, window_bounds = array<i64: 32, 128>}, {pipeline_mode = #tpu.pipeline_mode<synchronous>, transform_indices = @transform_5, window_bounds = array<i64: 1, 128>}, {pipeline_mode = #tpu.pipeline_mode<synchronous>, transform_indices = @transform_6, window_bounds = array<i64: 32, 32>}, {pipeline_mode = #tpu.pipeline_mode<synchronous>, transform_indices = @transform_7, window_bounds = array<i64: 1, 32>}, {pipeline_mode = #tpu.pipeline_mode<synchronous>, transform_indices = @transform_8, window_bounds = array<i64: 1, 32>}, {pipeline_mode = #tpu.pipeline_mode<synchronous>, transform_indices = @transform_9, window_bounds = array<i64: 1, 32>}, {pipeline_mode = #tpu.pipeline_mode<synchronous>, transform_indices = @transform_10, window_bounds = array<i64: 1, 32>}, {pipeline_mode = #tpu.pipeline_mode<synchronous>, transform_indices = @transform_11, window_bounds = array<i64: 1, 32>}, {pipeline_mode = #tpu.pipeline_mode<synchronous>, transform_indices = @transform_12, window_bounds = array<i64: 1, 32>}, {pipeline_mode = #tpu.pipeline_mode<synchronous>, transform_indices = @transform_13, window_bounds = array<i64: 1, 32>}, {transform_indices = @transform_14, window_bounds = array<i64: 32, 32>}, {transform_indices = @transform_15, window_bounds = array<i64: 16, 32>}]} {
    %c0_i32 = arith.constant 0 : i32
    %0 = arith.cmpi eq, %arg1, %c0_i32 : i32
    %1 = arith.extui %0 : i1 to i32
    %c0_i32_0 = arith.constant 0 : i32
    %2 = arith.cmpi ne, %1, %c0_i32_0 : i32
    scf.if %2 {
      %c0_39 = arith.constant 0 : index
      %c0_40 = arith.constant 0 : index
      %74 = vector.load %arg3[%c0_39, %c0_40] : memref<16x32xf32, #tpu.memory_space<vmem>>, vector<16x32xf32>
      %75 = arith.truncf %74 : vector<16x32xf32> to vector<16x32xbf16>
      %c0_41 = arith.constant 0 : index
      %c0_42 = arith.constant 0 : index
      %76 = vector.load %arg7[%c0_41, %c0_42] : memref<32x128xf32, #tpu.memory_space<vmem>>, vector<32x128xf32>
      %77 = arith.truncf %76 : vector<32x128xf32> to vector<32x128xbf16>
      %cst_43 = arith.constant dense<0.000000e+00> : vector<16x128xf32>
      %78 = tpu.matmul %75, %77, %cst_43 {dimension_numbers = #tpu.dot_dimension_numbers<[1], [0], [0], [1], [0, 0, 1, 1], [], []>} : vector<16x32xbf16>, vector<32x128xbf16>, vector<16x128xf32> -> vector<16x128xf32>
      %c0_44 = arith.constant 0 : index
      %c0_45 = arith.constant 0 : index
      %79 = vector.load %arg8[%c0_44, %c0_45] : memref<1x128xf32, #tpu.memory_space<vmem>>, vector<1x128xf32>
      %80 = vector.broadcast %79 : vector<1x128xf32> to vector<16x128xf32>
      %81 = arith.addf %78, %80 : vector<16x128xf32>
      %c0_46 = arith.constant 0 : index
      %c0_47 = arith.constant 0 : index
      %82 = vector.load %arg19[%c0_46, %c0_47] : memref<16x128xf32, #tpu.memory_space<vmem>>, vector<16x128xf32>
      tpu.vector_store %arg19[%c0_46, %c0_47], %81 {strides = array<i32>} : memref<16x128xf32, #tpu.memory_space<vmem>>, vector<16x128xf32>,
      %cst_48 = arith.constant 0.000000e+00 : f32
      %83 = vector.broadcast %cst_48 : f32 to vector<16x64xf32>
      %c0_49 = arith.constant 0 : index
      %c0_50 = arith.constant 0 : index
      %84 = vector.load %arg20[%c0_49, %c0_50] : memref<16x64xf32, #tpu.memory_space<vmem>>, vector<16x64xf32>
      tpu.vector_store %arg20[%c0_49, %c0_50], %83 {strides = array<i32>} : memref<16x64xf32, #tpu.memory_space<vmem>>, vector<16x64xf32>,
    } else {
    }
    %c0 = arith.constant 0 : index
    %c0_1 = arith.constant 0 : index
    %3 = vector.load %arg19[%c0, %c0_1] : memref<16x128xf32, #tpu.memory_space<vmem>>, vector<16x128xf32>
    %4 = vector.extract_strided_slice %3 {offsets = [0, 32], sizes = [16, 32], strides = [1, 1]} : vector<16x128xf32> to vector<16x32xf32>
    %5 = vector.extract_strided_slice %3 {offsets = [0, 64], sizes = [16, 32], strides = [1, 1]} : vector<16x128xf32> to vector<16x32xf32>
    %6 = vector.extract_strided_slice %3 {offsets = [0, 96], sizes = [16, 32], strides = [1, 1]} : vector<16x128xf32> to vector<16x32xf32>
    %7 = tpu.iota {dimensions = array<i32: 1>} : vector<32x16xi32>
    %c0_2 = arith.constant 0 : index
    %c0_3 = arith.constant 0 : index
    %8 = vector.load %arg5[%c0_2, %c0_3] : memref<32x1xi32, #tpu.memory_space<vmem>>, vector<32x1xi32>
    %9 = vector.broadcast %8 : vector<32x1xi32> to vector<32x16xi32>
    %10 = arith.cmpi eq, %7, %9 : vector<32x16xi32>
    %11 = arith.extui %10 : vector<32x16xi1> to vector<32x16xi32>
    %12 = arith.sitofp %11 : vector<32x16xi32> to vector<32x16xf32>
    %c0_4 = arith.constant 0 : index
    %c0_5 = arith.constant 0 : index
    %13 = vector.load %arg6[%c0_4, %c0_5] : memref<32x1xi32, #tpu.memory_space<vmem>>, vector<32x1xi32>
    %14 = vector.broadcast %13 : vector<32x1xi32> to vector<32x16xi32>
    %15 = arith.cmpi eq, %7, %14 : vector<32x16xi32>
    %16 = arith.extui %15 : vector<32x16xi1> to vector<32x16xi32>
    %17 = arith.sitofp %16 : vector<32x16xi32> to vector<32x16xf32>
    %cst = arith.constant dense<0.000000e+00> : vector<32x32xf32>
    %18 = tpu.matmul %12, %4, %cst {dimension_numbers = #tpu.dot_dimension_numbers<[1], [0], [0], [1], [0, 0, 1, 1], [], []>} : vector<32x16xf32>, vector<16x32xf32>, vector<32x32xf32> -> vector<32x32xf32>
    %cst_6 = arith.constant dense<0.000000e+00> : vector<32x32xf32>
    %19 = tpu.matmul %12, %6, %cst_6 {dimension_numbers = #tpu.dot_dimension_numbers<[1], [0], [0], [1], [0, 0, 1, 1], [], []>} : vector<32x16xf32>, vector<16x32xf32>, vector<32x32xf32> -> vector<32x32xf32>
    %cst_7 = arith.constant dense<0.000000e+00> : vector<32x32xf32>
    %20 = tpu.matmul %17, %5, %cst_7 {dimension_numbers = #tpu.dot_dimension_numbers<[1], [0], [0], [1], [0, 0, 1, 1], [], []>} : vector<32x16xf32>, vector<16x32xf32>, vector<32x32xf32> -> vector<32x32xf32>
    %c0_8 = arith.constant 0 : index
    %c0_9 = arith.constant 0 : index
    %21 = vector.load %arg4[%c0_8, %c0_9] : memref<32x32xf32, #tpu.memory_space<vmem>>, vector<32x32xf32>
    %22 = arith.truncf %21 : vector<32x32xf32> to vector<32x32xbf16>
    %c0_10 = arith.constant 0 : index
    %c0_11 = arith.constant 0 : index
    %23 = vector.load %arg9[%c0_10, %c0_11] : memref<32x32xf32, #tpu.memory_space<vmem>>, vector<32x32xf32>
    %24 = arith.truncf %23 : vector<32x32xf32> to vector<32x32xbf16>
    %cst_12 = arith.constant dense<0.000000e+00> : vector<32x32xf32>
    %25 = tpu.matmul %22, %24, %cst_12 {dimension_numbers = #tpu.dot_dimension_numbers<[1], [0], [0], [1], [0, 0, 1, 1], [], []>} : vector<32x32xbf16>, vector<32x32xbf16>, vector<32x32xf32> -> vector<32x32xf32>
    %c0_13 = arith.constant 0 : index
    %c0_14 = arith.constant 0 : index
    %26 = vector.load %arg10[%c0_13, %c0_14] : memref<1x32xf32, #tpu.memory_space<vmem>>, vector<1x32xf32>
    %27 = vector.broadcast %26 : vector<1x32xf32> to vector<32x32xf32>
    %28 = arith.addf %25, %27 : vector<32x32xf32>
    %29 = arith.addf %20, %19 : vector<32x32xf32>
    %30 = arith.addf %29, %28 : vector<32x32xf32>
    %cst_15 = arith.constant 0.000000e+00 : f32
    %31 = vector.broadcast %cst_15 : f32 to vector<32x32xf32>
    %32 = arith.subf %31, %30 : vector<32x32xf32>
    %33 = math.exp %32 : vector<32x32xf32>
    %cst_16 = arith.constant 1.000000e+00 : f32
    %34 = vector.broadcast %cst_16 : f32 to vector<32x32xf32>
    %35 = arith.addf %34, %33 : vector<32x32xf32>
    %cst_17 = arith.constant 1.000000e+00 : f32
    %36 = vector.broadcast %cst_17 : f32 to vector<32x32xf32>
    %37 = arith.divf %36, %35 : vector<32x32xf32>
    %38 = arith.mulf %37, %18 : vector<32x32xf32>
    %39 = tpu.concatenate %38, %37 in 1 : vector<32x32xf32>, vector<32x32xf32> -> vector<32x64xf32>
    %c0_18 = arith.constant 0 : index
    %c0_19 = arith.constant 0 : index
    %40 = vector.load %arg20[%c0_18, %c0_19] : memref<16x64xf32, #tpu.memory_space<vmem>>, vector<16x64xf32>
    %cst_20 = arith.constant dense<0.000000e+00> : vector<16x64xf32>
    %41 = tpu.matmul %17, %39, %cst_20 {dimension_numbers = #tpu.dot_dimension_numbers<[0], [0], [1], [1], [0, 1, 1, 1], [], []>} : vector<32x16xf32>, vector<32x64xf32>, vector<16x64xf32> -> vector<16x64xf32>
    %42 = arith.addf %40, %41 : vector<16x64xf32>
    %c0_21 = arith.constant 0 : index
    %c0_22 = arith.constant 0 : index
    %43 = vector.load %arg20[%c0_21, %c0_22] : memref<16x64xf32, #tpu.memory_space<vmem>>, vector<16x64xf32>
    tpu.vector_store %arg20[%c0_21, %c0_22], %42 {strides = array<i32>} : memref<16x64xf32, #tpu.memory_space<vmem>>, vector<16x64xf32>,
    %c0_23 = arith.constant 0 : index
    %c0_24 = arith.constant 0 : index
    %44 = vector.load %arg4[%c0_23, %c0_24] : memref<32x32xf32, #tpu.memory_space<vmem>>, vector<32x32xf32>
    %c0_25 = arith.constant 0 : index
    %c0_26 = arith.constant 0 : index
    %45 = vector.load %arg11[%c0_25, %c0_26] : memref<1x32xf32, #tpu.memory_space<vmem>>, vector<1x32xf32>
    %c0_27 = arith.constant 0 : index
    %c0_28 = arith.constant 0 : index
    %46 = vector.load %arg12[%c0_27, %c0_28] : memref<1x32xf32, #tpu.memory_space<vmem>>, vector<1x32xf32>
    %cst_29 = arith.constant dense<0.000000e+00> : vector<32xf32>
    %47 = vector.multi_reduction <add>, %30, %cst_29 [1] : vector<32x32xf32> to vector<32xf32>
    %48 = vector.shape_cast %47 : vector<32xf32> to vector<32x1xf32>
    %cst_30 = arith.constant 3.200000e+01 : f32
    %49 = vector.broadcast %cst_30 : f32 to vector<32x1xf32>
    %50 = arith.divf %48, %49 : vector<32x1xf32>
    %51 = vector.broadcast %50 : vector<32x1xf32> to vector<32x32xf32>
    %52 = arith.subf %30, %51 : vector<32x32xf32>
    %53 = arith.mulf %52, %52 : vector<32x32xf32>
    %cst_31 = arith.constant dense<0.000000e+00> : vector<32xf32>
    %54 = vector.multi_reduction <add>, %53, %cst_31 [1] : vector<32x32xf32> to vector<32xf32>
    %55 = vector.shape_cast %54 : vector<32xf32> to vector<32x1xf32>
    %cst_32 = arith.constant 3.200000e+01 : f32
    %56 = vector.broadcast %cst_32 : f32 to vector<32x1xf32>
    %57 = arith.divf %55, %56 : vector<32x1xf32>
    %cst_33 = arith.constant 9.99999974E-6 : f32
    %58 = vector.broadcast %cst_33 : f32 to vector<32x1xf32>
    %59 = arith.addf %57, %58 : vector<32x1xf32>
    %60 = math.rsqrt %59 : vector<32x1xf32>
    %61 = vector.broadcast %60 : vector<32x1xf32> to vector<32x32xf32>
    %62 = arith.mulf %52, %61 : vector<32x32xf32>
    %63 = vector.broadcast %45 : vector<1x32xf32> to vector<32x32xf32>
    %64 = arith.mulf %62, %63 : vector<32x32xf32>
    %65 = vector.broadcast %46 : vector<1x32xf32> to vector<32x32xf32>
    %66 = arith.addf %64, %65 : vector<32x32xf32>
    %cst_34 = arith.constant 0.000000e+00 : f32
    %67 = vector.broadcast %cst_34 : f32 to vector<32x32xf32>
    %68 = arith.maximumf %66, %67 : vector<32x32xf32>
    %69 = arith.addf %44, %68 : vector<32x32xf32>
    %c0_35 = arith.constant 0 : index
    %c0_36 = arith.constant 0 : index
    %70 = vector.load %arg17[%c0_35, %c0_36] : memref<32x32xf32, #tpu.memory_space<vmem>>, vector<32x32xf32>
    tpu.vector_store %arg17[%c0_35, %c0_36], %69 {strides = array<i32>} : memref<32x32xf32, #tpu.memory_space<vmem>>, vector<32x32xf32>,
    %c0_i32_37 = arith.constant 0 : i32
    %71 = arith.cmpi eq, %arg1, %c0_i32_37 : i32
    %72 = arith.extui %71 : i1 to i32
    %c0_i32_38 = arith.constant 0 : i32
    %73 = arith.cmpi ne, %72, %c0_i32_38 : i32
    scf.if %73 {
      %c0_39 = arith.constant 0 : index
      %c0_40 = arith.constant 0 : index
      %74 = vector.load %arg20[%c0_39, %c0_40] : memref<16x64xf32, #tpu.memory_space<vmem>>, vector<16x64xf32>
      %c0_41 = arith.constant 0 : index
      %c0_42 = arith.constant 0 : index
      %75 = vector.load %arg19[%c0_41, %c0_42] : memref<16x128xf32, #tpu.memory_space<vmem>>, vector<16x32xf32>
      %76 = vector.extract_strided_slice %74 {offsets = [0, 0], sizes = [16, 32], strides = [1, 1]} : vector<16x64xf32> to vector<16x32xf32>
      %77 = vector.extract_strided_slice %74 {offsets = [0, 32], sizes = [16, 32], strides = [1, 1]} : vector<16x64xf32> to vector<16x32xf32>
      %cst_43 = arith.constant 9.99999997E-7 : f32
      %78 = vector.broadcast %cst_43 : f32 to vector<16x32xf32>
      %79 = arith.addf %77, %78 : vector<16x32xf32>
      %80 = arith.divf %76, %79 : vector<16x32xf32>
      %81 = arith.addf %75, %80 : vector<16x32xf32>
      %c0_44 = arith.constant 0 : index
      %c0_45 = arith.constant 0 : index
      %82 = vector.load %arg3[%c0_44, %c0_45] : memref<16x32xf32, #tpu.memory_space<vmem>>, vector<16x32xf32>
      %c0_46 = arith.constant 0 : index
      %c0_47 = arith.constant 0 : index
      %83 = vector.load %arg13[%c0_46, %c0_47] : memref<1x32xf32, #tpu.memory_space<vmem>>, vector<1x32xf32>
      %c0_48 = arith.constant 0 : index
      %c0_49 = arith.constant 0 : index
      %84 = vector.load %arg14[%c0_48, %c0_49] : memref<1x32xf32, #tpu.memory_space<vmem>>, vector<1x32xf32>
      %cst_50 = arith.constant dense<0.000000e+00> : vector<16xf32>
      %85 = vector.multi_reduction <add>, %81, %cst_50 [1] : vector<16x32xf32> to vector<16xf32>
      %86 = vector.shape_cast %85 : vector<16xf32> to vector<16x1xf32>
      %cst_51 = arith.constant 3.200000e+01 : f32
      %87 = vector.broadcast %cst_51 : f32 to vector<16x1xf32>
      %88 = arith.divf %86, %87 : vector<16x1xf32>
      %89 = vector.broadcast %88 : vector<16x1xf32> to vector<16x32xf32>
      %90 = arith.subf %81, %89 : vector<16x32xf32>
      %91 = arith.mulf %90, %90 : vector<16x32xf32>
      %cst_52 = arith.constant dense<0.000000e+00> : vector<16xf32>
      %92 = vector.multi_reduction <add>, %91, %cst_52 [1] : vector<16x32xf32> to vector<16xf32>
      %93 = vector.shape_cast %92 : vector<16xf32> to vector<16x1xf32>
      %cst_53 = arith.constant 3.200000e+01 : f32
      %94 = vector.broadcast %cst_53 : f32 to vector<16x1xf32>
      %95 = arith.divf %93, %94 : vector<16x1xf32>
      %cst_54 = arith.constant 9.99999974E-6 : f32
      %96 = vector.broadcast %cst_54 : f32 to vector<16x1xf32>
      %97 = arith.addf %95, %96 : vector<16x1xf32>
      %98 = math.rsqrt %97 : vector<16x1xf32>
      %99 = vector.broadcast %98 : vector<16x1xf32> to vector<16x32xf32>
      %100 = arith.mulf %90, %99 : vector<16x32xf32>
      %101 = vector.broadcast %83 : vector<1x32xf32> to vector<16x32xf32>
      %102 = arith.mulf %100, %101 : vector<16x32xf32>
      %103 = vector.broadcast %84 : vector<1x32xf32> to vector<16x32xf32>
      %104 = arith.addf %102, %103 : vector<16x32xf32>
      %cst_55 = arith.constant 0.000000e+00 : f32
      %105 = vector.broadcast %cst_55 : f32 to vector<16x32xf32>
      %106 = arith.maximumf %104, %105 : vector<16x32xf32>
      %107 = arith.addf %82, %106 : vector<16x32xf32>
      %108 = vector.shape_cast %107 : vector<16x32xf32> to vector<2x8x32xf32>
      %c0_56 = arith.constant 0 : index
      %c0_57 = arith.constant 0 : index
      %109 = vector.load %arg15[%c0_56, %c0_57] : memref<1x32xf32, #tpu.memory_space<vmem>>, vector<1x32xf32>
      %c0_58 = arith.constant 0 : index
      %c0_59 = arith.constant 0 : index
      %110 = vector.load %arg16[%c0_58, %c0_59] : memref<1x32xf32, #tpu.memory_space<vmem>>, vector<1x32xf32>
      %cst_60 = arith.constant dense<0.000000e+00> : vector<2x8xf32>
      %111 = vector.multi_reduction <add>, %108, %cst_60 [2] : vector<2x8x32xf32> to vector<2x8xf32>
      %112 = vector.shape_cast %111 : vector<2x8xf32> to vector<2x8x1xf32>
      %cst_61 = arith.constant dense<0.000000e+00> : vector<2x1xf32>
      %113 = vector.multi_reduction <add>, %112, %cst_61 [1] : vector<2x8x1xf32> to vector<2x1xf32>
      %114 = vector.shape_cast %113 : vector<2x1xf32> to vector<2x1x1xf32>
      %cst_62 = arith.constant 3.906250e-03 : f32
      %115 = vector.broadcast %cst_62 : f32 to vector<2x1x1xf32>
      %116 = arith.mulf %114, %115 : vector<2x1x1xf32>
      %117 = vector.broadcast %116 : vector<2x1x1xf32> to vector<2x8x32xf32>
      %118 = arith.subf %108, %117 : vector<2x8x32xf32>
      %119 = arith.mulf %118, %118 : vector<2x8x32xf32>
      %cst_63 = arith.constant dense<0.000000e+00> : vector<2x8xf32>
      %120 = vector.multi_reduction <add>, %119, %cst_63 [2] : vector<2x8x32xf32> to vector<2x8xf32>
      %121 = vector.shape_cast %120 : vector<2x8xf32> to vector<2x8x1xf32>
      %cst_64 = arith.constant dense<0.000000e+00> : vector<2x1xf32>
      %122 = vector.multi_reduction <add>, %121, %cst_64 [1] : vector<2x8x1xf32> to vector<2x1xf32>
      %123 = vector.shape_cast %122 : vector<2x1xf32> to vector<2x1x1xf32>
      %cst_65 = arith.constant 3.906250e-03 : f32
      %124 = vector.broadcast %cst_65 : f32 to vector<2x1x1xf32>
      %125 = arith.mulf %123, %124 : vector<2x1x1xf32>
      %cst_66 = arith.constant 9.99999974E-6 : f32
      %126 = vector.broadcast %cst_66 : f32 to vector<2x1x1xf32>
      %127 = arith.addf %125, %126 : vector<2x1x1xf32>
      %128 = math.rsqrt %127 : vector<2x1x1xf32>
      %129 = vector.broadcast %128 : vector<2x1x1xf32> to vector<2x8x32xf32>
      %130 = arith.mulf %118, %129 : vector<2x8x32xf32>
      %131 = vector.shape_cast %109 : vector<1x32xf32> to vector<1x1x32xf32>
      %132 = vector.broadcast %131 : vector<1x1x32xf32> to vector<2x8x32xf32>
      %133 = arith.mulf %130, %132 : vector<2x8x32xf32>
      %134 = vector.shape_cast %110 : vector<1x32xf32> to vector<1x1x32xf32>
      %135 = vector.broadcast %134 : vector<1x1x32xf32> to vector<2x8x32xf32>
      %136 = arith.addf %133, %135 : vector<2x8x32xf32>
      %137 = vector.shape_cast %136 : vector<2x8x32xf32> to vector<16x32xf32>
      %c0_67 = arith.constant 0 : index
      %c0_68 = arith.constant 0 : index
      %138 = vector.load %arg18[%c0_67, %c0_68] : memref<16x32xf32, #tpu.memory_space<vmem>>, vector<16x32xf32>
      tpu.vector_store %arg18[%c0_67, %c0_68], %137 {strides = array<i32>} : memref<16x32xf32, #tpu.memory_space<vmem>>, vector<16x32xf32>,
    } else {
    }
    return
  }
  func.func @transform_0(%arg0: i32, %arg1: i32, %arg2: memref<1xi32, #tpu.memory_space<smem>>) -> (i32, i32) {
    %c0_i32 = arith.constant 0 : i32
    %c0_i32_0 = arith.constant 0 : i32
    return %arg0, %c0_i32 : i32, i32
  }
  func.func @transform_1(%arg0: i32, %arg1: i32, %arg2: memref<1xi32, #tpu.memory_space<smem>>) -> (i32, i32) {
    %0 = arith.index_cast %arg0 : i32 to index
    %1 = memref.load %arg2[%0] : memref<1xi32, #tpu.memory_space<smem>>
    %2 = arith.addi %1, %arg1 : i32
    %c0_i32 = arith.constant 0 : i32
    %c0_i32_0 = arith.constant 0 : i32
    return %2, %c0_i32 : i32, i32
  }
  func.func @transform_2(%arg0: i32, %arg1: i32, %arg2: memref<1xi32, #tpu.memory_space<smem>>) -> (i32, i32) {
    %0 = arith.index_cast %arg0 : i32 to index
    %1 = memref.load %arg2[%0] : memref<1xi32, #tpu.memory_space<smem>>
    %2 = arith.addi %1, %arg1 : i32
    %c0_i32 = arith.constant 0 : i32
    %c0_i32_0 = arith.constant 0 : i32
    return %2, %c0_i32 : i32, i32
  }
  func.func @transform_3(%arg0: i32, %arg1: i32, %arg2: memref<1xi32, #tpu.memory_space<smem>>) -> (i32, i32) {
    %0 = arith.index_cast %arg0 : i32 to index
    %1 = memref.load %arg2[%0] : memref<1xi32, #tpu.memory_space<smem>>
    %2 = arith.addi %1, %arg1 : i32
    %c0_i32 = arith.constant 0 : i32
    %c0_i32_0 = arith.constant 0 : i32
    return %2, %c0_i32 : i32, i32
  }
  func.func @transform_4(%arg0: i32, %arg1: i32, %arg2: memref<1xi32, #tpu.memory_space<smem>>) -> (i32, i32) {
    %c0_i32 = arith.constant 0 : i32
    %c0_i32_0 = arith.constant 0 : i32
    %c0_i32_1 = arith.constant 0 : i32
    return %c0_i32, %c0_i32_0 : i32, i32
  }
  func.func @transform_5(%arg0: i32, %arg1: i32, %arg2: memref<1xi32, #tpu.memory_space<smem>>) -> (i32, i32) {
    %c0_i32 = arith.constant 0 : i32
    %c0_i32_0 = arith.constant 0 : i32
    %c0_i32_1 = arith.constant 0 : i32
    return %c0_i32, %c0_i32_0 : i32, i32
  }
  func.func @transform_6(%arg0: i32, %arg1: i32, %arg2: memref<1xi32, #tpu.memory_space<smem>>) -> (i32, i32) {
    %c0_i32 = arith.constant 0 : i32
    %c0_i32_0 = arith.constant 0 : i32
    %c0_i32_1 = arith.constant 0 : i32
    return %c0_i32, %c0_i32_0 : i32, i32
  }
  func.func @transform_7(%arg0: i32, %arg1: i32, %arg2: memref<1xi32, #tpu.memory_space<smem>>) -> (i32, i32) {
    %c0_i32 = arith.constant 0 : i32
    %c0_i32_0 = arith.constant 0 : i32
    %c0_i32_1 = arith.constant 0 : i32
    return %c0_i32, %c0_i32_0 : i32, i32
  }
  func.func @transform_8(%arg0: i32, %arg1: i32, %arg2: memref<1xi32, #tpu.memory_space<smem>>) -> (i32, i32) {
    %c0_i32 = arith.constant 0 : i32
    %c0_i32_0 = arith.constant 0 : i32
    %c0_i32_1 = arith.constant 0 : i32
    return %c0_i32, %c0_i32_0 : i32, i32
  }
  func.func @transform_9(%arg0: i32, %arg1: i32, %arg2: memref<1xi32, #tpu.memory_space<smem>>) -> (i32, i32) {
    %c0_i32 = arith.constant 0 : i32
    %c0_i32_0 = arith.constant 0 : i32
    %c0_i32_1 = arith.constant 0 : i32
    return %c0_i32, %c0_i32_0 : i32, i32
  }
  func.func @transform_10(%arg0: i32, %arg1: i32, %arg2: memref<1xi32, #tpu.memory_space<smem>>) -> (i32, i32) {
    %c0_i32 = arith.constant 0 : i32
    %c0_i32_0 = arith.constant 0 : i32
    %c0_i32_1 = arith.constant 0 : i32
    return %c0_i32, %c0_i32_0 : i32, i32
  }
  func.func @transform_11(%arg0: i32, %arg1: i32, %arg2: memref<1xi32, #tpu.memory_space<smem>>) -> (i32, i32) {
    %c0_i32 = arith.constant 0 : i32
    %c0_i32_0 = arith.constant 0 : i32
    %c0_i32_1 = arith.constant 0 : i32
    return %c0_i32, %c0_i32_0 : i32, i32
  }
  func.func @transform_12(%arg0: i32, %arg1: i32, %arg2: memref<1xi32, #tpu.memory_space<smem>>) -> (i32, i32) {
    %c0_i32 = arith.constant 0 : i32
    %c0_i32_0 = arith.constant 0 : i32
    %c0_i32_1 = arith.constant 0 : i32
    return %c0_i32, %c0_i32_0 : i32, i32
  }
  func.func @transform_13(%arg0: i32, %arg1: i32, %arg2: memref<1xi32, #tpu.memory_space<smem>>) -> (i32, i32) {
    %c0_i32 = arith.constant 0 : i32
    %c0_i32_0 = arith.constant 0 : i32
    %c0_i32_1 = arith.constant 0 : i32
    return %c0_i32, %c0_i32_0 : i32, i32
  }
  func.func @transform_14(%arg0: i32, %arg1: i32, %arg2: memref<1xi32, #tpu.memory_space<smem>>) -> (i32, i32) {
    %0 = arith.index_cast %arg0 : i32 to index
    %1 = memref.load %arg2[%0] : memref<1xi32, #tpu.memory_space<smem>>
    %2 = arith.addi %1, %arg1 : i32
    %c0_i32 = arith.constant 0 : i32
    %c0_i32_0 = arith.constant 0 : i32
    return %2, %c0_i32 : i32, i32
  }
  func.func @transform_15(%arg0: i32, %arg1: i32, %arg2: memref<1xi32, #tpu.memory_space<smem>>) -> (i32, i32) {
    %c0_i32 = arith.constant 0 : i32
    %c0_i32_0 = arith.constant 0 : i32
    return %arg0, %c0_i32 : i32, i32
  }
}

</mosaic_0001>

<bundles_post_ra>
// kernel: gps_layer_forward.5
= control target key start
LH: loop header
LB: loop body
LE: loop exit
PB: predicated region body
PF: predicated region fallthrough
CT: control target
= control target key end

     0   :  { %v318_v3 = vmov 0.0   ;;  %vm319_vm0 = vmmov 0   ;;  %s447_s0 = inlined_call_operand.vmem [shape: f32[2,8,32], index: 0, kind: input, shape index: {}]   ;;  %s448_s1 = inlined_call_operand.vmem [shape: f32[2,8,32], index: 1, kind: input, shape index: {}]   ;;  %s449_s2 = inlined_call_operand.vmem [shape: f32[32,64], index: 2, kind: input, shape index: {}]   ;;  %s450_s3 = inlined_call_operand.vmem [shape: f32[1,64], index: 3, kind: input, shape index: {}]   ;;  %s451_s4 = inlined_call_operand.vmem [shape: f32[64,32], index: 4, kind: input, shape index: {}]   ;;  %s452_s5 = inlined_call_operand.vmem [shape: f32[1,32], index: 5, kind: input, shape index: {}]   ;;  %s453_s6 = inlined_call_operand.vmem [shape: f32[1,32], index: 6, kind: input, shape index: {}]   ;;  %s454_s7 = inlined_call_operand.vmem [shape: f32[1,32], index: 7, kind: input, shape index: {}]   ;;  %s455_s8 = inlined_call_operand.hbm [shape: f32[2,8,32], index: 8, kind: output, shape index: {}]  }
   0x1   :  { %v38_v0 = vld [vmem:[%s449_s2] sm:$0xff]  ;;  %v39_v1 = vld [vmem:[%s449_s2 + $0x8] sm:$0xff]  ;;  %v40_v2 = vld [vmem:[%s449_s2 + $0x10] sm:$0xff]  ;;  %265 = vmatprep.subr.bf16.mxu0 %v318_v3  ;;  %269 = vmatprep.mubr.msk.bf16.mxu0 %vm319_vm0, %v318_v3 }
   0x2   :  { %v42_v4 = vpack.c.bf16 %v39_v1, %v38_v0  ;;  %v41_v5 = vld [vmem:[%s449_s2 + $0x18] sm:$0xff]  ;;  %v31_v6 = vld [vmem:[%s447_s0] sm:$0xff]  ;;  %v32_v7 = vld [vmem:[%s447_s0 + $0x8] sm:$0xff]  ;;  %273 = vmatprep.subr.bf16.mxu1 %v318_v3  ;;  %281 = vmatprep.mubr.msk.bf16.mxu1 %vm319_vm0, %v318_v3 }
   0x3   :  { %v33_v8 = vld [vmem:[%s448_s1] sm:$0xff]  ;;  %v34_v9 = vld [vmem:[%s448_s1 + $0x8] sm:$0xff]  ;;  %v43_v11 = vpack.c.bf16 %v41_v5, %v40_v2  ;;  %v101_v15 = vld [vmem:[%s451_s4 + $0x10] sm:$0xff] }
   0x4   :  { %v99_v10 = vld [vmem:[%s451_s4] sm:$0xff]  ;;  %266 = vmatpush3.bf16.msra.mxu0 %v42_v4  ;;  %v35_v12 = vadd.f32 %v33_v8, %v31_v6  ;;  %v36_v13 = vadd.f32 %v34_v9, %v32_v7  ;;  %v100_v14 = vld [vmem:[%s451_s4 + $0x8] sm:$0xff]  ;;  %v102_v16 = vld [vmem:[%s451_s4 + $0x18] sm:$0xff] }
   0x5   :  { %267 = vmatprep.subr.bf16.mxu0 %v318_v3  ;;  %v107_v17 = vpack.c.bf16 %v100_v14, %v99_v10 }
   0x6   :  { %13 = vsyncpa [#allocation3], 0  ;;  %v37_v18 = vpack.c.bf16 %v36_v13, %v35_v12  ;;  %v108_v19 = vpack.c.bf16 %v102_v16, %v101_v15  ;;  %vm51_vm1 = vcmask 261120   ;;  %v103_v20 = vld [vmem:[%s451_s4 + $0x20] sm:$0xff]  ;;  %v104_v21 = vld [vmem:[%s451_s4 + $0x28] sm:$0xff]  ;;  %vm118_vm2 = vcmask 523264  }
   0x7   :  { %274 = vmatpush3.bf16.msra.mxu1 %v107_v17  ;;  %v109_v22 = vpack.c.bf16 %v104_v21, %v103_v20  ;;  %v105_v23 = vld [vmem:[%s451_s4 + $0x30] sm:$0xff]  ;;  %v106_v24 = vld [vmem:[%s451_s4 + $0x38] sm:$0xff]  ;;  %v251_v26 = vld [vmem:[%s450_s3] ss:$0 sm:$0xff]  ;;  %s320_s17 = smov [#allocation2]  }
   0x8   :  { %268 = vmatpush3.bf16.msra.mxu0 %v43_v11  ;;  %275 = vmatprep.subr.bf16.mxu1 %v318_v3  ;;  %v110_v25 = vpack.c.bf16 %v106_v24, %v105_v23  ;;  %v253_v36 = vld [vmem:[%s452_s5] ss:$0 sm:$0xff]  ;;  %s240_s18 = sshll.u32 %s320_s17, 4  ;;  %s241_s18 = int_to_ptr.vmem [resolvable:$true] %s240_s18 }
   0x9   :  { %v255_v24 = vld [vmem:[%s453_s6] ss:$0 sm:$0xff]  ;;  %s294_s19 = scalar_lea.vmem %s241_s18, 256  ;;  %p299_p1 = scmp.lt.s32.totalorder %s241_s18, %s241_s18 }
   0xa   :  { %p295_p0 = scmp.ne.s32.totalorder %s241_s18, %s294_s19  ;;  %p300_p2 = scmp.lt.s32.totalorder %s294_s19, %s294_s19 }
   0xb   :  { %270 = vmatmul.mubr.msk.bf16.vlgmr.msra.gmra.mrb[0].mxu0 %vm51_vm1, %v37_v18  ;;  %276 = vmatpush3.bf16.msra.mxu1 %v108_v19 }
   0xc   :  { %277 = vmatprep.subr.bf16.mxu1 %v318_v3  ;;  %p301_p3 = por %p300_p2, %p299_p1 }
   0xe   :  { %p302_p4 = pnand %p301_p3, %p295_p0 }
   0xf   :  { %278 = vmatpush3.bf16.msra.mxu1 %v109_v22 }
  0x10   :  { %279 = vmatprep.subr.bf16.mxu1 %v318_v3 }
  0x13   :  { %280 = vmatpush3.bf16.msra.mxu1 %v110_v25 }
  0xde   :  { %v89_v27 = vpop.f32.mrb[0].mxu0 }
  0xdf   :  { %v90_v28 = vadd.f32 %v251_v26, %v89_v27  ;;  %v271_v29 = vpop.f32.mrb[1].mxu0 }
  0xe0   :  { %v92_v30 = vpop.f32.mrb[2].mxu0 }
  0xe1   :  { %v93_v31 = vadd.f32 %v251_v26, %v92_v30  ;;  %v272_v32 = vpop.f32.mrb[3].mxu0  ;;  %v96_v33 = vmax.f32 %v90_v28, 0.0  ;;  %v256_v26 = vld [vmem:[%s454_s7] ss:$0 sm:$0xff] }
  0xe3   :  { %v97_v34 = vmax.f32 %v93_v31, 0.0 }
  0xe5   :  { %v98_v35 = vpack.c.bf16 %v97_v34, %v96_v33 }
  0xe7   :  { %282 = vmatmul.mubr.msk.bf16.vlgmr.msra.gmra.mrb[0].mxu1 %vm118_vm2, %v98_v35 }
 0x1ba   :  { %v156_v37 = vpop.f32.mrb[0].mxu1 }
 0x1bb   :  { %v157_v38 = vadd.f32 %v253_v36, %v156_v37  ;;  %v283_v39 = vpop.f32.mrb[1].mxu1 }
 0x1bc   :  { %v159_v40 = vpop.f32.mrb[2].mxu1 }
 0x1bd   :  { %v160_v41 = vadd.f32 %v253_v36, %v159_v40  ;;  %v284_v42 = vpop.f32.mrb[3].mxu1  ;;  %v163_v43 = vadd.f32 %v157_v38, %v35_v12 }
 0x1bf   :  { %v167_v44 = vsel %vm51_vm1, %v163_v43, 0.0  ;;  %v164_v45 = vadd.f32 %v160_v41, %v36_v13 }
 0x1c0   :  { %168 = vadd.xlane.f32.xlu0 %v167_v44 }
 0x1c1   :  { %v170_v46 = vsel %vm51_vm1, %v164_v45, 0.0 }
 0x1c4   :  { %171 = vadd.xlane.f32.xlu0 %v170_v46 }
 0x24d   :  { %v169_v47 = vpop.xlane.xlu0 %168 }
 0x24e   :  { %v173_v48 = vrot.slane %v169_v47, 4 }
 0x250   :  { %v174_v49 = vadd.f32 %v173_v48, %v169_v47 }
 0x251   :  { %v172_v50 = vpop.xlane.xlu0 %171 }
 0x252   :  { %v175_v51 = vrot.slane %v174_v49, 2  ;;  %v179_v52 = vrot.slane %v172_v50, 4 }
 0x254   :  { %v176_v53 = vadd.f32 %v175_v51, %v174_v49  ;;  %v180_v54 = vadd.f32 %v179_v52, %v172_v50 }
 0x256   :  { %v177_v55 = vrot.slane %v176_v53, 1  ;;  %v181_v56 = vrot.slane %v180_v54, 2 }
 0x258   :  { %v178_v57 = vadd.f32 %v177_v55, %v176_v53  ;;  %v182_v58 = vadd.f32 %v181_v56, %v180_v54 }
 0x25a   :  { %v183_v59 = vrot.slane %v182_v58, 1  ;;  %v185_v60 = vmul.f32 0.00390625, %v178_v57 }
 0x25c   :  { %v184_v61 = vadd.f32 %v183_v59, %v182_v58  ;;  %v187_v62 = vsub.f32 %v163_v43, %v185_v60 }
 0x25e   :  { %v186_v63 = vmul.f32 0.00390625, %v184_v61  ;;  %v189_v0 = vmul.f32 %v187_v62, %v187_v62 }
 0x260   :  { %v191_v1 = vsel %vm51_vm1, %v189_v0, 0.0  ;;  %v188_v2 = vsub.f32 %v164_v45, %v186_v63 }
 0x261   :  { %192 = vadd.xlane.f32.xlu1 %v191_v1 }
 0x262   :  { %v190_v3 = vmul.f32 %v188_v2, %v188_v2 }
 0x264   :  { %v194_v4 = vsel %vm51_vm1, %v190_v3, 0.0 }
 0x265   :  { %195 = vadd.xlane.f32.xlu1 %v194_v4 }
 0x2ee   :  { %v193_v5 = vpop.xlane.xlu1 %192 }
 0x2ef   :  { %v197_v6 = vrot.slane %v193_v5, 4 }
 0x2f1   :  { %v198_v7 = vadd.f32 %v197_v6, %v193_v5 }
 0x2f2   :  { %v196_v8 = vpop.xlane.xlu1 %195 }
 0x2f3   :  { %v199_v9 = vrot.slane %v198_v7, 2  ;;  %v203_v10 = vrot.slane %v196_v8, 4 }
 0x2f5   :  { %v200_v11 = vadd.f32 %v199_v9, %v198_v7  ;;  %v204_v12 = vadd.f32 %v203_v10, %v196_v8 }
 0x2f7   :  { %v201_v13 = vrot.slane %v200_v11, 1  ;;  %v205_v14 = vrot.slane %v204_v12, 2 }
 0x2f9   :  { %v202_v15 = vadd.f32 %v201_v13, %v200_v11  ;;  %v206_v16 = vadd.f32 %v205_v14, %v204_v12 }
 0x2fb   :  { %v209_v17 = vmul.f32 0.00390625, %v202_v15  ;;  %v207_v18 = vrot.slane %v206_v16, 1 }
 0x2fd   :  { %v211_v19 = vadd.f32 1e-05, %v209_v17  ;;  %v208_v20 = vadd.f32 %v207_v18, %v206_v16 }
 0x2ff   :  { %290 = vrsqrt.f32 %v211_v19  ;;  %v210_v21 = vmul.f32 0.00390625, %v208_v20 }
 0x301   :  { %v212_v22 = vadd.f32 1e-05, %v210_v21 }
 0x303   :  { %292 = vrsqrt.f32 %v212_v22 }
 0x309   :  { %v291_v23 = vpop.eup %290 }
 0x30a   :  { %v215_v25 = vmul.f32 %v291_v23, %v187_v62 }
 0x30c   :  { %v223_v27 = vmul.f32 %v255_v24, %v215_v25 }
 0x30d   :  { %v293_v28 = vpop.eup %292 }
 0x30e   :  { %v216_v29 = vmul.f32 %v293_v28, %v188_v2  ;;  %v231_v30 = vadd.f32 %v256_v26, %v223_v27 }
 0x310   :  { %v224_v31 = vmul.f32 %v255_v24, %v216_v29  ;;  %233 = vst.msk [vmem:[#allocation2] sm:$0xff] %vm51_vm1, %v231_v30 }
 0x312   :  { %v232_v32 = vadd.f32 %v256_v26, %v224_v31 }
 0x314   :  { %234 = vst.msk [vmem:[#allocation2 + $0x8] sm:$0xff] %vm51_vm1, %v232_v32 }
 0x315   :  { %305 = shalt.err (!%p302_p4)
}
 0x316   :  { %s306_s20 = scalar_lea.hbm %s455_s8, 256 }
 0x317   :  { %p307_p5 = scmp.ne.s32.totalorder %s455_s8, %s306_s20  ;;  %p310_p6 = scmp.lt.u32.totalorder %s306_s20, %s455_s8 }
 0x319   :  { %p312_p7 = pnand %p310_p6, %p307_p5 }
 0x31b   :  { %315 = shalt.err (!%p312_p7)
}
 0x31c   :  { %s321_s23 = smov 128   ;;  %s322_s24 = smov 8  }
 0x31d   :  { %246 = dma.vmem_to_hbm [thread:$0]  %s241_s18, 256, %s455_s8, [#allocation3], %s321_s23, %s321_s23, %s322_s24  }
 0x31e   :  { %316 = dma.done.wait [#allocation3], 256  }
 0x31f   :  { %317 = vsyncadd [#allocation3], 4294967040 }
 0x320   :  { %250 = vsyncpa [#allocation3], 1 }

// kernel: gps_layer_forward.3
= control target key start
LH: loop header
LB: loop body
LE: loop exit
PB: predicated region body
PF: predicated region fallthrough
CT: control target
= control target key end

     0   :  { %s1692_s0 = inlined_call_operand.<no memory space> [shape: s32[1], index: 0, kind: input, shape index: {}]   ;;  %s1693_s1 = inlined_call_operand.vmem [shape: f32[16,32], index: 1, kind: input, shape index: {}]   ;;  %s1694_s2 = inlined_call_operand.vmem [shape: f32[32,32], index: 2, kind: input, shape index: {}]   ;;  %s1695_s3 = inlined_call_operand.vmem [shape: s32[32,1], index: 3, kind: input, shape index: {}]   ;;  %s1696_s4 = inlined_call_operand.vmem [shape: s32[32,1], index: 4, kind: input, shape index: {}]   ;;  %s1697_s5 = inlined_call_operand.vmem [shape: f32[32,128], index: 5, kind: input, shape index: {}]   ;;  %s1698_s6 = inlined_call_operand.vmem [shape: f32[1,128], index: 6, kind: input, shape index: {}]   ;;  %s1699_s7 = inlined_call_operand.vmem [shape: f32[32,32], index: 7, kind: input, shape index: {}]   ;;  %s1700_s8 = inlined_call_operand.vmem [shape: f32[1,32], index: 8, kind: input, shape index: {}]   ;;  %s1701_s9 = inlined_call_operand.vmem [shape: f32[1,32], index: 9, kind: input, shape index: {}]   ;;  %s1702_s10 = inlined_call_operand.vmem [shape: f32[1,32], index: 10, kind: input, shape index: {}]   ;;  %s1703_s11 = inlined_call_operand.vmem [shape: f32[1,32], index: 11, kind: input, shape index: {}]   ;;  %s1704_s12 = inlined_call_operand.vmem [shape: f32[1,32], index: 12, kind: input, shape index: {}]   ;;  %s1705_s13 = inlined_call_operand.vmem [shape: f32[1,32], index: 13, kind: input, shape index: {}]   ;;  %s1706_s14 = inlined_call_operand.vmem [shape: f32[1,32], index: 14, kind: input, shape index: {}]   ;;  %s1707_s15 = inlined_call_operand.hbm [shape: f32[32,32], index: 15, kind: output, shape index: {0}]   ;;  %s1708_s16 = inlined_call_operand.vmem [shape: f32[16,32], index: 16, kind: output, shape index: {1}]  }
   0x1   :  { %1710 = sst [smem:[#allocation9_spill]] %s1692_s0 }
   0x2   :  { %v144_v0 = vld [vmem:[%s1697_s5] sm:$0xff]  ;;  %v145_v1 = vld [vmem:[%s1697_s5 + $0x8] sm:$0xff]  ;;  %v146_v2 = vld [vmem:[%s1697_s5 + $0x10] sm:$0xff]  ;;  %v1345_v3 = vmov 0.0   ;;  %vm1346_vm0 = vmmov 0   ;;  %s1711_s0 = sld [smem:[#allocation9_spill]] }
   0x3   :  { %1166 = vmatprep.subr.bf16.mxu0 %v1345_v3  ;;  %v148_v4 = vpack.c.bf16 %v145_v1, %v144_v0  ;;  %v147_v5 = vld [vmem:[%s1697_s5 + $0x18] sm:$0xff]  ;;  %1170 = vmatprep.mubr.msk.bf16.mxu0 %vm1346_vm0, %v1345_v3  ;;  %v1347_v6 = vmov 0  }
   0x4   :  { %1257 = vset.pattern.permute.xlu1 %v1347_v6  ;;  %1256 = vset.pattern.permute.xlu0 %v1347_v6 }
   0x8   :  { %s1093_s17 = sshll.u32 %s1711_s0, 2 }
   0x9   :  { %p106_p0 = scmp.lt.s32.totalorder %s1093_s17, 3 }
   0xa   :  { %23 = vsyncpa [#allocation7], 0  ;;  %1167 = vmatpush3.bf16.msra.mxu0 %v148_v4  ;;  %v149_v7 = vpack.c.bf16 %v147_v5, %v146_v2  ;;  %v1459_v8 = vld [vmem:[%s1693_s1] sm:$0xff]  ;;  %v1464_v9 = vld [vmem:[%s1693_s1 + $0x8] sm:$0xff]  ;;  %vm157_vm1 = vcmask 261120   ;;  %v209_v18 = vlaneseq  ;;  %vm275_vm3 = vcmask 130048  }
   0xb   :  { %1168 = vmatprep.subr.bf16.mxu0 %v1345_v3  ;;  %s1713_s17 = smov (!%p106_p0, %s1093_s17), 3  ;;  %v143_v10 = vpack.c.bf16 %v1464_v9, %v1459_v8  ;;  %v1099_v21 = vld [vmem:[%s1698_s6] ss:$0 sm:$0xff]  ;;  %v471_v31 = vld [vmem:[%s1699_s7 + $0x8] sm:$0xff]  ;;  %v472_v34 = vld [vmem:[%s1699_s7 + $0x10] sm:$0xff]  ;;  %vm204_vm11 = vcmask 523264  }
   0xc   :  { %s1469_s21 = sshll.u32 %s1713_s17, 3  ;;  %v1480_v19 = vand.u32 127, %v209_v18  ;;  %v470_v30 = vld [vmem:[%s1699_s7] sm:$0xff]  ;;  %s1349_s17 = smov 32   ;;  %v473_v35 = vld [vmem:[%s1699_s7 + $0x18] sm:$0xff]  ;;  %206 = vst.msk [vmem:[#allocation3 + $0x8] sm:$0xff] %vm204_vm11, %v1345_v3 }
   0xd   :  { %s119_s24 = scalar_lea.vmem %s1695_s3, %s1469_s21  ;;  %s129_s26 = scalar_lea.vmem %s1696_s4, %s1469_s21  ;;  %v474_v32 = vpack.c.bf16 %v471_v31, %v470_v30  ;;  %v475_v36 = vpack.c.bf16 %v473_v35, %v472_v34  ;;  %205 = vst.msk [vmem:[#allocation3] sm:$0xff] %vm204_vm11, %v1345_v3 }
   0xe   :  { %1169 = vmatpush3.bf16.msra.mxu0 %v149_v7  ;;  %v213_v11 = vld [vmem:[%s119_s24 + $0x10] sm:$0xff]  ;;  %v211_v12 = vld [vmem:[%s119_s24] sm:$0xff]  ;;  %v212_v13 = vld [vmem:[%s119_s24 + $0x8] sm:$0xff]  ;;  %s1348_s4 = smov 96   ;;  %s109_s5 = scalar_lea.vmem %s1694_s2, %s1469_s21 }
   0xf   :  { %222 = vperm.xlu1 %1257, %v213_v11   ;;  %216 = vperm.xlu0 %1256, %v211_v12   ;;  %v214_v14 = vld [vmem:[%s119_s24 + $0x18] sm:$0xff]  ;;  %v239_v15 = vld [vmem:[%s129_s26] sm:$0xff]  ;;  %v241_v16 = vld [vmem:[%s129_s26 + $0x10] sm:$0xff]  ;;  %s1350_s2 = smov 64   ;;  %s1134_s29 = sshll.u32 %s1711_s0, 9 }
  0x10   :  { %v242_v17 = vld [vmem:[%s129_s26 + $0x18] sm:$0xff]  ;;  %v240_v33 = vld [vmem:[%s129_s26 + $0x8] sm:$0xff]  ;;  %1194 = vmatprep.subr.bf16.mxu0 %v474_v32  ;;  %v1512_v37 = vld [vmem:[%s109_s5] sm:$0xff]  ;;  %s1351_s30 = smov [#allocation6]   ;;  %s1057_s20 = scalar_lea.hbm %s1707_s15, %s1134_s29 }
  0x11   :  { %1171 = vmatmul.mubr.msk.bf16.vlgmr.msra.gmra.mrb[0].mxu0 %vm157_vm1, %v143_v10  ;;  %v1514_v38 = vld [vmem:[%s109_s5 + $0x8] sm:$0xff]  ;;  %v1518_v40 = vld [vmem:[%s109_s5 + $0x10] sm:$0xff]  ;;  %v1520_v41 = vld [vmem:[%s109_s5 + $0x18] sm:$0xff] }
  0x12   :  { %1195 = vmatpush3.bf16.msra.mxu0 %v474_v32  ;;  %v468_v39 = vpack.c.bf16 %v1514_v38, %v1512_v37  ;;  %v469_v42 = vpack.c.bf16 %v1520_v41, %v1518_v40 }
  0x13   :  { %219 = vperm.xlu0 %1256, %v212_v13   ;;  %1196 = vmatprep.subr.bf16.mxu0 %v475_v36 }
  0x14   :  { %1198 = vmatprep.mubr.msk.bf16.mxu0 %vm157_vm1, %v468_v39 }
  0x16   :  { %1197 = vmatpush3.bf16.msra.mxu0 %v475_v36 }
  0x17   :  { %225 = vperm.xlu0 %1256, %v214_v14  }
  0x19   :  { %1199 = vmatmul.mubr.msk.bf16.vlgmr.msra.gmra.mrb[4].mxu0 %vm157_vm1, %v469_v42 }
  0x1b   :  { %244 = vperm.xlu0 %1256, %v239_v15  }
  0x1f   :  { %250 = vperm.xlu0 %1256, %v241_v16   ;;  %v1117_v16 = vld [vmem:[%s1700_s8] ss:$0 sm:$0xff] }
  0x23   :  { %253 = vperm.xlu0 %1256, %v242_v17  }
  0x8e   :  { %v217_v20 = vpop.permute.xlu0 %216  ;;  %v223_v43 = vpop.permute.xlu1 %222 }
  0x8f   :  { %vm227_vm2 = vcmp.eq.s32.totalorder %v1480_v19, %v217_v20  ;;  %vm229_vm5 = vcmp.eq.s32.totalorder %v1480_v19, %v223_v43 }
  0x90   :  { %v1101_v23 = vsel %vm227_vm2, 1.0, %v1345_v3  ;;  %v1103_v55 = vsel %vm229_vm5, 1.0, %v1345_v3 }
  0x91   :  { %1178 = vmatprep.mubr.msk.f32.mxu1 %vm275_vm3, %v1101_v23 }
  0x92   :  { %v220_v45 = vpop.permute.xlu0 %219 }
  0x93   :  { %vm228_vm4 = vcmp.eq.s32.totalorder %v1480_v19, %v220_v45 }
  0x94   :  { %v1102_v52 = vsel %vm228_vm4, 1.0, %v1345_v3 }
  0x96   :  { %v226_v53 = vpop.permute.xlu0 %225 }
  0x97   :  { %vm230_vm6 = vcmp.eq.s32.totalorder %v1480_v19, %v226_v53 }
  0x98   :  { %v1104_v56 = vsel %vm230_vm6, 1.0, %v1345_v3 }
  0x9a   :  { %v245_v57 = vpop.permute.xlu0 %244 }
  0x9b   :  { %vm255_vm7 = vcmp.eq.s32.totalorder %v1480_v19, %v245_v57 }
  0x9c   :  { %v1540_v58 = vsel %vm255_vm7, 1.0, %v1345_v3 }
  0x9e   :  { %v251_v60 = vpop.permute.xlu0 %250 }
  0x9f   :  { %vm257_vm9 = vcmp.eq.s32.totalorder %v1480_v19, %v251_v60 }
  0xa0   :  { %v1551_v4 = vsel %vm257_vm9, 1.0, %v1345_v3 }
  0xa2   :  { %v254_v1 = vpop.permute.xlu0 %253 }
  0xa3   :  { %vm258_vm10 = vcmp.eq.s32.totalorder %v1480_v19, %v254_v1 }
  0xa4   :  { %v1559_v5 = vsel %vm258_vm10, 1.0, %v1345_v3 }
  0xe4   :  { %v195_v22 = vpop.f32.mrb[0].mxu0 }
  0xe5   :  { %v1172_v24 = vpop.f32.mrb[1].mxu0  ;;  %v1488_v26 = vadd.f32 %v1099_v21, %v195_v22 }
  0xe6   :  { %v198_v25 = vpop.f32.mrb[2].mxu0 }
  0xe7   :  { %v1490_v27 = vadd.f32 %v1099_v21, %v198_v25  ;;  %v1173_v28 = vpop.f32.mrb[3].mxu0 }
  0xe9   :  { %v1258_v29 = vpack.i.bf16 %v1490_v27, %v1488_v26 }
  0xeb   :  { %1259 = vrot.lane.b32.xlu1 %v1258_v29, %s1348_s4 }
  0xec   :  { %v1200_v6 = vpop.f32.mrb[4].mxu0 }
  0xed   :  { %v524_v7 = vpop.f32.mrb[5].mxu0  ;;  %v533_v25 = vadd.f32 %v1200_v6, %v1117_v16 }
  0xee   :  { %v1201_v10 = vpop.f32.mrb[6].mxu0  ;;  %v525_v18 = vadd.f32 %v1117_v16, %v524_v7 }
  0xef   :  { %1264 = vrot.lane.b32.xlu1 %v1258_v29, %s1349_s17  ;;  %v527_v11 = vpop.f32.mrb[7].mxu0 }
  0xf0   :  { %v528_v17 = vadd.f32 %v1117_v16, %v527_v11 }
  0xf3   :  { %247 = vperm.xlu1 %1257, %v240_v33  }
  0xf7   :  { %1269 = vrot.lane.b32.xlu1 %v1258_v29, %s1350_s2 }
 0x15d   :  { %v1260_v44 = vpop.permute.xlu1 %1259 }
 0x15e   :  { %v1262_v46 = vunpack.i.h.bf16 %v1260_v44  ;;  %v1261_v47 = vunpack.i.l.bf16 %v1260_v44 }
 0x160   :  { %v1223_v48 = vpack.c.bf16 %v1262_v46, %v1261_v47 }
 0x161   :  { %v1265_v49 = vpop.permute.xlu1 %1264 }
 0x162   :  { %v1267_v50 = vunpack.i.h.bf16 %v1265_v49  ;;  %v1266_v51 = vunpack.i.l.bf16 %v1265_v49  ;;  %1224 = vmatprep.subr.bf16.mxu1 %v1223_v48 }
 0x163   :  { %1226 = vmatpush3.bf16.msra.mxu1 %v1223_v48 }
 0x164   :  { %v1227_v54 = vpack.c.bf16 %v1267_v50, %v1266_v51 }
 0x166   :  { %1179 = vmatmul.mubr.msk.f32.vlgmr.msra.gmra.mrb[0].mxu1 %vm275_vm3, %v1102_v52  ;;  %1228 = vmatprep.subr.bf16.mxu1 %v1227_v54 }
 0x167   :  { %1230 = vmatpush3.bf16.msra.mxu1 %v1227_v54  ;;  %1181 = vmatprep.mubr.msk.f32.mxu1 %vm275_vm3, %v1103_v55 }
 0x16a   :  { %1182 = vmatmul.mubr.msk.f32.gmra.mrb[2].mxu1 %vm275_vm3, %v1104_v56 }
 0x16b   :  { %1188 = vmatprep.mubr.msk.f32.mxu1 %vm275_vm3, %v1101_v23  ;;  %v536_v23 = vadd.f32 %v1201_v10, %v1117_v16 }
 0x16e   :  { %1189 = vmatmul.mubr.msk.f32.vlgmr.msra.gmra.mrb[4].mxu1 %vm275_vm3, %v1102_v52 }
 0x16f   :  { %1191 = vmatprep.mubr.msk.f32.mxu1 %vm275_vm3, %v1103_v55 }
 0x172   :  { %v248_v59 = vpop.permute.xlu1 %247  ;;  %1192 = vmatmul.mubr.msk.f32.gmra.mrb[6].mxu1 %vm275_vm3, %v1104_v56 }
 0x173   :  { %1206 = vmatprep.mubr.msk.f32.mxu1 %vm275_vm3, %v1540_v58  ;;  %vm256_vm8 = vcmp.eq.s32.totalorder %v1480_v19, %v248_v59 }
 0x174   :  { %v1548_v2 = vsel %vm256_vm8, 1.0, %v1345_v3 }
 0x176   :  { %v1270_v61 = vpop.permute.xlu1 %1269 }
 0x177   :  { %v1272_v62 = vunpack.i.h.bf16 %v1270_v61  ;;  %v1271_v63 = vunpack.i.l.bf16 %v1270_v61 }
 0x179   :  { %v1231_v0 = vpack.c.bf16 %v1272_v62, %v1271_v63 }
 0x17b   :  { %1232 = vmatprep.subr.bf16.mxu1 %v1231_v0 }
 0x17c   :  { %1234 = vmatpush3.bf16.msra.mxu1 %v1231_v0 }
 0x17f   :  { %1207 = vmatmul.mubr.msk.f32.vlgmr.msra.gmra.mrb[4].mxu1 %vm275_vm3, %v1548_v2 }
 0x180   :  { %1209 = vmatprep.mubr.msk.f32.mxu1 %vm275_vm3, %v1551_v4 }
 0x183   :  { %1210 = vmatmul.mubr.msk.f32.gmra.mrb[6].mxu1 %vm275_vm3, %v1559_v5 }
 0x239   :  { %v1180_v12 = vpop.f32.mrb[0].mxu1 }
 0x23a   :  { %v354_v13 = vpop.f32.mrb[1].mxu1 }
 0x23d   :  { %v1183_v14 = vpop.f32.mrb[2].mxu1 }
 0x23e   :  { %v364_v15 = vpop.f32.mrb[3].mxu1 }
 0x252   :  { %v1208_v19 = vpop.f32.mrb[4].mxu1 }
 0x253   :  { %v1566_v20 = vadd.f32 %v1208_v19, %v528_v17  ;;  %v623_v21 = vpop.f32.mrb[5].mxu1 }
 0x254   :  { %v1568_v22 = vadd.f32 %v623_v21, %v525_v18 }
 0x255   :  { %v647_v24 = vsub.f32 0.0, %v1566_v20 }
 0x256   :  { %v646_v28 = vsub.f32 0.0, %v1568_v22  ;;  %v1211_v29 = vpop.f32.mrb[6].mxu1 }
 0x257   :  { %v652_v30 = vmul.f32 1.442695, %v647_v24  ;;  %v1572_v31 = vadd.f32 %v1211_v29, %v536_v23  ;;  %v633_v32 = vpop.f32.mrb[7].mxu1 }
 0x258   :  { %v650_v33 = vmul.f32 1.442695, %v646_v28  ;;  %v1574_v34 = vadd.f32 %v633_v32, %v533_v25 }
 0x259   :  { %1283 = vpow2.f32 %v652_v30  ;;  %v649_v35 = vsub.f32 0.0, %v1572_v31 }
 0x25a   :  { %1285 = vpow2.f32 %v650_v33  ;;  %v648_v36 = vsub.f32 0.0, %v1574_v34 }
 0x25b   :  { %v656_v39 = vmul.f32 1.442695, %v649_v35 }
 0x25c   :  { %v654_v42 = vmul.f32 1.442695, %v648_v36 }
 0x25d   :  { %1287 = vpow2.f32 %v656_v39 }
 0x25e   :  { %1289 = vpow2.f32 %v654_v42 }
 0x263   :  { %v1284_v43 = vpop.eup %1283 }
 0x264   :  { %v1286_v44 = vpop.eup %1285  ;;  %v659_v45 = vadd.f32 1.0, %v1284_v43 }
 0x265   :  { %v658_v46 = vadd.f32 1.0, %v1286_v44 }
 0x266   :  { %1291 = vrcp.f32 %v659_v45 }
 0x267   :  { %v1288_v47 = vpop.eup %1287  ;;  %1293 = vrcp.f32 %v658_v46 }
 0x268   :  { %v1290_v48 = vpop.eup %1289  ;;  %v661_v49 = vadd.f32 1.0, %v1288_v47 }
 0x269   :  { %v660_v50 = vadd.f32 1.0, %v1290_v48 }
 0x26a   :  { %1295 = vrcp.f32 %v661_v49 }
 0x26b   :  { %1297 = vrcp.f32 %v660_v50 }
 0x270   :  { %v1292_v51 = vpop.eup %1291 }
 0x271   :  { %v1294_v52 = vpop.eup %1293  ;;  %v671_v53 = vmul.f32 %v1292_v51, %v1180_v12 }
 0x272   :  { %v1273_v54 = vpack.i.bf16 %v1292_v51, %v1294_v52  ;;  %v670_v55 = vmul.f32 %v1294_v52, %v354_v13  ;;  %v695_v13 = vld [vmem:[#allocation3 + $0x8] sm:$0xff] }
 0x274   :  { %v1296_v56 = vpop.eup %1295  ;;  %1274 = vrot.lane.b32.xlu1 %v1273_v54, %s1349_s17 }
 0x275   :  { %v1298_v57 = vpop.eup %1297  ;;  %v673_v59 = vmul.f32 %v1296_v56, %v1183_v14  ;;  %v694_v14 = vld [vmem:[#allocation3] sm:$0xff] }
 0x276   :  { %v1278_v60 = vpack.i.bf16 %v1296_v56, %v1298_v57  ;;  %v672_v61 = vmul.f32 %v1298_v57, %v364_v15 }
 0x278   :  { %1279 = vrot.lane.b32.xlu0 %v1278_v60, %s1349_s17 }
 0x29d   :  { %696 = vxpose.xlu1.b32.start [1/4] (short) (narrow) %v1540_v58, 16 }
 0x2a1   :  { %697 = vxpose.xlu1.b32.cont [2/4] (short) (narrow) %v1548_v2, 16 }
 0x2a5   :  { %698 = vxpose.xlu1.b32.cont [3/4] (short) (narrow) %v1551_v4, 16 }
 0x2a9   :  { %699 = vxpose.xlu1.b32.end [4/4] (short) (narrow) %v1559_v5, 16 }
 0x2e6   :  { %v1275_v62 = vpop.permute.xlu1 %1274 }
 0x2e7   :  { %v1277_v63 = vunpack.i.h.bf16 %v1275_v62  ;;  %v1276_v0 = vunpack.i.l.bf16 %v1275_v62 }
 0x2e9   :  { %v690_v1 = vsel %vm157_vm1, %v670_v55, %v1276_v0  ;;  %v691_v58 = vsel %vm157_vm1, %v671_v53, %v1277_v63 }
 0x2ea   :  { %v1280_v6 = vpop.permute.xlu0 %1279  ;;  %v1235_v2 = vpack.c.bf16 %v691_v58, %v690_v1 }
 0x2eb   :  { %v1282_v7 = vunpack.i.h.bf16 %v1280_v6  ;;  %v1281_v10 = vunpack.i.l.bf16 %v1280_v6 }
 0x2ec   :  { %1236 = vmatprep.subr.bf16.mxu0 %v1235_v2 }
 0x2ed   :  { %1238 = vmatpush3.bf16.msra.mxu0 %v1235_v2  ;;  %v692_v11 = vsel %vm157_vm1, %v672_v61, %v1281_v10  ;;  %v693_v3 = vsel %vm157_vm1, %v673_v59, %v1282_v7  ;;  %v1128_v59 = vld [vmem:[%s1703_s11] ss:$0 sm:$0xff] }
 0x2ee   :  { %v1239_v4 = vpack.c.bf16 %v693_v3, %v692_v11  ;;  %v1129_v61 = vld [vmem:[%s1704_s12] ss:$0 sm:$0xff] }
 0x2f0   :  { %1240 = vmatprep.subr.bf16.mxu0 %v1239_v4 }
 0x2f1   :  { %1242 = vmatpush3.bf16.msra.mxu0 %v1239_v4 }
 0x31d   :  { %v712_v5 = vpop.trf.xlu1 }
 0x31e   :  { %1220 = vmatprep.mubr.msk.f32.mxu0 %vm157_vm1, %v712_v5  ;;  %v820_v5 = vsel %vm157_vm1, %v1568_v22, 0.0 }
 0x321   :  { %v713_v12 = vpop.trf.xlu1 }
 0x322   :  { %1221 = vmatmul.mubr.msk.f32.vlgmr.msra.gmra.mrb[8].mxu0 %vm157_vm1, %v713_v12  ;;  %v823_v12 = vsel %vm157_vm1, %v1566_v20, 0.0 }
 0x3f5   :  { %v1222_v15 = vpop.f32.mrb[8].mxu0 }
 0x3f6   :  { %v810_v16 = vadd.f32 %v1222_v15, %v695_v13  ;;  %v800_v17 = vpop.f32.mrb[9].mxu0  ;;  %v829_v13 = vsel %vm157_vm1, %v1572_v31, 0.0 }
 0x3f7   :  { %v809_v18 = vadd.f32 %v800_v17, %v694_v14 }
 0x3f8   :  { %813 = vst.msk [vmem:[#allocation3 + $0x8] sm:$0xff] %vm204_vm11, %v810_v16 }
 0x3f9   :  { %812 = vst.msk [vmem:[#allocation3] sm:$0xff] %vm204_vm11, %v809_v18 }
 0x3ff   :  { %v909_v23 = vld [vmem:[#allocation3 + $0x8] sm:$0xff] }
 0x400   :  { %v908_v19 = vld [vmem:[#allocation3] sm:$0xff]  ;;  %v913_v24 = vadd.f32 1e-06, %v909_v23 }
 0x401   :  { %v912_v21 = vadd.f32 1e-06, %v908_v19 }
 0x403   :  { %916 = vrot.lane.b32.xlu0 %v912_v21, %s1348_s4 }
 0x407   :  { %918 = vrot.lane.b32.xlu0 %v913_v24, %s1348_s4 }
 0x475   :  { %v917_v25 = vpop.permute.xlu0 %916 }
 0x476   :  { %1299 = vrcp.f32 %v917_v25 }
 0x479   :  { %v919_v28 = vpop.permute.xlu0 %918 }
 0x47a   :  { %1301 = vrcp.f32 %v919_v28 }
 0x480   :  { %v1300_v29 = vpop.eup %1299 }
 0x481   :  { %v923_v30 = vmul.f32 %v1300_v29, %v908_v19 }
 0x483   :  { %v926_v32 = vadd.f32 %v923_v30, %v1488_v26 }
 0x484   :  { %v1302_v33 = vpop.eup %1301 }
 0x485   :  { %v932_v35 = vsel %vm157_vm1, %v926_v32, 0.0  ;;  %v925_v36 = vmul.f32 %v1302_v33, %v909_v23 }
 0x486   :  { %933 = vadd.xlane.f32.xlu0 %v932_v35 }
 0x487   :  { %v927_v39 = vadd.f32 %v925_v36, %v1490_v27 }
 0x489   :  { %v935_v42 = vsel %vm157_vm1, %v927_v39, 0.0 }
 0x48a   :  { %936 = vadd.xlane.f32.xlu0 %v935_v42 }
 0x513   :  { %v934_v43 = vpop.xlane.xlu0 %933 }
 0x514   :  { %v938_v44 = vmul.f32 0.03125, %v934_v43 }
 0x516   :  { %v940_v45 = vsub.f32 %v926_v32, %v938_v44 }
 0x517   :  { %v937_v46 = vpop.xlane.xlu0 %936 }
 0x518   :  { %v939_v47 = vmul.f32 0.03125, %v937_v46  ;;  %v942_v48 = vmul.f32 %v940_v45, %v940_v45 }
 0x51a   :  { %v941_v49 = vsub.f32 %v927_v39, %v939_v47  ;;  %v944_v50 = vsel %vm157_vm1, %v942_v48, 0.0 }
 0x51b   :  { %945 = vadd.xlane.f32.xlu0 %v944_v50 }
 0x51c   :  { %v943_v26 = vmul.f32 %v941_v49, %v941_v49 }
 0x51e   :  { %v947_v51 = vsel %vm157_vm1, %v943_v26, 0.0 }
 0x51f   :  { %948 = vadd.xlane.f32.xlu0 %v947_v51 }
 0x5a8   :  { %v946_v52 = vpop.xlane.xlu0 %945 }
 0x5a9   :  { %v950_v53 = vmul.f32 0.03125, %v946_v52 }
 0x5ab   :  { %v952_v27 = vadd.f32 1e-05, %v950_v53 }
 0x5ac   :  { %v949_v54 = vpop.xlane.xlu0 %948 }
 0x5ad   :  { %1303 = vrsqrt.f32 %v952_v27  ;;  %v951_v55 = vmul.f32 0.03125, %v949_v54 }
 0x5af   :  { %v953_v56 = vadd.f32 1e-05, %v951_v55 }
 0x5b1   :  { %1305 = vrsqrt.f32 %v953_v56 }
 0x5b7   :  { %v1304_v57 = vpop.eup %1303 }
 0x5b8   :  { %v956_v60 = vmul.f32 %v1304_v57, %v940_v45 }
 0x5ba   :  { %v964_v62 = vmul.f32 %v1128_v59, %v956_v60 }
 0x5bb   :  { %v1306_v63 = vpop.eup %1305 }
 0x5bc   :  { %v972_v0 = vadd.f32 %v1129_v61, %v964_v62  ;;  %v957_v1 = vmul.f32 %v1306_v63, %v941_v49 }
 0x5be   :  { %v974_v58 = vmax.f32 %v972_v0, 0.0  ;;  %v965_v6 = vmul.f32 %v1128_v59, %v957_v1 }
 0x5c0   :  { %v976_v2 = vadd.f32 %v974_v58, %v1459_v8  ;;  %v973_v7 = vadd.f32 %v1129_v61, %v965_v6  ;;  %v826_v8 = vsel %vm157_vm1, %v1574_v34, 0.0 }
 0x5c2   :  { %v980_v10 = vsel %vm157_vm1, %v976_v2, 0.0  ;;  %v975_v11 = vmax.f32 %v973_v7, 0.0 }
 0x5c3   :  { %981 = vadd.xlane.f32.xlu1 %v980_v10 }
 0x5c4   :  { %v977_v3 = vadd.f32 %v975_v11, %v1464_v9 }
 0x5c6   :  { %v983_v4 = vsel %vm157_vm1, %v977_v3, 0.0 }
 0x5c7   :  { %984 = vadd.xlane.f32.xlu0 %v983_v4 }
 0x5cb   :  { %821 = vadd.xlane.f32.xlu0 %v820_v5 }
 0x5cf   :  { %824 = vadd.xlane.f32.xlu0 %v823_v12 }
 0x5d3   :  { %827 = vadd.xlane.f32.xlu0 %v826_v8 }
 0x5d7   :  { %830 = vadd.xlane.f32.xlu0 %v829_v13 }
 0x650   :  { %v982_v9 = vpop.xlane.xlu1 %981 }
 0x651   :  { %v986_v14 = vrot.slane %v982_v9, 4 }
 0x653   :  { %v987_v15 = vadd.f32 %v986_v14, %v982_v9  ;;  %v1127_v9 = vld [vmem:[%s1702_s10] ss:$0 sm:$0xff] }
 0x654   :  { %v985_v16 = vpop.xlane.xlu0 %984 }
 0x655   :  { %v988_v17 = vrot.slane %v987_v15, 2  ;;  %v992_v18 = vrot.slane %v985_v16, 4 }
 0x657   :  { %v989_v19 = vadd.f32 %v988_v17, %v987_v15  ;;  %v993_v21 = vadd.f32 %v992_v18, %v985_v16 }
 0x658   :  { %v822_v23 = vpop.xlane.xlu0 %821 }
 0x659   :  { %v990_v24 = vrot.slane %v989_v19, 1  ;;  %v994_v25 = vrot.slane %v993_v21, 2  ;;  %v833_v28 = vmul.f32 0.03125, %v822_v23 }
 0x65b   :  { %v991_v29 = vadd.f32 %v990_v24, %v989_v19  ;;  %v995_v30 = vadd.f32 %v994_v25, %v993_v21  ;;  %v837_v32 = vsub.f32 %v1568_v22, %v833_v28 }
 0x65c   :  { %v825_v33 = vpop.xlane.xlu0 %824 }
 0x65d   :  { %v996_v35 = vrot.slane %v995_v30, 1  ;;  %v841_v36 = vmul.f32 %v837_v32, %v837_v32  ;;  %v998_v39 = vmul.f32 0.00390625, %v991_v29  ;;  %v834_v46 = vmul.f32 0.03125, %v825_v33 }
 0x65f   :  { %v997_v42 = vadd.f32 %v996_v35, %v995_v30  ;;  %v845_v43 = vsel %vm157_vm1, %v841_v36, 0.0  ;;  %v1626_v48 = vsub.f32 %v976_v2, %v998_v39  ;;  %v1631_v26 = vsub.f32 %v1566_v20, %v834_v46 }
 0x660   :  { %846 = vadd.xlane.f32.xlu0 %v845_v43  ;;  %v828_v44 = vpop.xlane.xlu0 %827 }
 0x661   :  { %v999_v45 = vmul.f32 0.00390625, %v997_v42  ;;  %v835_v51 = vmul.f32 0.03125, %v828_v44  ;;  %v1002_v27 = vmul.f32 %v1626_v48, %v1626_v48  ;;  %v842_v20 = vmul.f32 %v1631_v26, %v1631_v26 }
 0x663   :  { %v1624_v47 = vsub.f32 %v977_v3, %v999_v45  ;;  %v1638_v55 = vsub.f32 %v1574_v34, %v835_v51  ;;  %v1004_v56 = vsel %vm157_vm1, %v1002_v27, 0.0  ;;  %v1126_v3 = vld [vmem:[%s1701_s9] ss:$0 sm:$0xff] }
 0x664   :  { %v831_v49 = vpop.xlane.xlu0 %830 }
 0x665   :  { %v836_v50 = vmul.f32 0.03125, %v831_v49  ;;  %v1003_v22 = vmul.f32 %v1624_v47, %v1624_v47  ;;  %v843_v59 = vmul.f32 %v1638_v55, %v1638_v55 }
 0x667   :  { %v840_v52 = vsub.f32 %v1572_v31, %v836_v50  ;;  %v1007_v53 = vsel %vm157_vm1, %v1003_v22, 0.0  ;;  %v848_v31 = vsel %vm157_vm1, %v842_v20, 0.0  ;;  %v851_v60 = vsel %vm157_vm1, %v843_v59, 0.0 }
 0x668   :  { %1008 = vadd.xlane.f32.xlu0 %v1007_v53 }
 0x669   :  { %v844_v54 = vmul.f32 %v840_v52, %v840_v52 }
 0x66b   :  { %v854_v57 = vsel %vm157_vm1, %v844_v54, 0.0 }
 0x66c   :  { %1005 = vadd.xlane.f32.xlu0 %v1004_v56  ;;  %855 = vadd.xlane.f32.xlu1 %v854_v57 }
 0x670   :  { %849 = vadd.xlane.f32.xlu0 %v848_v31 }
 0x674   :  { %852 = vadd.xlane.f32.xlu0 %v851_v60 }
 0x6ed   :  { %v847_v34 = vpop.xlane.xlu0 %846 }
 0x6ee   :  { %v857_v61 = vmul.f32 0.03125, %v847_v34 }
 0x6f0   :  { %v861_v62 = vadd.f32 1e-05, %v857_v61 }
 0x6f2   :  { %1307 = vrsqrt.f32 %v861_v62 }
 0x6f5   :  { %v1009_v63 = vpop.xlane.xlu0 %1008 }
 0x6f6   :  { %v1016_v0 = vrot.slane %v1009_v63, 4 }
 0x6f8   :  { %v1017_v1 = vadd.f32 %v1016_v0, %v1009_v63 }
 0x6f9   :  { %v856_v58 = vpop.xlane.xlu1 %855  ;;  %v1006_v6 = vpop.xlane.xlu0 %1005 }
 0x6fa   :  { %v1018_v2 = vrot.slane %v1017_v1, 2  ;;  %v860_v7 = vmul.f32 0.03125, %v856_v58  ;;  %v1010_v10 = vrot.slane %v1006_v6, 4 }
 0x6fc   :  { %v1308_v11 = vpop.eup %1307  ;;  %v1019_v4 = vadd.f32 %v1018_v2, %v1017_v1  ;;  %v864_v5 = vadd.f32 1e-05, %v860_v7  ;;  %v1011_v12 = vadd.f32 %v1010_v10, %v1006_v6 }
 0x6fd   :  { %v869_v8 = vmul.f32 %v1308_v11, %v837_v32  ;;  %v850_v13 = vpop.xlane.xlu0 %849 }
 0x6fe   :  { %v1020_v14 = vrot.slane %v1019_v4, 1  ;;  %1309 = vrsqrt.f32 %v864_v5  ;;  %v1012_v15 = vrot.slane %v1011_v12, 2  ;;  %v858_v16 = vmul.f32 0.03125, %v850_v13 }
 0x6ff   :  { %v879_v17 = vmul.f32 %v1126_v3, %v869_v8 }
 0x700   :  { %v1021_v18 = vadd.f32 %v1020_v14, %v1019_v4  ;;  %v1013_v19 = vadd.f32 %v1012_v15, %v1011_v12  ;;  %v862_v21 = vadd.f32 1e-05, %v858_v16 }
 0x701   :  { %v889_v23 = vadd.f32 %v1127_v9, %v879_v17  ;;  %v853_v24 = vpop.xlane.xlu0 %852 }
 0x702   :  { %v1023_v25 = vmul.f32 0.00390625, %v1021_v18  ;;  %v1014_v28 = vrot.slane %v1013_v19, 1  ;;  %1311 = vrsqrt.f32 %v862_v21  ;;  %v859_v29 = vmul.f32 0.03125, %v853_v24 }
 0x703   :  { %v893_v30 = vmax.f32 %v889_v23, 0.0 }
 0x704   :  { %v1025_v32 = vadd.f32 1e-05, %v1023_v25  ;;  %v1015_v33 = vadd.f32 %v1014_v28, %v1013_v19  ;;  %v863_v35 = vadd.f32 1e-05, %v859_v29 }
 0x705   :  { %v897_v36 = vadd.f32 %v893_v30, %v1512_v37  ;;  %v1130_v37 = vld [vmem:[%s1705_s13] ss:$0 sm:$0xff] }
 0x706   :  { %1313 = vrsqrt.f32 %v1025_v32  ;;  %v1022_v39 = vmul.f32 0.00390625, %v1015_v33 }
 0x707   :  { %901 = vst.msk [vmem:[#allocation6] sm:$0xff] %vm157_vm1, %v897_v36  ;;  %1315 = vrsqrt.f32 %v863_v35 }
 0x708   :  { %v1310_v42 = vpop.eup %1309  ;;  %v1024_v43 = vadd.f32 1e-05, %v1022_v39 }
 0x709   :  { %v872_v44 = vmul.f32 %v1310_v42, %v840_v52  ;;  %v1131_v52 = vld [vmem:[%s1706_s14] ss:$0 sm:$0xff]  ;;  %s1058_s14 = sshll.u32 %s1351_s30, 4  ;;  %s1059_s14 = int_to_ptr.vmem [resolvable:$true] %s1058_s14 }
 0x70a   :  { %1317 = vrsqrt.f32 %v1024_v43  ;;  %s1319_s23 = scalar_lea.vmem %s1059_s14, 512  ;;  %p1324_p2 = scmp.lt.s32.totalorder %s1059_s14, %s1059_s14 }
 0x70b   :  { %v882_v45 = vmul.f32 %v1126_v3, %v872_v44  ;;  %p1320_p1 = scmp.ne.s32.totalorder %s1059_s14, %s1319_s23  ;;  %p1325_p3 = scmp.lt.s32.totalorder %s1319_s23, %s1319_s23 }
 0x70c   :  { %v1312_v46 = vpop.eup %1311 }
 0x70d   :  { %v892_v49 = vadd.f32 %v1127_v9, %v882_v45  ;;  %v870_v50 = vmul.f32 %v1312_v46, %v1631_v26  ;;  %p1326_p4 = por %p1325_p3, %p1324_p2 }
 0x70f   :  { %v896_v22 = vmax.f32 %v892_v49, 0.0  ;;  %v880_v51 = vmul.f32 %v1126_v3, %v870_v50  ;;  %p1327_p5 = pnand %p1326_p4, %p1320_p1 }
 0x710   :  { %v1314_v53 = vpop.eup %1313 }
 0x711   :  { %v1316_v27 = vpop.eup %1315  ;;  %v1029_v54 = vmul.f32 %v1314_v53, %v1624_v47  ;;  %v900_v56 = vadd.f32 %v896_v22, %v1520_v41  ;;  %v890_v57 = vadd.f32 %v1127_v9, %v880_v51 }
 0x712   :  { %v871_v20 = vmul.f32 %v1316_v27, %v1638_v55 }
 0x713   :  { %v1037_v26 = vmul.f32 %v1130_v37, %v1029_v54  ;;  %904 = vst.msk [vmem:[#allocation6 + $0x18] sm:$0xff] %vm157_vm1, %v900_v56  ;;  %v894_v31 = vmax.f32 %v890_v57, 0.0 }
 0x714   :  { %v1318_v59 = vpop.eup %1317  ;;  %v881_v60 = vmul.f32 %v1126_v3, %v871_v20 }
 0x715   :  { %v1045_v34 = vadd.f32 %v1131_v52, %v1037_v26  ;;  %v1028_v61 = vmul.f32 %v1318_v59, %v1626_v48  ;;  %v898_v47 = vadd.f32 %v894_v31, %v1514_v38 }
 0x716   :  { %v891_v62 = vadd.f32 %v1127_v9, %v881_v60 }
 0x717   :  { %1047 = vst.msk [vmem:[%s1708_s16 + $0x8] sm:$0xff] %vm157_vm1, %v1045_v34  ;;  %v1036_v41 = vmul.f32 %v1130_v37, %v1028_v61  ;;  %902 = vst.msk [vmem:[#allocation6 + $0x8] sm:$0xff] %vm157_vm1, %v898_v47 }
 0x718   :  { %v895_v55 = vmax.f32 %v891_v62, 0.0 }
 0x719   :  { %v1044_v63 = vadd.f32 %v1131_v52, %v1036_v41 }
 0x71a   :  { %v899_v38 = vadd.f32 %v895_v55, %v1518_v40 }
 0x71b   :  { %1046 = vst.msk [vmem:[%s1708_s16] sm:$0xff] %vm157_vm1, %v1044_v63 }
 0x71c   :  { %903 = vst.msk [vmem:[#allocation6 + $0x10] sm:$0xff] %vm157_vm1, %v899_v38 }
 0x71d   :  { %1330 = shalt.err (!%p1327_p5)
}
 0x71e   :  { %s1331_s24 = scalar_lea.hbm %s1057_s20, 512  ;;  %s1333_s21 = scalar_lea.hbm %s1707_s15, 512 }
 0x71f   :  { %p1332_p6 = scmp.ne.s32.totalorder %s1057_s20, %s1331_s24  ;;  %p1334_p7 = scmp.lt.u32.totalorder %s1057_s20, %s1707_s15 }
 0x720   :  { %p1335_p8 = scmp.lt.u32.totalorder %s1333_s21, %s1331_s24  ;;  %p1337_p10 = scmp.lt.u32.totalorder %s1331_s24, %s1057_s20 }
 0x722   :  { %p1336_p9 = por %p1335_p8, %p1334_p7 }
 0x724   :  { %p1338_p11 = por %p1337_p10, %p1336_p9 }
 0x726   :  { %p1339_p12 = pnand %p1338_p11, %p1332_p6 }
 0x728   :  { %1342 = shalt.err (!%p1339_p12)
}
 0x729   :  { %s1352_s16 = smov 128   ;;  %s1353_s25 = smov 8  }
 0x72a   :  { %1064 = dma.vmem_to_hbm [thread:$0]  %s1059_s14, 512, %s1057_s20, [#allocation7], %s1352_s16, %s1352_s16, %s1353_s25  }
 0x72b   :  { %1343 = dma.done.wait [#allocation7], 512  }
 0x72c   :  { %1344 = vsyncadd [#allocation7], 4294966784 }
 0x72d   :  { %1072 = vsyncpa [#allocation7], 1 }

// kernel: gps_layer_forward.4
= control target key start
LH: loop header
LB: loop body
LE: loop exit
PB: predicated region body
PF: predicated region fallthrough
CT: control target
= control target key end

     0   :  { %v2711_v0 = vmov 0.0   ;;  %vm2712_vm0 = vmmov 0   ;;  %vm55_vm1 = vcmask 261120   ;;  %vm210_vm2 = vcmask 64512   ;;  %s3203_s1 = inlined_call_operand.vmem [shape: f32[4,32,8], index: 1, kind: input, shape index: {}]   ;;  %s3204_s2 = inlined_call_operand.vmem [shape: f32[4,32,8], index: 2, kind: input, shape index: {}]   ;;  %s3205_s0 = inlined_call_operand.vmem [shape: f32[2,8,32], index: 0, kind: input, shape index: {}]   ;;  %s3206_s4 = inlined_call_operand.vmem [shape: f32[4,1,8], index: 4, kind: input, shape index: {}]   ;;  %s3207_s5 = inlined_call_operand.vmem [shape: f32[4,1,8], index: 5, kind: input, shape index: {}]   ;;  %s3208_s3 = inlined_call_operand.vmem [shape: f32[4,32,8], index: 3, kind: input, shape index: {}]   ;;  %s3209_s6 = inlined_call_operand.vmem [shape: f32[4,1,8], index: 6, kind: input, shape index: {}]   ;;  %s3210_s7 = inlined_call_operand.vmem [shape: f32[4,8,32], index: 7, kind: input, shape index: {}]   ;;  %s3211_s8 = inlined_call_operand.vmem [shape: f32[1,32], index: 8, kind: input, shape index: {}]   ;;  %s3212_s9 = inlined_call_operand.vmem [shape: f32[1,32], index: 9, kind: input, shape index: {}]   ;;  %s3213_s10 = inlined_call_operand.vmem [shape: f32[1,32], index: 10, kind: input, shape index: {}]   ;;  %s3214_s11 = inlined_call_operand.vmem [shape: f32[2,8,32], index: 11, kind: output, shape index: {}]  }
   0x1   :  { %2473 = vmatprep.subr.bf16.mxu0 %v2711_v0  ;;  %2481 = vmatprep.subr.bf16.mxu1 %v2711_v0  ;;  %v42_v1 = vld [vmem:[%s3203_s1] sm:$0xff]  ;;  %v43_v2 = vld [vmem:[%s3203_s1 + $0x8] sm:$0xff]  ;;  %v44_v6 = vld [vmem:[%s3203_s1 + $0x10] sm:$0xff]  ;;  %vm1031_vm3 = vcmask 1043456  }
   0x2   :  { %v102_v3 = vld [vmem:[%s3204_s2] sm:$0xff]  ;;  %v46_v4 = vpack.c.bf16 %v43_v2, %v42_v1  ;;  %v103_v5 = vld [vmem:[%s3204_s2 + $0x8] sm:$0xff]  ;;  %v45_v7 = vld [vmem:[%s3203_s1 + $0x18] sm:$0xff]  ;;  %2477 = vmatprep.mubr.msk.bf16.mxu0 %vm2712_vm0, %v2711_v0  ;;  %2485 = vmatprep.mubr.msk.bf16.mxu1 %vm2712_vm0, %v2711_v0 }
   0x3   :  { %v106_v8 = vpack.c.bf16 %v103_v5, %v102_v3  ;;  %v104_v9 = vld [vmem:[%s3204_s2 + $0x10] sm:$0xff]  ;;  %v105_v10 = vld [vmem:[%s3204_s2 + $0x18] sm:$0xff]  ;;  %v47_v11 = vpack.c.bf16 %v45_v7, %v44_v6  ;;  %v2806_v12 = vld [vmem:[%s3205_s0] sm:$0xff] }
   0x4   :  { %2474 = vmatpush3.bf16.msra.mxu0 %v46_v4  ;;  %v2811_v13 = vld [vmem:[%s3205_s0 + $0x8] sm:$0xff]  ;;  %v107_v14 = vpack.c.bf16 %v105_v10, %v104_v9  ;;  %v2294_v16 = vld [vmem:[%s3206_s4] ss:$0 sm:$0xff]  ;;  %v158_v34 = vld [vmem:[%s3208_s3 + $0x10] sm:$0xff] }
   0x5   :  { %2482 = vmatpush3.bf16.msra.mxu1 %v106_v8  ;;  %2475 = vmatprep.subr.bf16.mxu0 %v2711_v0  ;;  %v2817_v15 = vpack.c.bf16 %v2811_v13, %v2806_v12  ;;  %v2296_v17 = vld [vmem:[%s3207_s5] ss:$0 sm:$0xff]  ;;  %v157_v33 = vld [vmem:[%s3208_s3 + $0x8] sm:$0xff]  ;;  %v159_v36 = vld [vmem:[%s3208_s3 + $0x18] sm:$0xff] }
   0x6   :  { %2483 = vmatprep.subr.bf16.mxu1 %v2711_v0  ;;  %v156_v32 = vld [vmem:[%s3208_s3] sm:$0xff]  ;;  %v161_v37 = vpack.c.bf16 %v159_v36, %v158_v34  ;;  %v2314_v1 = vld [vmem:[%s3204_s2 + $0x28] sm:$0xff]  ;;  %v2315_v7 = vld [vmem:[%s3204_s2 + $0x30] sm:$0xff] }
   0x7   :  { %v160_v35 = vpack.c.bf16 %v157_v33, %v156_v32  ;;  %v2298_v56 = vld [vmem:[%s3209_s6] ss:$0 sm:$0xff]  ;;  %v2307_v6 = vld [vmem:[%s3203_s1 + $0x28] sm:$0xff]  ;;  %v2316_v8 = vld [vmem:[%s3204_s2 + $0x38] sm:$0xff] }
   0x8   :  { %2476 = vmatpush3.bf16.msra.mxu0 %v47_v11  ;;  %v2313_v63 = vld [vmem:[%s3204_s2 + $0x20] sm:$0xff]  ;;  %v598_v11 = vpack.c.bf16 %v2316_v8, %v2315_v7 }
   0x9   :  { %2484 = vmatpush3.bf16.msra.mxu1 %v107_v14  ;;  %2489 = vmatprep.subr.bf16.mxu0 %v2711_v0  ;;  %v597_v3 = vpack.c.bf16 %v2314_v1, %v2313_v63  ;;  %v2306_v4 = vld [vmem:[%s3203_s1 + $0x20] sm:$0xff] }
   0xa   :  { %2497 = vmatprep.subr.mxu1 %v2711_v0  ;;  %v539_v10 = vpack.c.bf16 %v2307_v6, %v2306_v4  ;;  %v2325_v63 = vld [vmem:[%s3209_s6 + $0x1] ss:$0 sm:$0xff] }
   0xb   :  { %2478 = vmatmul.mubr.msk.bf16.vlgmr.msra.gmra.mrb[0].mxu0 %vm55_vm1, %v2817_v15  ;;  %v532_v8 = vld [vmem:[%s3210_s7] sm:$0xff] }
   0xc   :  { %2486 = vmatmul.mubr.msk.bf16.vlgmr.msra.gmra.mrb[0].mxu1 %vm55_vm1, %v2817_v15  ;;  %2493 = vmatprep.mubr.msk.bf16.mxu0 %vm2712_vm0, %v2711_v0 }
   0xd   :  { %2499 = vmatprep.mubr.msk.f32.mxu1 %vm2712_vm0, %v2711_v0  ;;  %2490 = vmatpush3.bf16.msra.mxu0 %v160_v35 }
   0xe   :  { %2491 = vmatprep.subr.bf16.mxu0 %v2711_v0 }
  0x11   :  { %2492 = vmatpush3.bf16.msra.mxu0 %v161_v37 }
  0x12   :  { %2507 = vmatprep.subr.mxu0 %v2711_v0 }
  0x14   :  { %2494 = vmatmul.mubr.msk.bf16.vlgmr.msra.gmra.mrb[4].mxu0 %vm55_vm1, %v2817_v15 }
  0x15   :  { %2509 = vmatprep.mubr.msk.f32.mxu0 %vm2712_vm0, %v2711_v0 }
  0xde   :  { %v93_v18 = vpop.f32.mrb[0].mxu0 }
  0xdf   :  { %v94_v19 = vadd.f32 %v2294_v16, %v93_v18  ;;  %v149_v20 = vpop.f32.mrb[0].mxu1  ;;  %v2479_v21 = vpop.f32.mrb[1].mxu0 }
  0xe0   :  { %v150_v22 = vadd.f32 %v2296_v17, %v149_v20  ;;  %v2487_v23 = vpop.f32.mrb[1].mxu1  ;;  %v96_v24 = vpop.f32.mrb[2].mxu0 }
  0xe1   :  { %v100_v25 = vmul.f32 0.35355338, %v94_v19  ;;  %v152_v26 = vpop.f32.mrb[2].mxu1  ;;  %v2480_v27 = vpop.f32.mrb[3].mxu0  ;;  %v97_v29 = vadd.f32 %v2294_v16, %v96_v24  ;;  %v2308_v16 = vld [vmem:[%s3203_s1 + $0x30] sm:$0xff] }
  0xe2   :  { %v2488_v28 = vpop.f32.mrb[3].mxu1  ;;  %2498 = vmatpush3.xpose.msk.msra.mxu1 %vm210_vm2, %v150_v22  ;;  %v153_v30 = vadd.f32 %v2296_v17, %v152_v26  ;;  %v2309_v17 = vld [vmem:[%s3203_s1 + $0x38] sm:$0xff]  ;;  %v2318_v24 = vld [vmem:[%s3207_s5 + $0x1] ss:$0 sm:$0xff] }
  0xe3   :  { %2502 = vmatprep.subr.mxu1 %v2711_v0  ;;  %v101_v31 = vmul.f32 0.35355338, %v97_v29  ;;  %v540_v18 = vpack.c.bf16 %v2309_v17, %v2308_v16  ;;  %v2311_v29 = vld [vmem:[%s3206_s4 + $0x1] ss:$0 sm:$0xff] }
  0xe5   :  { %2500 = vmatmul.mubr.msk.f32.vlgmr.msra.gmra.mrb[4].mxu1 %vm210_vm2, %v100_v25 }
  0xe6   :  { %2503 = vmatpush3.xpose.msk.msra.mxu1 %vm210_vm2, %v153_v30  ;;  %2504 = vmatprep.mubr.msk.f32.mxu1 %vm2712_vm0, %v2711_v0 }
  0xe7   :  { %2512 = vmatprep.subr.mxu1 %v2711_v0  ;;  %v203_v54 = vpop.f32.mrb[4].mxu0 }
  0xe8   :  { %v2495_v55 = vpop.f32.mrb[5].mxu0  ;;  %v204_v60 = vadd.f32 %v2298_v56, %v203_v54 }
  0xe9   :  { %2505 = vmatmul.mubr.msk.f32.vlgmr.msra.gmra.mrb[6].mxu1 %vm210_vm2, %v101_v31  ;;  %v206_v57 = vpop.f32.mrb[6].mxu0 }
  0xea   :  { %2514 = vmatprep.mubr.msk.f32.mxu1 %vm2712_vm0, %v2711_v0  ;;  %v207_v58 = vadd.f32 %v2298_v56, %v206_v57  ;;  %v2496_v59 = vpop.f32.mrb[7].mxu0  ;;  %2508 = vmatpush3.msra.mxu0 %v204_v60 }
  0xeb   :  { %2517 = vmatprep.subr.bf16.mxu0 %v2711_v0 }
  0xec   :  { %2513 = vmatpush3.msra.mxu1 %v207_v58 }
  0xed   :  { %2525 = vmatprep.subr.bf16.mxu1 %v2711_v0 }
 0x1b8   :  { %v283_v38 = vpop.f32.mrb[4].mxu1 }
 0x1b9   :  { %v2501_v39 = vpop.f32.mrb[5].mxu1  ;;  %v363_v43 = vsel %vm210_vm2, %v283_v38, -inf }
 0x1bc   :  { %v359_v40 = vpop.f32.mrb[6].mxu1 }
 0x1bd   :  { %v2506_v41 = vpop.f32.mrb[7].mxu1  ;;  %v366_v42 = vsel %vm210_vm2, %v359_v40, -inf }
 0x1be   :  { %367 = vmax.xlane.f32.xlu0 %v366_v42  ;;  %v2321_v41 = vld [vmem:[%s3208_s3 + $0x28] sm:$0xff]  ;;  %v2322_v42 = vld [vmem:[%s3208_s3 + $0x30] sm:$0xff] }
 0x1c2   :  { %364 = vmax.xlane.f32.xlu0 %v363_v43 }
 0x24b   :  { %v368_v44 = vpop.xlane.xlu0 %367 }
 0x24c   :  { %v370_v45 = vsub.f32 %v359_v40, %v368_v44  ;;  %v2320_v40 = vld [vmem:[%s3208_s3 + $0x20] sm:$0xff]  ;;  %v2323_v44 = vld [vmem:[%s3208_s3 + $0x38] sm:$0xff] }
 0x24d   :  { %v653_v43 = vpack.c.bf16 %v2321_v41, %v2320_v40 }
 0x24e   :  { %v373_v46 = vmul.f32 1.442695, %v370_v45  ;;  %v654_v45 = vpack.c.bf16 %v2323_v44, %v2322_v42  ;;  %v2348_v42 = vld [vmem:[%s3207_s5 + $0x2] ss:$0 sm:$0xff] }
 0x24f   :  { %v365_v47 = vpop.xlane.xlu0 %364 }
 0x250   :  { %2675 = vpow2.f32 %v373_v46  ;;  %v369_v48 = vsub.f32 %v283_v38, %v365_v47 }
 0x252   :  { %v371_v49 = vmul.f32 1.442695, %v369_v48 }
 0x254   :  { %2677 = vpow2.f32 %v371_v49 }
 0x25a   :  { %v2676_v50 = vpop.eup %2675 }
 0x25b   :  { %v378_v51 = vsel %vm210_vm2, %v2676_v50, 0.0 }
 0x25c   :  { %379 = vadd.xlane.f32.xlu1 %v378_v51 }
 0x25e   :  { %v2678_v52 = vpop.eup %2677 }
 0x25f   :  { %v375_v53 = vsel %vm210_vm2, %v2678_v52, 0.0 }
 0x260   :  { %376 = vadd.xlane.f32.xlu1 %v375_v53 }
 0x2e9   :  { %v380_v61 = vpop.xlane.xlu1 %379 }
 0x2ea   :  { %2679 = vrcp.f32 %v380_v61 }
 0x2ed   :  { %v377_v62 = vpop.xlane.xlu1 %376 }
 0x2ee   :  { %2681 = vrcp.f32 %v377_v62 }
 0x2f4   :  { %v2680_v2 = vpop.eup %2679 }
 0x2f5   :  { %v384_v5 = vmul.f32 %v2680_v2, %v2676_v50 }
 0x2f7   :  { %2515 = vmatmul.mubr.msk.f32.vlgmr.msra.gmra.mrb[8].mxu1 %vm210_vm2, %v384_v5 }
 0x2f8   :  { %v2682_v9 = vpop.eup %2681  ;;  %2526 = vmatpush3.bf16.msra.mxu1 %v597_v3  ;;  %2529 = vmatprep.mubr.msk.bf16.mxu1 %vm2712_vm0, %v2711_v0 }
 0x2f9   :  { %v382_v14 = vmul.f32 %v2682_v9, %v2678_v52  ;;  %2527 = vmatprep.subr.bf16.mxu1 %v2711_v0 }
 0x2fb   :  { %2510 = vmatmul.mubr.msk.f32.vlgmr.msra.gmra.mrb[8].mxu0 %vm210_vm2, %v382_v14 }
 0x2fc   :  { %2518 = vmatpush3.bf16.msra.mxu0 %v539_v10  ;;  %2528 = vmatpush3.bf16.msra.mxu1 %v598_v11  ;;  %v533_v11 = vpack.c.bf16 %v532_v8, %v532_v8 }
 0x2fd   :  { %2519 = vmatprep.subr.bf16.mxu0 %v2711_v0  ;;  %2521 = vmatprep.mubr.msk.bf16.mxu0 %vm2712_vm0, %v2711_v0 }
 0x2fe   :  { %2541 = vmatprep.subr.mxu1 %v2711_v0  ;;  %v1080_v17 = vsel %vm1031_vm3, %v533_v11, 0 }
 0x2ff   :  { %2530 = vmatmul.mubr.msk.bf16.vlgmr.msra.gmra.mrb[12].mxu1 %vm55_vm1, %v2817_v15 }
 0x300   :  { %2520 = vmatpush3.bf16.msra.mxu0 %v540_v18  ;;  %2543 = vmatprep.mubr.msk.f32.mxu1 %vm2712_vm0, %v2711_v0  ;;  %v2333_v18 = vld [vmem:[%s3210_s7 + $0x8] sm:$0xff] }
 0x301   :  { %2533 = vmatprep.subr.bf16.mxu0 %v2711_v0 }
 0x303   :  { %2522 = vmatmul.mubr.msk.bf16.vlgmr.msra.gmra.mrb[12].mxu0 %vm55_vm1, %v2817_v15 }
 0x304   :  { %2537 = vmatprep.mubr.msk.bf16.mxu0 %vm2712_vm0, %v2711_v0  ;;  %2534 = vmatpush3.bf16.msra.mxu0 %v653_v43 }
 0x305   :  { %2535 = vmatprep.subr.bf16.mxu0 %v2711_v0 }
 0x308   :  { %2536 = vmatpush3.bf16.msra.mxu0 %v654_v45 }
 0x309   :  { %2551 = vmatprep.subr.mxu0 %v2711_v0 }
 0x30b   :  { %2538 = vmatmul.mubr.msk.bf16.vlgmr.msra.gmra.mrb[16].mxu0 %vm55_vm1, %v2817_v15 }
 0x30c   :  { %2553 = vmatprep.mubr.msk.f32.mxu0 %vm2712_vm0, %v2711_v0 }
 0x3ca   :  { %v2914_v19 = vpop.f32.mrb[8].mxu1 }
 0x3cb   :  { %v2516_v20 = vpop.f32.mrb[9].mxu1 }
 0x3cc   :  { %v1027_v20 = vpack.c.bf16 %v2333_v18, %v2333_v18 }
 0x3ce   :  { %v2916_v21 = vpop.f32.mrb[8].mxu0 }
 0x3cf   :  { %v531_v22 = vpack.c.bf16 %v2914_v19, %v2916_v21  ;;  %v2511_v23 = vpop.f32.mrb[9].mxu0  ;;  %v1033_v19 = vsel %vm1031_vm3, %v1027_v20, 0  ;;  %v2345_v21 = vld [vmem:[%s3204_s2 + $0x50] sm:$0xff] }
 0x3d0   :  { %v2343_v23 = vld [vmem:[%s3204_s2 + $0x40] sm:$0xff] }
 0x3d2   :  { %v641_v25 = vpop.f32.mrb[12].mxu1 }
 0x3d3   :  { %v642_v26 = vadd.f32 %v2318_v24, %v641_v25  ;;  %v2531_v27 = vpop.f32.mrb[13].mxu1 }
 0x3d4   :  { %v644_v28 = vpop.f32.mrb[14].mxu1 }
 0x3d5   :  { %v2532_v30 = vpop.f32.mrb[15].mxu1  ;;  %2542 = vmatpush3.xpose.msk.msra.mxu1 %vm210_vm2, %v642_v26  ;;  %v645_v38 = vadd.f32 %v2318_v24, %v644_v28  ;;  %v2344_v24 = vld [vmem:[%s3204_s2 + $0x48] sm:$0xff] }
 0x3d6   :  { %v583_v31 = vpop.f32.mrb[12].mxu0  ;;  %2546 = vmatprep.subr.mxu1 %v2711_v0  ;;  %v1186_v25 = vpack.c.bf16 %v2344_v24, %v2343_v23  ;;  %v2337_v30 = vld [vmem:[%s3203_s1 + $0x48] sm:$0xff] }
 0x3d7   :  { %v584_v32 = vadd.f32 %v2311_v29, %v583_v31  ;;  %v2523_v33 = vpop.f32.mrb[13].mxu0 }
 0x3d8   :  { %v586_v34 = vpop.f32.mrb[14].mxu0 }
 0x3d9   :  { %v590_v35 = vmul.f32 0.35355338, %v584_v32  ;;  %v587_v36 = vadd.f32 %v2311_v29, %v586_v34  ;;  %v2524_v37 = vpop.f32.mrb[15].mxu0  ;;  %v2336_v29 = vld [vmem:[%s3203_s1 + $0x40] sm:$0xff] }
 0x3da   :  { %v1128_v32 = vpack.c.bf16 %v2337_v30, %v2336_v29 }
 0x3db   :  { %2544 = vmatmul.mubr.msk.f32.vlgmr.msra.gmra.mrb[10].mxu1 %vm210_vm2, %v590_v35  ;;  %v591_v39 = vmul.f32 0.35355338, %v587_v36  ;;  %v2338_v35 = vld [vmem:[%s3203_s1 + $0x50] sm:$0xff]  ;;  %v2339_v36 = vld [vmem:[%s3203_s1 + $0x58] sm:$0xff] }
 0x3dc   :  { %2547 = vmatpush3.xpose.msk.msra.mxu1 %vm210_vm2, %v645_v38  ;;  %2548 = vmatprep.mubr.msk.f32.mxu1 %vm2712_vm0, %v2711_v0  ;;  %v1129_v38 = vpack.c.bf16 %v2339_v36, %v2338_v35 }
 0x3dd   :  { %2556 = vmatprep.subr.mxu1 %v2711_v0 }
 0x3de   :  { %v697_v62 = vpop.f32.mrb[16].mxu0 }
 0x3df   :  { %2549 = vmatmul.mubr.msk.f32.vlgmr.msra.gmra.mrb[16].mxu1 %vm210_vm2, %v591_v39  ;;  %v2539_v1 = vpop.f32.mrb[17].mxu0  ;;  %v698_v2 = vadd.f32 %v2325_v63, %v697_v62 }
 0x3e0   :  { %2558 = vmatprep.mubr.msk.f32.mxu1 %vm2712_vm0, %v2711_v0  ;;  %v700_v3 = vpop.f32.mrb[18].mxu0  ;;  %v2350_v1 = vld [vmem:[%s3208_s3 + $0x40] sm:$0xff] }
 0x3e1   :  { %v2540_v4 = vpop.f32.mrb[19].mxu0  ;;  %v701_v5 = vadd.f32 %v2325_v63, %v700_v3  ;;  %2552 = vmatpush3.msra.mxu0 %v698_v2  ;;  %v2351_v2 = vld [vmem:[%s3208_s3 + $0x48] sm:$0xff]  ;;  %v2352_v3 = vld [vmem:[%s3208_s3 + $0x50] sm:$0xff] }
 0x3e2   :  { %2561 = vmatprep.subr.bf16.mxu0 %v2711_v0  ;;  %v1242_v4 = vpack.c.bf16 %v2351_v2, %v2350_v1 }
 0x3e3   :  { %2557 = vmatpush3.msra.mxu1 %v701_v5  ;;  %v2353_v5 = vld [vmem:[%s3208_s3 + $0x58] sm:$0xff] }
 0x3e4   :  { %2567 = vmatprep.subr.bf16.mxu1 %v2711_v0 }
 0x4ae   :  { %v776_v46 = vpop.f32.mrb[10].mxu1 }
 0x4af   :  { %v2545_v47 = vpop.f32.mrb[11].mxu1  ;;  %v856_v48 = vsel %vm210_vm2, %v776_v46, -inf }
 0x4b0   :  { %857 = vmax.xlane.f32.xlu0 %v856_v48 }
 0x4b2   :  { %v852_v49 = vpop.f32.mrb[16].mxu1 }
 0x4b3   :  { %v2550_v50 = vpop.f32.mrb[17].mxu1  ;;  %v859_v51 = vsel %vm210_vm2, %v852_v49, -inf }
 0x4b4   :  { %860 = vmax.xlane.f32.xlu1 %v859_v51 }
 0x53d   :  { %v858_v52 = vpop.xlane.xlu0 %857 }
 0x53e   :  { %v862_v53 = vsub.f32 %v776_v46, %v858_v52 }
 0x540   :  { %v864_v54 = vmul.f32 1.442695, %v862_v53 }
 0x541   :  { %v861_v55 = vpop.xlane.xlu1 %860 }
 0x542   :  { %2683 = vpow2.f32 %v864_v54  ;;  %v863_v56 = vsub.f32 %v852_v49, %v861_v55  ;;  %v2341_v55 = vld [vmem:[%s3206_s4 + $0x2] ss:$0 sm:$0xff] }
 0x544   :  { %v866_v57 = vmul.f32 1.442695, %v863_v56 }
 0x546   :  { %2685 = vpow2.f32 %v866_v57 }
 0x54c   :  { %v2684_v58 = vpop.eup %2683 }
 0x54d   :  { %v868_v59 = vsel %vm210_vm2, %v2684_v58, 0.0 }
 0x54e   :  { %869 = vadd.xlane.f32.xlu0 %v868_v59 }
 0x550   :  { %v2686_v60 = vpop.eup %2685 }
 0x551   :  { %v871_v61 = vsel %vm210_vm2, %v2686_v60, 0.0 }
 0x552   :  { %872 = vadd.xlane.f32.xlu1 %v871_v61 }
 0x5db   :  { %v870_v6 = vpop.xlane.xlu0 %869 }
 0x5dc   :  { %2687 = vrcp.f32 %v870_v6  ;;  %v1243_v6 = vpack.c.bf16 %v2353_v5, %v2352_v3 }
 0x5df   :  { %v873_v7 = vpop.xlane.xlu1 %872 }
 0x5e0   :  { %2689 = vrcp.f32 %v873_v7 }
 0x5e6   :  { %v2688_v9 = vpop.eup %2687 }
 0x5e7   :  { %v875_v10 = vmul.f32 %v2688_v9, %v2684_v58 }
 0x5e9   :  { %2554 = vmatmul.mubr.msk.f32.vlgmr.msra.gmra.mrb[10].mxu0 %vm210_vm2, %v875_v10 }
 0x5ea   :  { %v2690_v14 = vpop.eup %2689  ;;  %2563 = vmatprep.mubr.msk.bf16.mxu0 %vm2712_vm0, %v2711_v0  ;;  %2562 = vmatpush3.bf16.msra.mxu0 %v1033_v19 }
 0x5eb   :  { %v877_v16 = vmul.f32 %v2690_v14, %v2686_v60  ;;  %2573 = vmatprep.subr.bf16.mxu0 %v2711_v0 }
 0x5ed   :  { %2559 = vmatmul.mubr.msk.f32.vlgmr.msra.gmra.mrb[18].mxu1 %vm210_vm2, %v877_v16 }
 0x5ee   :  { %2568 = vmatpush3.bf16.msra.mxu1 %v1080_v17  ;;  %2569 = vmatprep.mubr.msk.bf16.mxu1 %vm2712_vm0, %v2711_v0 }
 0x5ef   :  { %2581 = vmatprep.subr.bf16.mxu1 %v2711_v0 }
 0x5f1   :  { %2570 = vmatmul.mubr.msk.bf16.vlgmr.msra.gmra.mrb[20].mxu1 %vm210_vm2, %v531_v22  ;;  %v2346_v22 = vld [vmem:[%s3204_s2 + $0x58] sm:$0xff] }
 0x5f2   :  { %2585 = vmatprep.mubr.msk.bf16.mxu1 %vm2712_vm0, %v2711_v0  ;;  %2582 = vmatpush3.bf16.msra.mxu1 %v1186_v25  ;;  %v1187_v26 = vpack.c.bf16 %v2346_v22, %v2345_v21 }
 0x5f3   :  { %2583 = vmatprep.subr.bf16.mxu1 %v2711_v0 }
 0x5f6   :  { %2584 = vmatpush3.bf16.msra.mxu1 %v1187_v26 }
 0x5f7   :  { %2597 = vmatprep.subr.mxu1 %v2711_v0 }
 0x5f9   :  { %2586 = vmatmul.mubr.msk.bf16.vlgmr.msra.gmra.mrb[24].mxu1 %vm55_vm1, %v2817_v15 }
 0x5fa   :  { %2599 = vmatprep.mubr.msk.f32.mxu1 %vm2712_vm0, %v2711_v0 }
 0x6bc   :  { %v947_v27 = vpop.f32.mrb[10].mxu0 }
 0x6bd   :  { %v2555_v28 = vpop.f32.mrb[11].mxu0 }
 0x6c0   :  { %v1020_v31 = vpop.f32.mrb[18].mxu1 }
 0x6c1   :  { %v1024_v33 = vpack.c.bf16 %v1020_v31, %v947_v27  ;;  %v2560_v34 = vpop.f32.mrb[19].mxu1  ;;  %v2355_v27 = vld [vmem:[%s3209_s6 + $0x2] ss:$0 sm:$0xff] }
 0x6c3   :  { %2564 = vmatmul.mubr.msk.bf16.vlgmr.msra.gmra.mrb[20].mxu0 %vm210_vm2, %v1024_v33 }
 0x6c4   :  { %v1116_v37 = vpop.f32.mrb[20].mxu1  ;;  %2574 = vmatpush3.bf16.msra.mxu0 %v1128_v32  ;;  %2577 = vmatprep.mubr.msk.bf16.mxu0 %vm2712_vm0, %v2711_v0 }
 0x6c5   :  { %v2571_v39 = vpop.f32.mrb[21].mxu1  ;;  %2575 = vmatprep.subr.bf16.mxu0 %v2711_v0 }
 0x6c6   :  { %v1119_v40 = vpop.f32.mrb[22].mxu1  ;;  %v2363_v39 = vld [vmem:[%s3210_s7 + $0x10] sm:$0xff] }
 0x6c7   :  { %v2572_v41 = vpop.f32.mrb[23].mxu1 }
 0x6c8   :  { %2576 = vmatpush3.bf16.msra.mxu0 %v1129_v38 }
 0x6c9   :  { %2589 = vmatprep.subr.bf16.mxu0 %v2711_v0 }
 0x6cb   :  { %2578 = vmatmul.mubr.msk.bf16.vlgmr.msra.gmra.mrb[24].mxu0 %vm55_vm1, %v2817_v15 }
 0x6cc   :  { %2593 = vmatprep.mubr.msk.bf16.mxu0 %vm2712_vm0, %v2711_v0  ;;  %v1230_v43 = vpop.f32.mrb[24].mxu1  ;;  %2590 = vmatpush3.bf16.msra.mxu0 %v1242_v4 }
 0x6cd   :  { %v1231_v44 = vadd.f32 %v2348_v42, %v1230_v43  ;;  %v2587_v45 = vpop.f32.mrb[25].mxu1  ;;  %2591 = vmatprep.subr.bf16.mxu0 %v2711_v0  ;;  %v2366_v43 = vld [vmem:[%s3203_s1 + $0x68] sm:$0xff] }
 0x6ce   :  { %v1233_v46 = vpop.f32.mrb[26].mxu1  ;;  %v2367_v45 = vld [vmem:[%s3203_s1 + $0x70] sm:$0xff] }
 0x6cf   :  { %v1234_v47 = vadd.f32 %v2348_v42, %v1233_v46  ;;  %v2588_v48 = vpop.f32.mrb[27].mxu1  ;;  %2598 = vmatpush3.xpose.msk.msra.mxu1 %vm210_vm2, %v1231_v44  ;;  %v2365_v42 = vld [vmem:[%s3203_s1 + $0x60] sm:$0xff]  ;;  %v2368_v46 = vld [vmem:[%s3203_s1 + $0x78] sm:$0xff] }
 0x6d0   :  { %2602 = vmatprep.subr.mxu1 %v2711_v0  ;;  %2592 = vmatpush3.bf16.msra.mxu0 %v1243_v6  ;;  %v1671_v44 = vpack.c.bf16 %v2366_v43, %v2365_v42  ;;  %v2384_v43 = vld [vmem:[%s3209_s6 + $0x3] ss:$0 sm:$0xff] }
 0x6d1   :  { %2607 = vmatprep.subr.mxu0 %v2711_v0 }
 0x6d3   :  { %2594 = vmatmul.mubr.msk.bf16.vlgmr.msra.gmra.mrb[28].mxu0 %vm55_vm1, %v2817_v15 }
 0x6d4   :  { %2609 = vmatprep.mubr.msk.f32.mxu0 %vm2712_vm0, %v2711_v0 }
 0x796   :  { %v1069_v49 = vpop.f32.mrb[20].mxu0 }
 0x797   :  { %v3029_v50 = vadd.f32 %v1116_v37, %v1069_v49  ;;  %v2565_v51 = vpop.f32.mrb[21].mxu0 }
 0x798   :  { %v1072_v52 = vpop.f32.mrb[22].mxu0  ;;  %v2372_v51 = vld [vmem:[%s3204_s2 + $0x60] sm:$0xff] }
 0x799   :  { %v3031_v53 = vadd.f32 %v1119_v40, %v1072_v52  ;;  %v2566_v54 = vpop.f32.mrb[23].mxu0  ;;  %v1616_v40 = vpack.c.bf16 %v2363_v39, %v2363_v39  ;;  %v2373_v52 = vld [vmem:[%s3204_s2 + $0x68] sm:$0xff] }
 0x79b   :  { %v1621_v41 = vsel %vm1031_vm3, %v1616_v40, 0 }
 0x79e   :  { %v1172_v56 = vpop.f32.mrb[24].mxu0 }
 0x79f   :  { %v1173_v57 = vadd.f32 %v2341_v55, %v1172_v56  ;;  %v2579_v58 = vpop.f32.mrb[25].mxu0 }
 0x7a0   :  { %v1175_v59 = vpop.f32.mrb[26].mxu0  ;;  %v2374_v58 = vld [vmem:[%s3204_s2 + $0x70] sm:$0xff] }
 0x7a1   :  { %v1179_v60 = vmul.f32 0.35355338, %v1173_v57  ;;  %v1176_v61 = vadd.f32 %v2341_v55, %v1175_v59  ;;  %v2580_v62 = vpop.f32.mrb[27].mxu0  ;;  %v1729_v55 = vpack.c.bf16 %v2373_v52, %v2372_v51  ;;  %v2375_v59 = vld [vmem:[%s3204_s2 + $0x78] sm:$0xff] }
 0x7a3   :  { %2600 = vmatmul.mubr.msk.f32.vlgmr.msra.gmra.mrb[28].mxu1 %vm210_vm2, %v1179_v60  ;;  %v1180_v63 = vmul.f32 0.35355338, %v1176_v61  ;;  %v1730_v60 = vpack.c.bf16 %v2375_v59, %v2374_v58 }
 0x7a4   :  { %2603 = vmatpush3.xpose.msk.msra.mxu1 %vm210_vm2, %v1234_v47  ;;  %2604 = vmatprep.mubr.msk.f32.mxu1 %vm2712_vm0, %v2711_v0  ;;  %v1672_v47 = vpack.c.bf16 %v2368_v46, %v2367_v45 }
 0x7a5   :  { %2612 = vmatprep.subr.mxu1 %v2711_v0 }
 0x7a6   :  { %v1286_v26 = vpop.f32.mrb[28].mxu0 }
 0x7a7   :  { %2605 = vmatmul.mubr.msk.f32.vlgmr.msra.gmra.mrb[30].mxu1 %vm210_vm2, %v1180_v63  ;;  %v2595_v28 = vpop.f32.mrb[29].mxu0  ;;  %v1287_v29 = vadd.f32 %v2355_v27, %v1286_v26 }
 0x7a8   :  { %2614 = vmatprep.mubr.msk.f32.mxu1 %vm2712_vm0, %v2711_v0  ;;  %v1289_v30 = vpop.f32.mrb[30].mxu0 }
 0x7a9   :  { %v2596_v31 = vpop.f32.mrb[31].mxu0  ;;  %v1290_v32 = vadd.f32 %v2355_v27, %v1289_v30  ;;  %2608 = vmatpush3.msra.mxu0 %v1287_v29 }
 0x7aa   :  { %2617 = vmatprep.subr.bf16.mxu0 %v2711_v0 }
 0x7ab   :  { %2613 = vmatpush3.msra.mxu1 %v1290_v32 }
 0x7ac   :  { %2623 = vmatprep.subr.bf16.mxu1 %v2711_v0 }
 0x876   :  { %v1365_v7 = vpop.f32.mrb[28].mxu1 }
 0x877   :  { %v2601_v8 = vpop.f32.mrb[29].mxu1  ;;  %v1445_v9 = vsel %vm210_vm2, %v1365_v7, -inf }
 0x878   :  { %1446 = vmax.xlane.f32.xlu0 %v1445_v9  ;;  %v2370_v8 = vld [vmem:[%s3206_s4 + $0x3] ss:$0 sm:$0xff] }
 0x879   :  { %v2377_v9 = vld [vmem:[%s3207_s5 + $0x3] ss:$0 sm:$0xff] }
 0x87a   :  { %v1441_v10 = vpop.f32.mrb[30].mxu1 }
 0x87b   :  { %v2606_v11 = vpop.f32.mrb[31].mxu1  ;;  %v1448_v14 = vsel %vm210_vm2, %v1441_v10, -inf }
 0x87c   :  { %1449 = vmax.xlane.f32.xlu1 %v1448_v14 }
 0x905   :  { %v1447_v16 = vpop.xlane.xlu0 %1446 }
 0x906   :  { %v1451_v17 = vsub.f32 %v1365_v7, %v1447_v16 }
 0x908   :  { %v1453_v18 = vmul.f32 1.442695, %v1451_v17 }
 0x909   :  { %v1450_v20 = vpop.xlane.xlu1 %1449 }
 0x90a   :  { %2691 = vpow2.f32 %v1453_v18  ;;  %v1452_v23 = vsub.f32 %v1441_v10, %v1450_v20 }
 0x90c   :  { %v1455_v24 = vmul.f32 1.442695, %v1452_v23 }
 0x90e   :  { %2693 = vpow2.f32 %v1455_v24  ;;  %v2379_v24 = vld [vmem:[%s3208_s3 + $0x60] sm:$0xff] }
 0x914   :  { %v2692_v25 = vpop.eup %2691 }
 0x915   :  { %v1457_v19 = vsel %vm210_vm2, %v2692_v25, 0.0 }
 0x916   :  { %1458 = vadd.xlane.f32.xlu0 %v1457_v19  ;;  %v2381_v19 = vld [vmem:[%s3208_s3 + $0x70] sm:$0xff] }
 0x918   :  { %v2694_v21 = vpop.eup %2693 }
 0x919   :  { %v1460_v22 = vsel %vm210_vm2, %v2694_v21, 0.0 }
 0x91a   :  { %1461 = vadd.xlane.f32.xlu1 %v1460_v22  ;;  %v2382_v22 = vld [vmem:[%s3208_s3 + $0x78] sm:$0xff] }
 0x91b   :  { %v1786_v26 = vpack.c.bf16 %v2382_v22, %v2381_v19 }
 0x9a3   :  { %v1459_v33 = vpop.xlane.xlu0 %1458 }
 0x9a4   :  { %2695 = vrcp.f32 %v1459_v33 }
 0x9a7   :  { %v1462_v34 = vpop.xlane.xlu1 %1461 }
 0x9a8   :  { %2697 = vrcp.f32 %v1462_v34 }
 0x9ae   :  { %v2696_v35 = vpop.eup %2695 }
 0x9af   :  { %v1464_v36 = vmul.f32 %v2696_v35, %v2692_v25  ;;  %v2380_v25 = vld [vmem:[%s3208_s3 + $0x68] sm:$0xff] }
 0x9b1   :  { %2610 = vmatmul.mubr.msk.f32.vlgmr.msra.gmra.mrb[32].mxu0 %vm210_vm2, %v1464_v36 }
 0x9b2   :  { %v2698_v37 = vpop.eup %2697  ;;  %2619 = vmatprep.mubr.msk.bf16.mxu0 %vm2712_vm0, %v2711_v0  ;;  %2618 = vmatpush3.bf16.msra.mxu0 %v1621_v41 }
 0x9b3   :  { %v1466_v38 = vmul.f32 %v2698_v37, %v2694_v21  ;;  %2631 = vmatprep.subr.bf16.mxu0 %v2711_v0  ;;  %v1785_v21 = vpack.c.bf16 %v2380_v25, %v2379_v24 }
 0x9b5   :  { %2615 = vmatmul.mubr.msk.f32.vlgmr.msra.gmra.mrb[32].mxu1 %vm210_vm2, %v1466_v38 }
 0x9b6   :  { %2627 = vmatprep.mubr.msk.bf16.mxu1 %vm2712_vm0, %v2711_v0  ;;  %2624 = vmatpush3.bf16.msra.mxu1 %v1671_v44 }
 0x9b7   :  { %2625 = vmatprep.subr.bf16.mxu1 %v2711_v0 }
 0x9ba   :  { %2626 = vmatpush3.bf16.msra.mxu1 %v1672_v47 }
 0x9bb   :  { %2639 = vmatprep.subr.bf16.mxu1 %v2711_v0 }
 0x9bd   :  { %2628 = vmatmul.mubr.msk.bf16.vlgmr.msra.gmra.mrb[36].mxu1 %vm55_vm1, %v2817_v15 }
 0x9be   :  { %2643 = vmatprep.mubr.msk.bf16.mxu1 %vm2712_vm0, %v2711_v0  ;;  %2640 = vmatpush3.bf16.msra.mxu1 %v1785_v21 }
 0x9bf   :  { %2641 = vmatprep.subr.bf16.mxu1 %v2711_v0 }
 0x9c2   :  { %2642 = vmatpush3.bf16.msra.mxu1 %v1786_v26 }
 0x9c3   :  { %2657 = vmatprep.subr.mxu1 %v2711_v0 }
 0x9c5   :  { %2644 = vmatmul.mubr.msk.bf16.vlgmr.msra.gmra.mrb[40].mxu1 %vm55_vm1, %v2817_v15 }
 0x9c6   :  { %2659 = vmatprep.mubr.msk.f32.mxu1 %vm2712_vm0, %v2711_v0 }
 0xa84   :  { %v1536_v48 = vpop.f32.mrb[32].mxu0 }
 0xa85   :  { %v2611_v49 = vpop.f32.mrb[33].mxu0 }
 0xa88   :  { %v1609_v54 = vpop.f32.mrb[32].mxu1 }
 0xa89   :  { %v1613_v56 = vpack.c.bf16 %v1609_v54, %v1536_v48  ;;  %v2616_v57 = vpop.f32.mrb[33].mxu1 }
 0xa8a   :  { %v2392_v57 = vld [vmem:[%s3210_s7 + $0x18] sm:$0xff] }
 0xa8b   :  { %2620 = vmatmul.mubr.msk.bf16.vlgmr.msra.gmra.mrb[36].mxu0 %vm210_vm2, %v1613_v56  ;;  %v2159_v58 = vpack.c.bf16 %v2392_v57, %v2392_v57 }
 0xa8c   :  { %2632 = vmatpush3.bf16.msra.mxu0 %v1729_v55  ;;  %2635 = vmatprep.mubr.msk.bf16.mxu0 %vm2712_vm0, %v2711_v0 }
 0xa8d   :  { %2633 = vmatprep.subr.bf16.mxu0 %v2711_v0  ;;  %v2164_v59 = vsel %vm1031_vm3, %v2159_v58, 0  ;;  %v2396_v58 = vld [vmem:[%s3213_s10] ss:$0 sm:$0xff] }
 0xa90   :  { %2634 = vmatpush3.bf16.msra.mxu0 %v1730_v60  ;;  %v1715_v61 = vpop.f32.mrb[36].mxu1 }
 0xa91   :  { %2647 = vmatprep.subr.mxu0 %v2711_v0  ;;  %v2629_v62 = vpop.f32.mrb[37].mxu1  ;;  %v1716_v10 = vadd.f32 %v2370_v8, %v1715_v61 }
 0xa92   :  { %v1718_v63 = vpop.f32.mrb[38].mxu1 }
 0xa93   :  { %2636 = vmatmul.mubr.msk.bf16.vlgmr.msra.gmra.mrb[40].mxu0 %vm55_vm1, %v2817_v15  ;;  %v2630_v1 = vpop.f32.mrb[39].mxu1 }
 0xa94   :  { %2649 = vmatprep.mubr.msk.f32.mxu0 %vm2712_vm0, %v2711_v0 }
 0xa98   :  { %v1829_v42 = vpop.f32.mrb[40].mxu1 }
 0xa99   :  { %v2645_v44 = vpop.f32.mrb[41].mxu1  ;;  %v1830_v45 = vadd.f32 %v2384_v43, %v1829_v42 }
 0xa9a   :  { %v1832_v46 = vpop.f32.mrb[42].mxu1 }
 0xa9b   :  { %v2646_v47 = vpop.f32.mrb[43].mxu1  ;;  %v1833_v48 = vadd.f32 %v2384_v43, %v1832_v46  ;;  %2658 = vmatpush3.msra.mxu1 %v1830_v45 }
 0xa9c   :  { %2667 = vmatprep.subr.bf16.mxu1 %v2711_v0 }
 0xb5e   :  { %v1657_v2 = vpop.f32.mrb[36].mxu0 }
 0xb5f   :  { %v3122_v3 = vadd.f32 %v1657_v2, %v3029_v50  ;;  %v2621_v4 = vpop.f32.mrb[37].mxu0  ;;  %v1722_v50 = vmul.f32 0.35355338, %v1716_v10 }
 0xb60   :  { %v1660_v5 = vpop.f32.mrb[38].mxu0 }
 0xb61   :  { %v3125_v6 = vadd.f32 %v1660_v5, %v3031_v53  ;;  %v2622_v7 = vpop.f32.mrb[39].mxu0  ;;  %v1719_v53 = vadd.f32 %v2370_v8, %v1718_v63 }
 0xb63   :  { %v1723_v23 = vmul.f32 0.35355338, %v1719_v53 }
 0xb66   :  { %v1773_v11 = vpop.f32.mrb[40].mxu0 }
 0xb67   :  { %v1774_v14 = vadd.f32 %v2377_v9, %v1773_v11  ;;  %v2637_v16 = vpop.f32.mrb[41].mxu0 }
 0xb68   :  { %v1776_v17 = vpop.f32.mrb[42].mxu0 }
 0xb69   :  { %v2638_v18 = vpop.f32.mrb[43].mxu0  ;;  %2648 = vmatpush3.xpose.msk.msra.mxu0 %vm210_vm2, %v1774_v14  ;;  %v1777_v20 = vadd.f32 %v2377_v9, %v1776_v17 }
 0xb6a   :  { %2652 = vmatprep.subr.mxu0 %v2711_v0 }
 0xb6c   :  { %2650 = vmatmul.mubr.msk.f32.vlgmr.msra.gmra.mrb[34].mxu0 %vm210_vm2, %v1722_v50 }
 0xb6d   :  { %2653 = vmatpush3.xpose.msk.msra.mxu0 %vm210_vm2, %v1777_v20  ;;  %2654 = vmatprep.mubr.msk.f32.mxu0 %vm2712_vm0, %v2711_v0 }
 0xb6e   :  { %2662 = vmatprep.subr.mxu0 %v2711_v0 }
 0xb70   :  { %2655 = vmatmul.mubr.msk.f32.vlgmr.msra.gmra.mrb[44].mxu0 %vm210_vm2, %v1723_v23 }
 0xb71   :  { %2664 = vmatprep.mubr.msk.f32.mxu0 %vm2712_vm0, %v2711_v0  ;;  %2663 = vmatpush3.msra.mxu0 %v1833_v48 }
 0xc3f   :  { %v1908_v27 = vpop.f32.mrb[34].mxu0 }
 0xc40   :  { %v1988_v28 = vsel %vm210_vm2, %v1908_v27, -inf  ;;  %v2651_v29 = vpop.f32.mrb[35].mxu0 }
 0xc41   :  { %1989 = vmax.xlane.f32.xlu0 %v1988_v28 }
 0xc43   :  { %v1984_v30 = vpop.f32.mrb[44].mxu0 }
 0xc44   :  { %v2656_v31 = vpop.f32.mrb[45].mxu0  ;;  %v1991_v32 = vsel %vm210_vm2, %v1984_v30, -inf }
 0xc45   :  { %1992 = vmax.xlane.f32.xlu1 %v1991_v32 }
 0xcce   :  { %v1990_v33 = vpop.xlane.xlu0 %1989 }
 0xccf   :  { %v1994_v34 = vsub.f32 %v1908_v27, %v1990_v33 }
 0xcd1   :  { %v1996_v35 = vmul.f32 1.442695, %v1994_v34 }
 0xcd2   :  { %v1993_v36 = vpop.xlane.xlu1 %1992 }
 0xcd3   :  { %2699 = vpow2.f32 %v1996_v35  ;;  %v1995_v37 = vsub.f32 %v1984_v30, %v1993_v36 }
 0xcd5   :  { %v1998_v15 = vmul.f32 1.442695, %v1995_v37 }
 0xcd7   :  { %2701 = vpow2.f32 %v1998_v15 }
 0xcdd   :  { %v2700_v38 = vpop.eup %2699 }
 0xcde   :  { %v2000_v39 = vsel %vm210_vm2, %v2700_v38, 0.0 }
 0xcdf   :  { %2001 = vadd.xlane.f32.xlu0 %v2000_v39 }
 0xce1   :  { %v2702_v40 = vpop.eup %2701 }
 0xce2   :  { %v2003_v41 = vsel %vm210_vm2, %v2702_v40, 0.0 }
 0xce3   :  { %2004 = vadd.xlane.f32.xlu1 %v2003_v41 }
 0xd6c   :  { %v2002_v49 = vpop.xlane.xlu0 %2001 }
 0xd6d   :  { %2703 = vrcp.f32 %v2002_v49 }
 0xd70   :  { %v2005_v51 = vpop.xlane.xlu1 %2004 }
 0xd71   :  { %2705 = vrcp.f32 %v2005_v51 }
 0xd77   :  { %v2704_v52 = vpop.eup %2703 }
 0xd78   :  { %v2007_v54 = vmul.f32 %v2704_v52, %v2700_v38 }
 0xd7a   :  { %2660 = vmatmul.mubr.msk.f32.vlgmr.msra.gmra.mrb[34].mxu1 %vm210_vm2, %v2007_v54 }
 0xd7b   :  { %v2706_v55 = vpop.eup %2705  ;;  %2669 = vmatprep.mubr.msk.bf16.mxu1 %vm2712_vm0, %v2711_v0  ;;  %2668 = vmatpush3.bf16.msra.mxu1 %v2164_v59  ;;  %v2394_v0 = vld [vmem:[%s3211_s8] ss:$0 sm:$0xff] }
 0xd7c   :  { %v2009_v56 = vmul.f32 %v2706_v55, %v2702_v40  ;;  %v2395_v55 = vld [vmem:[%s3212_s9] ss:$0 sm:$0xff] }
 0xd7e   :  { %2665 = vmatmul.mubr.msk.f32.vlgmr.msra.gmra.mrb[46].mxu0 %vm210_vm2, %v2009_v56 }
 0xe4d   :  { %v2079_v60 = vpop.f32.mrb[34].mxu1 }
 0xe4e   :  { %v2661_v61 = vpop.f32.mrb[35].mxu1 }
 0xe51   :  { %v2152_v62 = vpop.f32.mrb[46].mxu0 }
 0xe52   :  { %v2156_v63 = vpack.c.bf16 %v2152_v62, %v2079_v60  ;;  %v2666_v1 = vpop.f32.mrb[47].mxu0 }
 0xe54   :  { %2670 = vmatmul.mubr.msk.bf16.vlgmr.msra.gmra.mrb[44].mxu1 %vm210_vm2, %v2156_v63 }
 0xf27   :  { %v2200_v2 = vpop.f32.mrb[44].mxu1 }
 0xf28   :  { %v2207_v4 = vadd.f32 %v2200_v2, %v3122_v3  ;;  %v2671_v5 = vpop.f32.mrb[45].mxu1 }
 0xf29   :  { %v2203_v7 = vpop.f32.mrb[46].mxu1 }
 0xf2a   :  { %v2216_v8 = vadd.f32 %v2394_v0, %v2207_v4  ;;  %v2208_v9 = vadd.f32 %v2203_v7, %v3125_v6  ;;  %v2672_v10 = vpop.f32.mrb[47].mxu1 }
 0xf2c   :  { %v2217_v11 = vadd.f32 %v2394_v0, %v2208_v9  ;;  %v2218_v14 = vadd.f32 %v2216_v8, %v2806_v12 }
 0xf2e   :  { %v2222_v16 = vsel %vm55_vm1, %v2218_v14, 0.0  ;;  %v2219_v50 = vadd.f32 %v2217_v11, %v2811_v13 }
 0xf2f   :  { %2223 = vadd.xlane.f32.xlu0 %v2222_v16 }
 0xf30   :  { %v2225_v17 = vsel %vm55_vm1, %v2219_v50, 0.0 }
 0xf31   :  { %2226 = vadd.xlane.f32.xlu1 %v2225_v17 }
 0xfbc   :  { %v2224_v18 = vpop.xlane.xlu0 %2223 }
 0xfbd   :  { %v2228_v53 = vrot.slane %v2224_v18, 4 }
 0xfbe   :  { %v2227_v3 = vpop.xlane.xlu1 %2226 }
 0xfbf   :  { %v2229_v20 = vadd.f32 %v2228_v53, %v2224_v18  ;;  %v2234_v23 = vrot.slane %v2227_v3, 4 }
 0xfc1   :  { %v2230_v24 = vrot.slane %v2229_v20, 2  ;;  %v2235_v25 = vadd.f32 %v2234_v23, %v2227_v3 }
 0xfc3   :  { %v2231_v6 = vadd.f32 %v2230_v24, %v2229_v20  ;;  %v2236_v19 = vrot.slane %v2235_v25, 2 }
 0xfc5   :  { %v2232_v21 = vrot.slane %v2231_v6, 1  ;;  %v2237_v22 = vadd.f32 %v2236_v19, %v2235_v25 }
 0xfc7   :  { %v2233_v12 = vadd.f32 %v2232_v21, %v2231_v6  ;;  %v2238_v26 = vrot.slane %v2237_v22, 1 }
 0xfc9   :  { %v2240_v27 = vmul.f32 0.00390625, %v2233_v12  ;;  %v2239_v28 = vadd.f32 %v2238_v26, %v2237_v22 }
 0xfcb   :  { %v2241_v13 = vmul.f32 0.00390625, %v2239_v28  ;;  %v2242_v29 = vsub.f32 %v2218_v14, %v2240_v27 }
 0xfcd   :  { %v2244_v30 = vmul.f32 %v2242_v29, %v2242_v29  ;;  %v2243_v31 = vsub.f32 %v2219_v50, %v2241_v13 }
 0xfcf   :  { %v2246_v32 = vsel %vm55_vm1, %v2244_v30, 0.0  ;;  %v2245_v33 = vmul.f32 %v2243_v31, %v2243_v31 }
 0xfd0   :  { %2247 = vadd.xlane.f32.xlu0 %v2246_v32 }
 0xfd1   :  { %v2249_v34 = vsel %vm55_vm1, %v2245_v33, 0.0 }
 0xfd2   :  { %2250 = vadd.xlane.f32.xlu1 %v2249_v34 }
0x105d   :  { %v2248_v35 = vpop.xlane.xlu0 %2247 }
0x105e   :  { %v2252_v36 = vrot.slane %v2248_v35, 4 }
0x105f   :  { %v2251_v37 = vpop.xlane.xlu1 %2250 }
0x1060   :  { %v2253_v15 = vadd.f32 %v2252_v36, %v2248_v35  ;;  %v2258_v38 = vrot.slane %v2251_v37, 4 }
0x1062   :  { %v2254_v39 = vrot.slane %v2253_v15, 2  ;;  %v2259_v40 = vadd.f32 %v2258_v38, %v2251_v37 }
0x1064   :  { %v2255_v41 = vadd.f32 %v2254_v39, %v2253_v15  ;;  %v2260_v42 = vrot.slane %v2259_v40, 2 }
0x1066   :  { %v2256_v43 = vrot.slane %v2255_v41, 1  ;;  %v2261_v44 = vadd.f32 %v2260_v42, %v2259_v40 }
0x1068   :  { %v2257_v45 = vadd.f32 %v2256_v43, %v2255_v41  ;;  %v2262_v46 = vrot.slane %v2261_v44, 1 }
0x106a   :  { %v2264_v47 = vmul.f32 0.00390625, %v2257_v45  ;;  %v2263_v48 = vadd.f32 %v2262_v46, %v2261_v44 }
0x106c   :  { %v2266_v49 = vadd.f32 1e-05, %v2264_v47  ;;  %v2265_v51 = vmul.f32 0.00390625, %v2263_v48 }
0x106e   :  { %2707 = vrsqrt.f32 %v2266_v49  ;;  %v2267_v52 = vadd.f32 1e-05, %v2265_v51 }
0x1070   :  { %2709 = vrsqrt.f32 %v2267_v52 }
0x1078   :  { %v2708_v54 = vpop.eup %2707 }
0x1079   :  { %v2270_v56 = vmul.f32 %v2708_v54, %v2242_v29 }
0x107a   :  { %v2710_v57 = vpop.eup %2709 }
0x107b   :  { %v2278_v59 = vmul.f32 %v2395_v55, %v2270_v56  ;;  %v2271_v60 = vmul.f32 %v2710_v57, %v2243_v31 }
0x107d   :  { %v2286_v61 = vadd.f32 %v2396_v58, %v2278_v59  ;;  %v2279_v62 = vmul.f32 %v2395_v55, %v2271_v60 }
0x107f   :  { %2288 = vst.msk [vmem:[%s3214_s11] sm:$0xff] %vm55_vm1, %v2286_v61  ;;  %v2287_v63 = vadd.f32 %v2396_v58, %v2279_v62 }
0x1081   :  { %2289 = vst.msk [vmem:[%s3214_s11 + $0x8] sm:$0xff] %vm55_vm1, %v2287_v63 }

</bundles_post_ra>
